<compile_context>
chip_gen: v6e
topology: v6e:2x2x1
jax: 0.10.0
libtpu: 0.0.40
codegen_flags: <defaults>
</compile_context>

<pallas_src>
import functools

import jax
import jax.numpy as jnp
from jax.experimental import pallas as pl
from jax.experimental.pallas import tpu as pltpu

_BN_EPS = 1e-5
_LANE = 128


def _rup(n, m):
    return ((n + m - 1) // m) * m


# ---------- kernel 1: SE squeeze/excite + bn1+relu -> 3x3 conv1 + shortcut ----

def _conv1_se_kernel(stride, has_se_conv, has_shortcut, inv_hw, se_rows,
                     m_rows, *refs):
    it = iter(refs)
    x_ref = next(it)
    scale_ref = next(it)
    shift_ref = next(it)
    w_ref = next(it)
    if has_se_conv:
        se_w_ref = next(it)
        se_scale_ref = next(it)
        se_shift_ref = next(it)
    w1_ref = next(it)
    w2_ref = next(it)
    if has_shortcut:
        wsc_ref = next(it)
    c1_ref = next(it)
    pse_ref = next(it)
    if has_shortcut:
        sc_ref = next(it)
    xp_ref = next(it)

    _, H, W, cin = x_ref.shape
    _, Ho, Wo, cout = c1_ref.shape

    x3 = x_ref[0]                                           # (H, W, cin) bf16

    # ---- SE squeeze: mean_spatial(relu(bn_se(x @ Wse)))  (raw x per spec) ---
    # Accumulated over spatial row chunks so the (rows*W, cout) f32
    # intermediate never exceeds the vreg file.
    pooled = jnp.zeros((1, cout), jnp.float32)
    for r0 in range(0, H, se_rows):
        rc = min(se_rows, H - r0)
        xc = x3[r0:r0 + rc].reshape(rc * W, cin)            # bf16
        if has_se_conv:
            y = jnp.dot(xc, se_w_ref[...], preferred_element_type=jnp.float32)
            y = jnp.maximum(y * se_scale_ref[...] + se_shift_ref[...], 0.0)
        else:
            y = xc.astype(jnp.float32)                      # identity SE path
        pooled = pooled + jnp.sum(y, axis=0, keepdims=True)
    pooled = pooled * inv_hw
    # excite: fc1 -> relu -> fc2 -> sigmoid
    h = jnp.maximum(
        jnp.dot(pooled, w1_ref[...], preferred_element_type=jnp.float32), 0.0)
    z = jnp.dot(h, w2_ref[...], preferred_element_type=jnp.float32)
    pse_ref[0] = 1.0 / (1.0 + jnp.exp(-z))

    # ---- pre-activation: relu(bn1(x)) into the halo scratch -----------------
    a = jnp.maximum(x3.astype(jnp.float32) * scale_ref[0] + shift_ref[0], 0.0)
    a = a.astype(xp_ref.dtype)

    # zero ONLY the 1-px border (cheap strips, not the whole scratch)
    zrow = jnp.zeros((1, W + 2, cin), xp_ref.dtype)
    zcol = jnp.zeros((H, 1, cin), xp_ref.dtype)
    xp_ref[0:1, :, :] = zrow
    xp_ref[H + 1:H + 2, :, :] = zrow
    xp_ref[1:H + 1, 0:1, :] = zcol
    xp_ref[1:H + 1, W + 1:W + 2, :] = zcol
    xp_ref[1:H + 1, 1:W + 1, :] = a

    # ---- strided 3x3 conv1 (+ strided 1x1 shortcut), M-tiled accumulator ----
    for r0 in range(0, Ho, m_rows):
        rc = min(m_rows, Ho - r0)
        acc = jnp.zeros((rc * Wo, cout), jnp.float32)
        sc_acc = None
        for ky in range(3):
            for kx in range(3):
                if stride == 1:
                    patch = xp_ref[ky + r0:ky + r0 + rc, kx:kx + Wo, :]
                else:
                    # stride folded into the tap loads
                    patch = xp_ref[pl.ds(ky + r0 * stride, rc, stride),
                                   pl.ds(kx, Wo, stride), :]
                patch = patch.reshape(rc * Wo, cin).astype(jnp.bfloat16)
                acc = acc + jnp.dot(patch, w_ref[ky * 3 + kx],
                                    preferred_element_type=jnp.float32)
                if has_shortcut and ky == 1 and kx == 1:
                    # tap (1,1) is exactly the strided 1x1 shortcut input
                    sc_acc = jnp.dot(patch, wsc_ref[...],
                                     preferred_element_type=jnp.float32)
        c1_ref[0:1, r0:r0 + rc, :, :] = (
            acc.reshape(1, rc, Wo, cout).astype(c1_ref.dtype))
        if has_shortcut:
            sc_ref[0:1, r0:r0 + rc, :, :] = (
                sc_acc.reshape(1, rc, Wo, cout).astype(sc_ref.dtype))


def conv1_se_forward(x, bn1_scale, bn1_shift, w9, se_w, se_scale, se_shift,
                     w1, w2, sc_w, stride):
    B, H, W, cin_p = x.shape
    cout = w9.shape[-1]
    cr = w1.shape[-1]
    Ho = (H - 1) // stride + 1
    Wo = (W - 1) // stride + 1
    has_se_conv = se_w is not None
    has_shortcut = sc_w is not None

    # chunk sizes: SE over input rows, conv accumulator over output rows
    se_rows = max(1, min(H, 512 // W))
    m_rows = max(1, min(Ho, 256 // Wo))

    inputs = [x, bn1_scale, bn1_shift, w9]
    in_specs = [
        pl.BlockSpec((1, H, W, cin_p), lambda b: (b, 0, 0, 0)),
        pl.BlockSpec((1, cin_p), lambda b: (0, 0)),
        pl.BlockSpec((1, cin_p), lambda b: (0, 0)),
        pl.BlockSpec((9, cin_p, cout), lambda b: (0, 0, 0)),
    ]
    if has_se_conv:
        inputs += [se_w, se_scale, se_shift]
        in_specs += [pl.BlockSpec((cin_p, cout), lambda b: (0, 0)),
                     pl.BlockSpec((1, cout), lambda b: (0, 0)),
                     pl.BlockSpec((1, cout), lambda b: (0, 0))]
    inputs += [w1, w2]
    in_specs += [pl.BlockSpec((cout, cr), lambda b: (0, 0)),
                 pl.BlockSpec((cr, cout), lambda b: (0, 0))]
    if has_shortcut:
        inputs.append(sc_w)
        in_specs.append(pl.BlockSpec((cin_p, cout), lambda b: (0, 0)))

    out_shape = [jax.ShapeDtypeStruct((B, Ho, Wo, cout), jnp.bfloat16),
                 jax.ShapeDtypeStruct((B, 1, cout), jnp.float32)]
    out_specs = [pl.BlockSpec((1, Ho, Wo, cout), lambda b: (b, 0, 0, 0)),
                 pl.BlockSpec((1, 1, cout), lambda b: (b, 0, 0))]
    if has_shortcut:
        out_shape.append(jax.ShapeDtypeStruct((B, Ho, Wo, cout), jnp.bfloat16))
        out_specs.append(pl.BlockSpec((1, Ho, Wo, cout),
                                      lambda b: (b, 0, 0, 0)))

    res = pl.pallas_call(
        functools.partial(_conv1_se_kernel, stride, has_se_conv, has_shortcut,
                          1.0 / (H * W), se_rows, m_rows),
        out_shape=out_shape,
        grid=(B,),
        in_specs=in_specs,
        out_specs=out_specs,
        scratch_shapes=[pltpu.VMEM((H + 2, W + 2, cin_p), jnp.float32)],
        compiler_params=pltpu.CompilerParams(
            dimension_semantics=("parallel",)),
    )(*inputs)

    if has_shortcut:
        c1, pse, shortcut = res
    else:
        c1, pse = res
        shortcut = None
    return c1, pse, shortcut


# ------------- kernel 2: bn2+relu -> 3x3 conv2 -> *PSE + shortcut ------------

def _conv2_kernel(m_rows, x_ref, scale_ref, shift_ref, w_ref, pse_ref,
                  res_ref, o_ref, xp_ref):
    _, Ho, Wo, cp = o_ref.shape

    a = jnp.maximum(
        x_ref[0].astype(jnp.float32) * scale_ref[0] + shift_ref[0], 0.0)
    a = a.astype(xp_ref.dtype)

    # zero ONLY the 1-px border strips
    zrow = jnp.zeros((1, Wo + 2, cp), xp_ref.dtype)
    zcol = jnp.zeros((Ho, 1, cp), xp_ref.dtype)
    xp_ref[0:1, :, :] = zrow
    xp_ref[Ho + 1:Ho + 2, :, :] = zrow
    xp_ref[1:Ho + 1, 0:1, :] = zcol
    xp_ref[1:Ho + 1, Wo + 1:Wo + 2, :] = zcol
    xp_ref[1:Ho + 1, 1:Wo + 1, :] = a

    pse = pse_ref[0]                                        # (1, cp) f32

    for r0 in range(0, Ho, m_rows):
        rc = min(m_rows, Ho - r0)
        acc = jnp.zeros((rc * Wo, cp), jnp.float32)
        for ky in range(3):
            for kx in range(3):
                patch = xp_ref[ky + r0:ky + r0 + rc, kx:kx + Wo, :]
                patch = patch.reshape(rc * Wo, cp).astype(jnp.bfloat16)
                acc = acc + jnp.dot(patch, w_ref[ky * 3 + kx],
                                    preferred_element_type=jnp.float32)
        # fused epilogue: SE channel scale + residual add
        res = res_ref[0:1, r0:r0 + rc, :, :].reshape(rc * Wo, cp)
        out = acc * pse + res.astype(jnp.float32)
        o_ref[0:1, r0:r0 + rc, :, :] = (
            out.reshape(1, rc, Wo, cp).astype(o_ref.dtype))


def conv2_forward(c1, bn2_scale, bn2_shift, w9, pse, shortcut):
    B, Ho, Wo, cp = c1.shape
    m_rows = max(1, min(Ho, 256 // Wo))
    return pl.pallas_call(
        functools.partial(_conv2_kernel, m_rows),
        out_shape=jax.ShapeDtypeStruct((B, Ho, Wo, cp), jnp.bfloat16),
        grid=(B,),
        in_specs=[
            pl.BlockSpec((1, Ho, Wo, cp), lambda b: (b, 0, 0, 0)),
            pl.BlockSpec((1, cp), lambda b: (0, 0)),
            pl.BlockSpec((1, cp), lambda b: (0, 0)),
            pl.BlockSpec((9, cp, cp), lambda b: (0, 0, 0)),
            pl.BlockSpec((1, 1, cp), lambda b: (b, 0, 0)),
            pl.BlockSpec((1, Ho, Wo, cp), lambda b: (b, 0, 0, 0)),
        ],
        out_specs=pl.BlockSpec((1, Ho, Wo, cp), lambda b: (b, 0, 0, 0)),
        scratch_shapes=[pltpu.VMEM((Ho + 2, Wo + 2, cp), jnp.float32)],
        compiler_params=pltpu.CompilerParams(
            dimension_semantics=("parallel",)),
    )(c1, bn2_scale, bn2_shift, w9, pse, shortcut)


# ------------------------------ param preparation ---------------------------

def _fold_bn(bn, c_pad):
    # eval-mode BN folded to y = x*scale + shift; padded channels map to 0.
    scale = bn["gamma"] * jax.lax.rsqrt(bn["var"] + _BN_EPS)
    shift = bn["beta"] - bn["mean"] * scale
    pad = ((0, 0), (0, c_pad - scale.shape[-1]))
    return jnp.pad(scale, pad), jnp.pad(shift, pad)


def _pad2(w, r_pad, c_pad, dtype):
    r, c = w.shape
    return jnp.pad(w, ((0, r_pad - r), (0, c_pad - c))).astype(dtype)


def _prep_conv_w(w, cin_pad, cout_pad):
    kh, kw, ci, co = w.shape
    w = jnp.pad(w, ((0, 0), (0, 0), (0, cin_pad - ci), (0, cout_pad - co)))
    return w.reshape(kh * kw, cin_pad, cout_pad).astype(jnp.bfloat16)


# ------------------------------ module forward ------------------------------

def cpse_preact_block(x_nchw, params, in_planes, planes, stride):
    """Forward pass of CPSEPreActBlock. Input NCHW, output NCHW."""
    cin_p = _rup(in_planes, _LANE)
    cp = _rup(planes, _LANE)

    x = jnp.transpose(x_nchw, (0, 2, 3, 1))                         # NHWC
    B, H, W, _ = x.shape
    # channel-pad + bf16 activations in HBM (BN still applied in f32 in-kernel)
    x = jnp.pad(x, ((0, 0), (0, 0), (0, 0),
                    (0, cin_p - in_planes))).astype(jnp.bfloat16)

    has_se_conv = in_planes != planes
    has_shortcut = (stride != 1) or (in_planes != planes)

    bn1_scale, bn1_shift = _fold_bn(params["bn1"], cin_p)
    w9_1 = _prep_conv_w(params["conv1_w"], cin_p, cp)
    se_w = se_scale = se_shift = None
    if has_se_conv:
        se_w = _pad2(params["se_conv_w"], cin_p, cp, jnp.bfloat16)
        se_scale, se_shift = _fold_bn(params["se_bn"], cp)
    w1 = jnp.pad(params["se_fc1_w"], ((0, cp - planes), (0, 0)))
    w2 = jnp.pad(params["se_fc2_w"], ((0, 0), (0, cp - planes)))
    sc_w = (_pad2(params["sc_w"], cin_p, cp, jnp.bfloat16)
            if has_shortcut else None)

    # ---- kernel 1: SE (PSE) + conv1 + shortcut (x read from HBM once) ----
    c1, pse, shortcut = conv1_se_forward(
        x, bn1_scale, bn1_shift, w9_1, se_w, se_scale, se_shift,
        w1, w2, sc_w, stride)
    if shortcut is None:
        shortcut = x                # identity shortcut (cin_p == cp, stride 1)

    # ---- kernel 2: conv2 (fused bn2+relu) + SE scale + residual add ----
    bn2_scale, bn2_shift = _fold_bn(params["bn2"], cp)
    w9_2 = _prep_conv_w(params["conv2_w"], cp, cp)
    out = conv2_forward(c1, bn2_scale, bn2_shift, w9_2, pse, shortcut)  # bf16

    out = out[..., :planes].astype(jnp.float32)        # drop channel padding
    return jnp.transpose(out, (0, 3, 1, 2))            # back to NCHW


# ------------------------------ params ------------------------------

def init_params(key, in_planes, planes, stride, reduction):
    ks = list(jax.random.split(key, 9))

    def w(k, shape, fan_in):
        return (jax.random.normal(k, shape, jnp.float32) /
                jnp.sqrt(jnp.float32(fan_in)))

    def bn(k, c):
        k1, k2, k3, k4 = jax.random.split(k, 4)
        return dict(
            gamma=1.0 + 0.1 * jax.random.normal(k1, (1, c), jnp.float32),
            beta=0.1 * jax.random.normal(k2, (1, c), jnp.float32),
            mean=0.1 * jax.random.normal(k3, (1, c), jnp.float32),
            var=1.0 + 0.1 * jax.random.uniform(k4, (1, c), jnp.float32),
        )

    p = {
        "bn1": bn(ks[0], in_planes),
        # conv weights stored as (kh, kw, Cin, Cout)
        "conv1_w": w(ks[1], (3, 3, in_planes, planes), 9 * in_planes),
        "bn2": bn(ks[2], planes),
        "conv2_w": w(ks[3], (3, 3, planes, planes), 9 * planes),
    }
    if stride != 1 or in_planes != planes:
        p["sc_w"] = w(ks[4], (in_planes, planes), in_planes)
    if in_planes != planes:
        p["se_conv_w"] = w(ks[5], (in_planes, planes), in_planes)
        p["se_bn"] = bn(ks[6], planes)
    cr = max(planes // reduction, 1)
    p["se_fc1_w"] = w(ks[7], (planes, cr), planes)  # Linear(C, C//r).weight.T
    p["se_fc2_w"] = w(ks[8], (cr, planes), cr)      # Linear(C//r, C).weight.T
    return p


# ------------------------------ main ------------------------------

if __name__ == "__main__":
    B, in_planes, planes = 2, 16, 32
    H = W = 16
    stride, reduction = 2, 16

    key = jax.random.PRNGKey(0)
    k_params, k_x = jax.random.split(key)
    params = init_params(k_params, in_planes, planes, stride, reduction)
    x = jax.random.normal(k_x, (B, in_planes, H, W), jnp.float32)   # NCHW

    fwd = jax.jit(functools.partial(cpse_preact_block, in_planes=in_planes,
                                    planes=planes, stride=stride))
    out = jax.block_until_ready(fwd(x, params))

    expected = (B, planes, H // stride, W // stride)
    assert out.shape == expected, (out.shape, expected)
    assert bool(jnp.all(jnp.isfinite(out)))
    print("KERNEL_OK")
</pallas_src>

<mosaic_0001>
module attributes {stable_mosaic.version = 11 : i64} {
  func.func @_conv2_kernel(%arg0: i32, %arg1: memref<1x8x8x128xbf16, #tpu.memory_space<vmem>>, %arg2: memref<1x128xf32, #tpu.memory_space<vmem>>, %arg3: memref<1x128xf32, #tpu.memory_space<vmem>>, %arg4: memref<9x128x128xbf16, #tpu.memory_space<vmem>>, %arg5: memref<1x1x128xf32, #tpu.memory_space<vmem>>, %arg6: memref<1x8x8x128xbf16, #tpu.memory_space<vmem>>, %arg7: memref<1x8x8x128xbf16, #tpu.memory_space<vmem>>, %arg8: memref<10x10x128xf32, #tpu.memory_space<vmem>>) attributes {dimension_semantics = [#tpu.dimension_semantics<parallel>], iteration_bounds = array<i64: 2>, scalar_prefetch = 0 : i64, scratch_operands = 1 : i64, tpu.core_type = #tpu.core_type<tc>, window_params = [{transform_indices = @transform_0, window_bounds = array<i64: 1, 8, 8, 128>}, {pipeline_mode = #tpu.pipeline_mode<synchronous>, transform_indices = @transform_1, window_bounds = array<i64: 1, 128>}, {pipeline_mode = #tpu.pipeline_mode<synchronous>, transform_indices = @transform_2, window_bounds = array<i64: 1, 128>}, {pipeline_mode = #tpu.pipeline_mode<synchronous>, transform_indices = @transform_3, window_bounds = array<i64: 9, 128, 128>}, {transform_indices = @transform_4, window_bounds = array<i64: 1, 1, 128>}, {transform_indices = @transform_5, window_bounds = array<i64: 1, 8, 8, 128>}, {transform_indices = @transform_6, window_bounds = array<i64: 1, 8, 8, 128>}]} {
    %c0 = arith.constant 0 : index
    %c0_0 = arith.constant 0 : index
    %c0_1 = arith.constant 0 : index
    %c0_2 = arith.constant 0 : index
    %0 = vector.load %arg1[%c0, %c0_0, %c0_1, %c0_2] : memref<1x8x8x128xbf16, #tpu.memory_space<vmem>>, vector<1x8x8x128xbf16>
    %1 = vector.shape_cast %0 : vector<1x8x8x128xbf16> to vector<8x8x128xbf16>
    %2 = arith.extf %1 : vector<8x8x128xbf16> to vector<8x8x128xf32>
    %c0_3 = arith.constant 0 : index
    %c0_4 = arith.constant 0 : index
    %3 = vector.load %arg2[%c0_3, %c0_4] : memref<1x128xf32, #tpu.memory_space<vmem>>, vector<1x128xf32>
    %4 = vector.shape_cast %3 : vector<1x128xf32> to vector<128xf32>
    %5 = vector.shape_cast %4 : vector<128xf32> to vector<1x1x128xf32>
    %6 = vector.broadcast %5 : vector<1x1x128xf32> to vector<8x8x128xf32>
    %7 = arith.mulf %2, %6 : vector<8x8x128xf32>
    %c0_5 = arith.constant 0 : index
    %c0_6 = arith.constant 0 : index
    %8 = vector.load %arg3[%c0_5, %c0_6] : memref<1x128xf32, #tpu.memory_space<vmem>>, vector<1x128xf32>
    %9 = vector.shape_cast %8 : vector<1x128xf32> to vector<128xf32>
    %10 = vector.shape_cast %9 : vector<128xf32> to vector<1x1x128xf32>
    %11 = vector.broadcast %10 : vector<1x1x128xf32> to vector<8x8x128xf32>
    %12 = arith.addf %7, %11 : vector<8x8x128xf32>
    %cst = arith.constant 0.000000e+00 : f32
    %13 = vector.broadcast %cst : f32 to vector<8x8x128xf32>
    %14 = arith.maximumf %12, %13 : vector<8x8x128xf32>
    %cst_7 = arith.constant 0.000000e+00 : f32
    %15 = vector.broadcast %cst_7 : f32 to vector<1x10x128xf32>
    %cst_8 = arith.constant 0.000000e+00 : f32
    %16 = vector.broadcast %cst_8 : f32 to vector<8x1x128xf32>
    %c0_9 = arith.constant 0 : index
    %c0_10 = arith.constant 0 : index
    %c0_11 = arith.constant 0 : index
    %17 = vector.load %arg8[%c0_9, %c0_10, %c0_11] : memref<10x10x128xf32, #tpu.memory_space<vmem>>, vector<1x10x128xf32>
    tpu.vector_store %arg8[%c0_9, %c0_10, %c0_11], %15 {strides = array<i32>} : memref<10x10x128xf32, #tpu.memory_space<vmem>>, vector<1x10x128xf32>,
    %c9 = arith.constant 9 : index
    %c0_12 = arith.constant 0 : index
    %c0_13 = arith.constant 0 : index
    %18 = vector.load %arg8[%c9, %c0_12, %c0_13] : memref<10x10x128xf32, #tpu.memory_space<vmem>>, vector<1x10x128xf32>
    tpu.vector_store %arg8[%c9, %c0_12, %c0_13], %15 {strides = array<i32>} : memref<10x10x128xf32, #tpu.memory_space<vmem>>, vector<1x10x128xf32>,
    %c1 = arith.constant 1 : index
    %c0_14 = arith.constant 0 : index
    %c0_15 = arith.constant 0 : index
    %19 = vector.load %arg8[%c1, %c0_14, %c0_15] : memref<10x10x128xf32, #tpu.memory_space<vmem>>, vector<8x1x128xf32>
    tpu.vector_store %arg8[%c1, %c0_14, %c0_15], %16 {strides = array<i32>} : memref<10x10x128xf32, #tpu.memory_space<vmem>>, vector<8x1x128xf32>,
    %c1_16 = arith.constant 1 : index
    %c9_17 = arith.constant 9 : index
    %c0_18 = arith.constant 0 : index
    %20 = vector.load %arg8[%c1_16, %c9_17, %c0_18] : memref<10x10x128xf32, #tpu.memory_space<vmem>>, vector<8x1x128xf32>
    tpu.vector_store %arg8[%c1_16, %c9_17, %c0_18], %16 {strides = array<i32>} : memref<10x10x128xf32, #tpu.memory_space<vmem>>, vector<8x1x128xf32>,
    %c1_19 = arith.constant 1 : index
    %c1_20 = arith.constant 1 : index
    %c0_21 = arith.constant 0 : index
    %21 = vector.load %arg8[%c1_19, %c1_20, %c0_21] : memref<10x10x128xf32, #tpu.memory_space<vmem>>, vector<8x8x128xf32>
    tpu.vector_store %arg8[%c1_19, %c1_20, %c0_21], %14 {strides = array<i32>} : memref<10x10x128xf32, #tpu.memory_space<vmem>>, vector<8x8x128xf32>,
    %c0_22 = arith.constant 0 : index
    %c0_23 = arith.constant 0 : index
    %c0_24 = arith.constant 0 : index
    %22 = vector.load %arg5[%c0_22, %c0_23, %c0_24] : memref<1x1x128xf32, #tpu.memory_space<vmem>>, vector<1x1x128xf32>
    %23 = vector.shape_cast %22 : vector<1x1x128xf32> to vector<1x128xf32>
    %cst_25 = arith.constant 0.000000e+00 : f32
    %24 = vector.broadcast %cst_25 : f32 to vector<64x128xf32>
    %c0_26 = arith.constant 0 : index
    %c0_27 = arith.constant 0 : index
    %c0_28 = arith.constant 0 : index
    %25 = vector.load %arg8[%c0_26, %c0_27, %c0_28] : memref<10x10x128xf32, #tpu.memory_space<vmem>>, vector<8x8x128xf32>
    %26 = vector.shape_cast %25 : vector<8x8x128xf32> to vector<64x128xf32>
    %27 = arith.truncf %26 : vector<64x128xf32> to vector<64x128xbf16>
    %c0_29 = arith.constant 0 : index
    %c0_30 = arith.constant 0 : index
    %c0_31 = arith.constant 0 : index
    %28 = vector.load %arg4[%c0_29, %c0_30, %c0_31] : memref<9x128x128xbf16, #tpu.memory_space<vmem>>, vector<1x128x128xbf16>
    %29 = vector.shape_cast %28 : vector<1x128x128xbf16> to vector<128x128xbf16>
    %cst_32 = arith.constant dense<0.000000e+00> : vector<64x128xf32>
    %30 = tpu.matmul %27, %29, %cst_32 {dimension_numbers = #tpu.dot_dimension_numbers<[1], [0], [0], [1], [0, 0, 1, 1], [], []>} : vector<64x128xbf16>, vector<128x128xbf16>, vector<64x128xf32> -> vector<64x128xf32>
    %31 = arith.addf %24, %30 : vector<64x128xf32>
    %c0_33 = arith.constant 0 : index
    %c1_34 = arith.constant 1 : index
    %c0_35 = arith.constant 0 : index
    %32 = vector.load %arg8[%c0_33, %c1_34, %c0_35] : memref<10x10x128xf32, #tpu.memory_space<vmem>>, vector<8x8x128xf32>
    %33 = vector.shape_cast %32 : vector<8x8x128xf32> to vector<64x128xf32>
    %34 = arith.truncf %33 : vector<64x128xf32> to vector<64x128xbf16>
    %c1_36 = arith.constant 1 : index
    %c0_37 = arith.constant 0 : index
    %c0_38 = arith.constant 0 : index
    %35 = vector.load %arg4[%c1_36, %c0_37, %c0_38] : memref<9x128x128xbf16, #tpu.memory_space<vmem>>, vector<1x128x128xbf16>
    %36 = vector.shape_cast %35 : vector<1x128x128xbf16> to vector<128x128xbf16>
    %cst_39 = arith.constant dense<0.000000e+00> : vector<64x128xf32>
    %37 = tpu.matmul %34, %36, %cst_39 {dimension_numbers = #tpu.dot_dimension_numbers<[1], [0], [0], [1], [0, 0, 1, 1], [], []>} : vector<64x128xbf16>, vector<128x128xbf16>, vector<64x128xf32> -> vector<64x128xf32>
    %38 = arith.addf %31, %37 : vector<64x128xf32>
    %c0_40 = arith.constant 0 : index
    %c2 = arith.constant 2 : index
    %c0_41 = arith.constant 0 : index
    %39 = vector.load %arg8[%c0_40, %c2, %c0_41] : memref<10x10x128xf32, #tpu.memory_space<vmem>>, vector<8x8x128xf32>
    %40 = vector.shape_cast %39 : vector<8x8x128xf32> to vector<64x128xf32>
    %41 = arith.truncf %40 : vector<64x128xf32> to vector<64x128xbf16>
    %c2_42 = arith.constant 2 : index
    %c0_43 = arith.constant 0 : index
    %c0_44 = arith.constant 0 : index
    %42 = vector.load %arg4[%c2_42, %c0_43, %c0_44] : memref<9x128x128xbf16, #tpu.memory_space<vmem>>, vector<1x128x128xbf16>
    %43 = vector.shape_cast %42 : vector<1x128x128xbf16> to vector<128x128xbf16>
    %cst_45 = arith.constant dense<0.000000e+00> : vector<64x128xf32>
    %44 = tpu.matmul %41, %43, %cst_45 {dimension_numbers = #tpu.dot_dimension_numbers<[1], [0], [0], [1], [0, 0, 1, 1], [], []>} : vector<64x128xbf16>, vector<128x128xbf16>, vector<64x128xf32> -> vector<64x128xf32>
    %45 = arith.addf %38, %44 : vector<64x128xf32>
    %c1_46 = arith.constant 1 : index
    %c0_47 = arith.constant 0 : index
    %c0_48 = arith.constant 0 : index
    %46 = vector.load %arg8[%c1_46, %c0_47, %c0_48] : memref<10x10x128xf32, #tpu.memory_space<vmem>>, vector<8x8x128xf32>
    %47 = vector.shape_cast %46 : vector<8x8x128xf32> to vector<64x128xf32>
    %48 = arith.truncf %47 : vector<64x128xf32> to vector<64x128xbf16>
    %c3 = arith.constant 3 : index
    %c0_49 = arith.constant 0 : index
    %c0_50 = arith.constant 0 : index
    %49 = vector.load %arg4[%c3, %c0_49, %c0_50] : memref<9x128x128xbf16, #tpu.memory_space<vmem>>, vector<1x128x128xbf16>
    %50 = vector.shape_cast %49 : vector<1x128x128xbf16> to vector<128x128xbf16>
    %cst_51 = arith.constant dense<0.000000e+00> : vector<64x128xf32>
    %51 = tpu.matmul %48, %50, %cst_51 {dimension_numbers = #tpu.dot_dimension_numbers<[1], [0], [0], [1], [0, 0, 1, 1], [], []>} : vector<64x128xbf16>, vector<128x128xbf16>, vector<64x128xf32> -> vector<64x128xf32>
    %52 = arith.addf %45, %51 : vector<64x128xf32>
    %c1_52 = arith.constant 1 : index
    %c1_53 = arith.constant 1 : index
    %c0_54 = arith.constant 0 : index
    %53 = vector.load %arg8[%c1_52, %c1_53, %c0_54] : memref<10x10x128xf32, #tpu.memory_space<vmem>>, vector<8x8x128xf32>
    %54 = vector.shape_cast %53 : vector<8x8x128xf32> to vector<64x128xf32>
    %55 = arith.truncf %54 : vector<64x128xf32> to vector<64x128xbf16>
    %c4 = arith.constant 4 : index
    %c0_55 = arith.constant 0 : index
    %c0_56 = arith.constant 0 : index
    %56 = vector.load %arg4[%c4, %c0_55, %c0_56] : memref<9x128x128xbf16, #tpu.memory_space<vmem>>, vector<1x128x128xbf16>
    %57 = vector.shape_cast %56 : vector<1x128x128xbf16> to vector<128x128xbf16>
    %cst_57 = arith.constant dense<0.000000e+00> : vector<64x128xf32>
    %58 = tpu.matmul %55, %57, %cst_57 {dimension_numbers = #tpu.dot_dimension_numbers<[1], [0], [0], [1], [0, 0, 1, 1], [], []>} : vector<64x128xbf16>, vector<128x128xbf16>, vector<64x128xf32> -> vector<64x128xf32>
    %59 = arith.addf %52, %58 : vector<64x128xf32>
    %c1_58 = arith.constant 1 : index
    %c2_59 = arith.constant 2 : index
    %c0_60 = arith.constant 0 : index
    %60 = vector.load %arg8[%c1_58, %c2_59, %c0_60] : memref<10x10x128xf32, #tpu.memory_space<vmem>>, vector<8x8x128xf32>
    %61 = vector.shape_cast %60 : vector<8x8x128xf32> to vector<64x128xf32>
    %62 = arith.truncf %61 : vector<64x128xf32> to vector<64x128xbf16>
    %c5 = arith.constant 5 : index
    %c0_61 = arith.constant 0 : index
    %c0_62 = arith.constant 0 : index
    %63 = vector.load %arg4[%c5, %c0_61, %c0_62] : memref<9x128x128xbf16, #tpu.memory_space<vmem>>, vector<1x128x128xbf16>
    %64 = vector.shape_cast %63 : vector<1x128x128xbf16> to vector<128x128xbf16>
    %cst_63 = arith.constant dense<0.000000e+00> : vector<64x128xf32>
    %65 = tpu.matmul %62, %64, %cst_63 {dimension_numbers = #tpu.dot_dimension_numbers<[1], [0], [0], [1], [0, 0, 1, 1], [], []>} : vector<64x128xbf16>, vector<128x128xbf16>, vector<64x128xf32> -> vector<64x128xf32>
    %66 = arith.addf %59, %65 : vector<64x128xf32>
    %c2_64 = arith.constant 2 : index
    %c0_65 = arith.constant 0 : index
    %c0_66 = arith.constant 0 : index
    %67 = vector.load %arg8[%c2_64, %c0_65, %c0_66] : memref<10x10x128xf32, #tpu.memory_space<vmem>>, vector<8x8x128xf32>
    %68 = vector.shape_cast %67 : vector<8x8x128xf32> to vector<64x128xf32>
    %69 = arith.truncf %68 : vector<64x128xf32> to vector<64x128xbf16>
    %c6 = arith.constant 6 : index
    %c0_67 = arith.constant 0 : index
    %c0_68 = arith.constant 0 : index
    %70 = vector.load %arg4[%c6, %c0_67, %c0_68] : memref<9x128x128xbf16, #tpu.memory_space<vmem>>, vector<1x128x128xbf16>
    %71 = vector.shape_cast %70 : vector<1x128x128xbf16> to vector<128x128xbf16>
    %cst_69 = arith.constant dense<0.000000e+00> : vector<64x128xf32>
    %72 = tpu.matmul %69, %71, %cst_69 {dimension_numbers = #tpu.dot_dimension_numbers<[1], [0], [0], [1], [0, 0, 1, 1], [], []>} : vector<64x128xbf16>, vector<128x128xbf16>, vector<64x128xf32> -> vector<64x128xf32>
    %73 = arith.addf %66, %72 : vector<64x128xf32>
    %c2_70 = arith.constant 2 : index
    %c1_71 = arith.constant 1 : index
    %c0_72 = arith.constant 0 : index
    %74 = vector.load %arg8[%c2_70, %c1_71, %c0_72] : memref<10x10x128xf32, #tpu.memory_space<vmem>>, vector<8x8x128xf32>
    %75 = vector.shape_cast %74 : vector<8x8x128xf32> to vector<64x128xf32>
    %76 = arith.truncf %75 : vector<64x128xf32> to vector<64x128xbf16>
    %c7 = arith.constant 7 : index
    %c0_73 = arith.constant 0 : index
    %c0_74 = arith.constant 0 : index
    %77 = vector.load %arg4[%c7, %c0_73, %c0_74] : memref<9x128x128xbf16, #tpu.memory_space<vmem>>, vector<1x128x128xbf16>
    %78 = vector.shape_cast %77 : vector<1x128x128xbf16> to vector<128x128xbf16>
    %cst_75 = arith.constant dense<0.000000e+00> : vector<64x128xf32>
    %79 = tpu.matmul %76, %78, %cst_75 {dimension_numbers = #tpu.dot_dimension_numbers<[1], [0], [0], [1], [0, 0, 1, 1], [], []>} : vector<64x128xbf16>, vector<128x128xbf16>, vector<64x128xf32> -> vector<64x128xf32>
    %80 = arith.addf %73, %79 : vector<64x128xf32>
    %c2_76 = arith.constant 2 : index
    %c2_77 = arith.constant 2 : index
    %c0_78 = arith.constant 0 : index
    %81 = vector.load %arg8[%c2_76, %c2_77, %c0_78] : memref<10x10x128xf32, #tpu.memory_space<vmem>>, vector<8x8x128xf32>
    %82 = vector.shape_cast %81 : vector<8x8x128xf32> to vector<64x128xf32>
    %83 = arith.truncf %82 : vector<64x128xf32> to vector<64x128xbf16>
    %c8 = arith.constant 8 : index
    %c0_79 = arith.constant 0 : index
    %c0_80 = arith.constant 0 : index
    %84 = vector.load %arg4[%c8, %c0_79, %c0_80] : memref<9x128x128xbf16, #tpu.memory_space<vmem>>, vector<1x128x128xbf16>
    %85 = vector.shape_cast %84 : vector<1x128x128xbf16> to vector<128x128xbf16>
    %cst_81 = arith.constant dense<0.000000e+00> : vector<64x128xf32>
    %86 = tpu.matmul %83, %85, %cst_81 {dimension_numbers = #tpu.dot_dimension_numbers<[1], [0], [0], [1], [0, 0, 1, 1], [], []>} : vector<64x128xbf16>, vector<128x128xbf16>, vector<64x128xf32> -> vector<64x128xf32>
    %87 = arith.addf %80, %86 : vector<64x128xf32>
    %c0_82 = arith.constant 0 : index
    %c0_83 = arith.constant 0 : index
    %c0_84 = arith.constant 0 : index
    %c0_85 = arith.constant 0 : index
    %88 = vector.load %arg6[%c0_82, %c0_83, %c0_84, %c0_85] : memref<1x8x8x128xbf16, #tpu.memory_space<vmem>>, vector<1x8x8x128xbf16>
    %89 = vector.shape_cast %88 : vector<1x8x8x128xbf16> to vector<64x128xbf16>
    %90 = vector.broadcast %23 : vector<1x128xf32> to vector<64x128xf32>
    %91 = arith.mulf %87, %90 : vector<64x128xf32>
    %92 = arith.extf %89 : vector<64x128xbf16> to vector<64x128xf32>
    %93 = arith.addf %91, %92 : vector<64x128xf32>
    %94 = vector.shape_cast %93 : vector<64x128xf32> to vector<1x8x8x128xf32>
    %95 = arith.truncf %94 : vector<1x8x8x128xf32> to vector<1x8x8x128xbf16>
    %c0_86 = arith.constant 0 : index
    %c0_87 = arith.constant 0 : index
    %c0_88 = arith.constant 0 : index
    %c0_89 = arith.constant 0 : index
    %96 = vector.load %arg7[%c0_86, %c0_87, %c0_88, %c0_89] : memref<1x8x8x128xbf16, #tpu.memory_space<vmem>>, vector<1x8x8x128xbf16>
    tpu.vector_store %arg7[%c0_86, %c0_87, %c0_88, %c0_89], %95 {strides = array<i32>} : memref<1x8x8x128xbf16, #tpu.memory_space<vmem>>, vector<1x8x8x128xbf16>,
    return
  }
  func.func @transform_0(%arg0: i32) -> (i32, i32, i32, i32) {
    %c0_i32 = arith.constant 0 : i32
    %c0_i32_0 = arith.constant 0 : i32
    %c0_i32_1 = arith.constant 0 : i32
    %c0_i32_2 = arith.constant 0 : i32
    return %arg0, %c0_i32, %c0_i32_0, %c0_i32_1 : i32, i32, i32, i32
  }
  func.func @transform_1(%arg0: i32) -> (i32, i32) {
    %c0_i32 = arith.constant 0 : i32
    %c0_i32_0 = arith.constant 0 : i32
    %c0_i32_1 = arith.constant 0 : i32
    return %c0_i32, %c0_i32_0 : i32, i32
  }
  func.func @transform_2(%arg0: i32) -> (i32, i32) {
    %c0_i32 = arith.constant 0 : i32
    %c0_i32_0 = arith.constant 0 : i32
    %c0_i32_1 = arith.constant 0 : i32
    return %c0_i32, %c0_i32_0 : i32, i32
  }
  func.func @transform_3(%arg0: i32) -> (i32, i32, i32) {
    %c0_i32 = arith.constant 0 : i32
    %c0_i32_0 = arith.constant 0 : i32
    %c0_i32_1 = arith.constant 0 : i32
    %c0_i32_2 = arith.constant 0 : i32
    return %c0_i32, %c0_i32_0, %c0_i32_1 : i32, i32, i32
  }
  func.func @transform_4(%arg0: i32) -> (i32, i32, i32) {
    %c0_i32 = arith.constant 0 : i32
    %c0_i32_0 = arith.constant 0 : i32
    %c0_i32_1 = arith.constant 0 : i32
    return %arg0, %c0_i32, %c0_i32_0 : i32, i32, i32
  }
  func.func @transform_5(%arg0: i32) -> (i32, i32, i32, i32) {
    %c0_i32 = arith.constant 0 : i32
    %c0_i32_0 = arith.constant 0 : i32
    %c0_i32_1 = arith.constant 0 : i32
    %c0_i32_2 = arith.constant 0 : i32
    return %arg0, %c0_i32, %c0_i32_0, %c0_i32_1 : i32, i32, i32, i32
  }
  func.func @transform_6(%arg0: i32) -> (i32, i32, i32, i32) {
    %c0_i32 = arith.constant 0 : i32
    %c0_i32_0 = arith.constant 0 : i32
    %c0_i32_1 = arith.constant 0 : i32
    %c0_i32_2 = arith.constant 0 : i32
    return %arg0, %c0_i32, %c0_i32_0, %c0_i32_1 : i32, i32, i32, i32
  }
}

module attributes {stable_mosaic.version = 11 : i64} {
  func.func @_conv1_se_kernel(%arg0: i32, %arg1: memref<1x16x16x128xbf16, #tpu.memory_space<vmem>>, %arg2: memref<1x128xf32, #tpu.memory_space<vmem>>, %arg3: memref<1x128xf32, #tpu.memory_space<vmem>>, %arg4: memref<9x128x128xbf16, #tpu.memory_space<vmem>>, %arg5: memref<128x128xbf16, #tpu.memory_space<vmem>>, %arg6: memref<1x128xf32, #tpu.memory_space<vmem>>, %arg7: memref<1x128xf32, #tpu.memory_space<vmem>>, %arg8: memref<128x2xf32, #tpu.memory_space<vmem>>, %arg9: memref<2x128xf32, #tpu.memory_space<vmem>>, %arg10: memref<128x128xbf16, #tpu.memory_space<vmem>>, %arg11: memref<1x8x8x128xbf16, #tpu.memory_space<vmem>>, %arg12: memref<1x1x128xf32, #tpu.memory_space<vmem>>, %arg13: memref<1x8x8x128xbf16, #tpu.memory_space<vmem>>, %arg14: memref<18x18x128xf32, #tpu.memory_space<vmem>>) attributes {dimension_semantics = [#tpu.dimension_semantics<parallel>], iteration_bounds = array<i64: 2>, scalar_prefetch = 0 : i64, scratch_operands = 1 : i64, tpu.core_type = #tpu.core_type<tc>, window_params = [{transform_indices = @transform_0, window_bounds = array<i64: 1, 16, 16, 128>}, {pipeline_mode = #tpu.pipeline_mode<synchronous>, transform_indices = @transform_1, window_bounds = array<i64: 1, 128>}, {pipeline_mode = #tpu.pipeline_mode<synchronous>, transform_indices = @transform_2, window_bounds = array<i64: 1, 128>}, {pipeline_mode = #tpu.pipeline_mode<synchronous>, transform_indices = @transform_3, window_bounds = array<i64: 9, 128, 128>}, {pipeline_mode = #tpu.pipeline_mode<synchronous>, transform_indices = @transform_4, window_bounds = array<i64: 128, 128>}, {pipeline_mode = #tpu.pipeline_mode<synchronous>, transform_indices = @transform_5, window_bounds = array<i64: 1, 128>}, {pipeline_mode = #tpu.pipeline_mode<synchronous>, transform_indices = @transform_6, window_bounds = array<i64: 1, 128>}, {pipeline_mode = #tpu.pipeline_mode<synchronous>, transform_indices = @transform_7, window_bounds = array<i64: 128, 2>}, {pipeline_mode = #tpu.pipeline_mode<synchronous>, transform_indices = @transform_8, window_bounds = array<i64: 2, 128>}, {pipeline_mode = #tpu.pipeline_mode<synchronous>, transform_indices = @transform_9, window_bounds = array<i64: 128, 128>}, {transform_indices = @transform_10, window_bounds = array<i64: 1, 8, 8, 128>}, {transform_indices = @transform_11, window_bounds = array<i64: 1, 1, 128>}, {transform_indices = @transform_12, window_bounds = array<i64: 1, 8, 8, 128>}]} {
    %c0 = arith.constant 0 : index
    %c0_0 = arith.constant 0 : index
    %c0_1 = arith.constant 0 : index
    %c0_2 = arith.constant 0 : index
    %0 = vector.load %arg1[%c0, %c0_0, %c0_1, %c0_2] : memref<1x16x16x128xbf16, #tpu.memory_space<vmem>>, vector<1x16x16x128xbf16>
    %1 = vector.shape_cast %0 : vector<1x16x16x128xbf16> to vector<16x16x128xbf16>
    %cst = arith.constant 0.000000e+00 : f32
    %2 = vector.broadcast %cst : f32 to vector<1x128xf32>
    %3 = vector.shape_cast %1 : vector<16x16x128xbf16> to vector<256x128xbf16>
    %c0_3 = arith.constant 0 : index
    %c0_4 = arith.constant 0 : index
    %4 = vector.load %arg5[%c0_3, %c0_4] : memref<128x128xbf16, #tpu.memory_space<vmem>>, vector<128x128xbf16>
    %cst_5 = arith.constant dense<0.000000e+00> : vector<256x128xf32>
    %5 = tpu.matmul %3, %4, %cst_5 {dimension_numbers = #tpu.dot_dimension_numbers<[1], [0], [0], [1], [0, 0, 1, 1], [], []>} : vector<256x128xbf16>, vector<128x128xbf16>, vector<256x128xf32> -> vector<256x128xf32>
    %c0_6 = arith.constant 0 : index
    %c0_7 = arith.constant 0 : index
    %6 = vector.load %arg6[%c0_6, %c0_7] : memref<1x128xf32, #tpu.memory_space<vmem>>, vector<1x128xf32>
    %7 = vector.broadcast %6 : vector<1x128xf32> to vector<256x128xf32>
    %8 = arith.mulf %5, %7 : vector<256x128xf32>
    %c0_8 = arith.constant 0 : index
    %c0_9 = arith.constant 0 : index
    %9 = vector.load %arg7[%c0_8, %c0_9] : memref<1x128xf32, #tpu.memory_space<vmem>>, vector<1x128xf32>
    %10 = vector.broadcast %9 : vector<1x128xf32> to vector<256x128xf32>
    %11 = arith.addf %8, %10 : vector<256x128xf32>
    %cst_10 = arith.constant 0.000000e+00 : f32
    %12 = vector.broadcast %cst_10 : f32 to vector<256x128xf32>
    %13 = arith.maximumf %11, %12 : vector<256x128xf32>
    %cst_11 = arith.constant dense<0.000000e+00> : vector<128xf32>
    %14 = vector.multi_reduction <add>, %13, %cst_11 [0] : vector<256x128xf32> to vector<128xf32>
    %15 = vector.shape_cast %14 : vector<128xf32> to vector<1x128xf32>
    %16 = arith.addf %2, %15 : vector<1x128xf32>
    %cst_12 = arith.constant 3.906250e-03 : f32
    %17 = vector.broadcast %cst_12 : f32 to vector<1x128xf32>
    %18 = arith.mulf %16, %17 : vector<1x128xf32>
    %c0_13 = arith.constant 0 : index
    %c0_14 = arith.constant 0 : index
    %19 = vector.load %arg8[%c0_13, %c0_14] : memref<128x2xf32, #tpu.memory_space<vmem>>, vector<128x2xf32>
    %cst_15 = arith.constant dense<0.000000e+00> : vector<1x2xf32>
    %20 = tpu.matmul %18, %19, %cst_15 {dimension_numbers = #tpu.dot_dimension_numbers<[1], [0], [0], [1], [0, 0, 1, 1], [], []>} : vector<1x128xf32>, vector<128x2xf32>, vector<1x2xf32> -> vector<1x2xf32>
    %cst_16 = arith.constant 0.000000e+00 : f32
    %21 = vector.broadcast %cst_16 : f32 to vector<1x2xf32>
    %22 = arith.maximumf %20, %21 : vector<1x2xf32>
    %c0_17 = arith.constant 0 : index
    %c0_18 = arith.constant 0 : index
    %23 = vector.load %arg9[%c0_17, %c0_18] : memref<2x128xf32, #tpu.memory_space<vmem>>, vector<2x128xf32>
    %cst_19 = arith.constant dense<0.000000e+00> : vector<1x128xf32>
    %24 = tpu.matmul %22, %23, %cst_19 {dimension_numbers = #tpu.dot_dimension_numbers<[1], [0], [0], [1], [0, 0, 1, 1], [], []>} : vector<1x2xf32>, vector<2x128xf32>, vector<1x128xf32> -> vector<1x128xf32>
    %cst_20 = arith.constant 0.000000e+00 : f32
    %25 = vector.broadcast %cst_20 : f32 to vector<1x128xf32>
    %26 = arith.subf %25, %24 : vector<1x128xf32>
    %27 = math.exp %26 : vector<1x128xf32>
    %cst_21 = arith.constant 1.000000e+00 : f32
    %28 = vector.broadcast %cst_21 : f32 to vector<1x128xf32>
    %29 = arith.addf %28, %27 : vector<1x128xf32>
    %cst_22 = arith.constant 1.000000e+00 : f32
    %30 = vector.broadcast %cst_22 : f32 to vector<1x128xf32>
    %31 = arith.divf %30, %29 : vector<1x128xf32>
    %c0_23 = arith.constant 0 : index
    %c0_24 = arith.constant 0 : index
    %c0_25 = arith.constant 0 : index
    %32 = vector.load %arg12[%c0_23, %c0_24, %c0_25] : memref<1x1x128xf32, #tpu.memory_space<vmem>>, vector<1x1x128xf32>
    %33 = vector.shape_cast %32 : vector<1x1x128xf32> to vector<1x128xf32>
    %34 = vector.shape_cast %31 : vector<1x128xf32> to vector<1x1x128xf32>
    tpu.vector_store %arg12[%c0_23, %c0_24, %c0_25], %34 {strides = array<i32>} : memref<1x1x128xf32, #tpu.memory_space<vmem>>, vector<1x1x128xf32>,
    %35 = arith.extf %1 : vector<16x16x128xbf16> to vector<16x16x128xf32>
    %c0_26 = arith.constant 0 : index
    %c0_27 = arith.constant 0 : index
    %36 = vector.load %arg2[%c0_26, %c0_27] : memref<1x128xf32, #tpu.memory_space<vmem>>, vector<1x128xf32>
    %37 = vector.shape_cast %36 : vector<1x128xf32> to vector<128xf32>
    %38 = vector.shape_cast %37 : vector<128xf32> to vector<1x1x128xf32>
    %39 = vector.broadcast %38 : vector<1x1x128xf32> to vector<16x16x128xf32>
    %40 = arith.mulf %35, %39 : vector<16x16x128xf32>
    %c0_28 = arith.constant 0 : index
    %c0_29 = arith.constant 0 : index
    %41 = vector.load %arg3[%c0_28, %c0_29] : memref<1x128xf32, #tpu.memory_space<vmem>>, vector<1x128xf32>
    %42 = vector.shape_cast %41 : vector<1x128xf32> to vector<128xf32>
    %43 = vector.shape_cast %42 : vector<128xf32> to vector<1x1x128xf32>
    %44 = vector.broadcast %43 : vector<1x1x128xf32> to vector<16x16x128xf32>
    %45 = arith.addf %40, %44 : vector<16x16x128xf32>
    %cst_30 = arith.constant 0.000000e+00 : f32
    %46 = vector.broadcast %cst_30 : f32 to vector<16x16x128xf32>
    %47 = arith.maximumf %45, %46 : vector<16x16x128xf32>
    %cst_31 = arith.constant 0.000000e+00 : f32
    %48 = vector.broadcast %cst_31 : f32 to vector<1x18x128xf32>
    %cst_32 = arith.constant 0.000000e+00 : f32
    %49 = vector.broadcast %cst_32 : f32 to vector<16x1x128xf32>
    %c0_33 = arith.constant 0 : index
    %c0_34 = arith.constant 0 : index
    %c0_35 = arith.constant 0 : index
    %50 = vector.load %arg14[%c0_33, %c0_34, %c0_35] : memref<18x18x128xf32, #tpu.memory_space<vmem>>, vector<1x18x128xf32>
    tpu.vector_store %arg14[%c0_33, %c0_34, %c0_35], %48 {strides = array<i32>} : memref<18x18x128xf32, #tpu.memory_space<vmem>>, vector<1x18x128xf32>,
    %c17 = arith.constant 17 : index
    %c0_36 = arith.constant 0 : index
    %c0_37 = arith.constant 0 : index
    %51 = vector.load %arg14[%c17, %c0_36, %c0_37] : memref<18x18x128xf32, #tpu.memory_space<vmem>>, vector<1x18x128xf32>
    tpu.vector_store %arg14[%c17, %c0_36, %c0_37], %48 {strides = array<i32>} : memref<18x18x128xf32, #tpu.memory_space<vmem>>, vector<1x18x128xf32>,
    %c1 = arith.constant 1 : index
    %c0_38 = arith.constant 0 : index
    %c0_39 = arith.constant 0 : index
    %52 = vector.load %arg14[%c1, %c0_38, %c0_39] : memref<18x18x128xf32, #tpu.memory_space<vmem>>, vector<16x1x128xf32>
    tpu.vector_store %arg14[%c1, %c0_38, %c0_39], %49 {strides = array<i32>} : memref<18x18x128xf32, #tpu.memory_space<vmem>>, vector<16x1x128xf32>,
    %c1_40 = arith.constant 1 : index
    %c17_41 = arith.constant 17 : index
    %c0_42 = arith.constant 0 : index
    %53 = vector.load %arg14[%c1_40, %c17_41, %c0_42] : memref<18x18x128xf32, #tpu.memory_space<vmem>>, vector<16x1x128xf32>
    tpu.vector_store %arg14[%c1_40, %c17_41, %c0_42], %49 {strides = array<i32>} : memref<18x18x128xf32, #tpu.memory_space<vmem>>, vector<16x1x128xf32>,
    %c1_43 = arith.constant 1 : index
    %c1_44 = arith.constant 1 : index
    %c0_45 = arith.constant 0 : index
    %54 = vector.load %arg14[%c1_43, %c1_44, %c0_45] : memref<18x18x128xf32, #tpu.memory_space<vmem>>, vector<16x16x128xf32>
    tpu.vector_store %arg14[%c1_43, %c1_44, %c0_45], %47 {strides = array<i32>} : memref<18x18x128xf32, #tpu.memory_space<vmem>>, vector<16x16x128xf32>,
    %cst_46 = arith.constant 0.000000e+00 : f32
    %55 = vector.broadcast %cst_46 : f32 to vector<64x128xf32>
    %c0_47 = arith.constant 0 : index
    %c0_48 = arith.constant 0 : index
    %c0_49 = arith.constant 0 : index
    %56 = tpu.strided_load %arg14[%c0_47, %c0_48, %c0_49] {strides = array<i32: 2, 2, 1>} : memref<18x18x128xf32, #tpu.memory_space<vmem>>, vector<8x8x128xf32>
    %57 = vector.shape_cast %56 : vector<8x8x128xf32> to vector<64x128xf32>
    %58 = arith.truncf %57 : vector<64x128xf32> to vector<64x128xbf16>
    %c0_50 = arith.constant 0 : index
    %c0_51 = arith.constant 0 : index
    %c0_52 = arith.constant 0 : index
    %59 = vector.load %arg4[%c0_50, %c0_51, %c0_52] : memref<9x128x128xbf16, #tpu.memory_space<vmem>>, vector<1x128x128xbf16>
    %60 = vector.shape_cast %59 : vector<1x128x128xbf16> to vector<128x128xbf16>
    %cst_53 = arith.constant dense<0.000000e+00> : vector<64x128xf32>
    %61 = tpu.matmul %58, %60, %cst_53 {dimension_numbers = #tpu.dot_dimension_numbers<[1], [0], [0], [1], [0, 0, 1, 1], [], []>} : vector<64x128xbf16>, vector<128x128xbf16>, vector<64x128xf32> -> vector<64x128xf32>
    %62 = arith.addf %55, %61 : vector<64x128xf32>
    %c0_54 = arith.constant 0 : index
    %c1_55 = arith.constant 1 : index
    %c0_56 = arith.constant 0 : index
    %63 = tpu.strided_load %arg14[%c0_54, %c1_55, %c0_56] {strides = array<i32: 2, 2, 1>} : memref<18x18x128xf32, #tpu.memory_space<vmem>>, vector<8x8x128xf32>
    %64 = vector.shape_cast %63 : vector<8x8x128xf32> to vector<64x128xf32>
    %65 = arith.truncf %64 : vector<64x128xf32> to vector<64x128xbf16>
    %c1_57 = arith.constant 1 : index
    %c0_58 = arith.constant 0 : index
    %c0_59 = arith.constant 0 : index
    %66 = vector.load %arg4[%c1_57, %c0_58, %c0_59] : memref<9x128x128xbf16, #tpu.memory_space<vmem>>, vector<1x128x128xbf16>
    %67 = vector.shape_cast %66 : vector<1x128x128xbf16> to vector<128x128xbf16>
    %cst_60 = arith.constant dense<0.000000e+00> : vector<64x128xf32>
    %68 = tpu.matmul %65, %67, %cst_60 {dimension_numbers = #tpu.dot_dimension_numbers<[1], [0], [0], [1], [0, 0, 1, 1], [], []>} : vector<64x128xbf16>, vector<128x128xbf16>, vector<64x128xf32> -> vector<64x128xf32>
    %69 = arith.addf %62, %68 : vector<64x128xf32>
    %c0_61 = arith.constant 0 : index
    %c2 = arith.constant 2 : index
    %c0_62 = arith.constant 0 : index
    %70 = tpu.strided_load %arg14[%c0_61, %c2, %c0_62] {strides = array<i32: 2, 2, 1>} : memref<18x18x128xf32, #tpu.memory_space<vmem>>, vector<8x8x128xf32>
    %71 = vector.shape_cast %70 : vector<8x8x128xf32> to vector<64x128xf32>
    %72 = arith.truncf %71 : vector<64x128xf32> to vector<64x128xbf16>
    %c2_63 = arith.constant 2 : index
    %c0_64 = arith.constant 0 : index
    %c0_65 = arith.constant 0 : index
    %73 = vector.load %arg4[%c2_63, %c0_64, %c0_65] : memref<9x128x128xbf16, #tpu.memory_space<vmem>>, vector<1x128x128xbf16>
    %74 = vector.shape_cast %73 : vector<1x128x128xbf16> to vector<128x128xbf16>
    %cst_66 = arith.constant dense<0.000000e+00> : vector<64x128xf32>
    %75 = tpu.matmul %72, %74, %cst_66 {dimension_numbers = #tpu.dot_dimension_numbers<[1], [0], [0], [1], [0, 0, 1, 1], [], []>} : vector<64x128xbf16>, vector<128x128xbf16>, vector<64x128xf32> -> vector<64x128xf32>
    %76 = arith.addf %69, %75 : vector<64x128xf32>
    %c1_67 = arith.constant 1 : index
    %c0_68 = arith.constant 0 : index
    %c0_69 = arith.constant 0 : index
    %77 = tpu.strided_load %arg14[%c1_67, %c0_68, %c0_69] {strides = array<i32: 2, 2, 1>} : memref<18x18x128xf32, #tpu.memory_space<vmem>>, vector<8x8x128xf32>
    %78 = vector.shape_cast %77 : vector<8x8x128xf32> to vector<64x128xf32>
    %79 = arith.truncf %78 : vector<64x128xf32> to vector<64x128xbf16>
    %c3 = arith.constant 3 : index
    %c0_70 = arith.constant 0 : index
    %c0_71 = arith.constant 0 : index
    %80 = vector.load %arg4[%c3, %c0_70, %c0_71] : memref<9x128x128xbf16, #tpu.memory_space<vmem>>, vector<1x128x128xbf16>
    %81 = vector.shape_cast %80 : vector<1x128x128xbf16> to vector<128x128xbf16>
    %cst_72 = arith.constant dense<0.000000e+00> : vector<64x128xf32>
    %82 = tpu.matmul %79, %81, %cst_72 {dimension_numbers = #tpu.dot_dimension_numbers<[1], [0], [0], [1], [0, 0, 1, 1], [], []>} : vector<64x128xbf16>, vector<128x128xbf16>, vector<64x128xf32> -> vector<64x128xf32>
    %83 = arith.addf %76, %82 : vector<64x128xf32>
    %c1_73 = arith.constant 1 : index
    %c1_74 = arith.constant 1 : index
    %c0_75 = arith.constant 0 : index
    %84 = tpu.strided_load %arg14[%c1_73, %c1_74, %c0_75] {strides = array<i32: 2, 2, 1>} : memref<18x18x128xf32, #tpu.memory_space<vmem>>, vector<8x8x128xf32>
    %85 = vector.shape_cast %84 : vector<8x8x128xf32> to vector<64x128xf32>
    %86 = arith.truncf %85 : vector<64x128xf32> to vector<64x128xbf16>
    %c4 = arith.constant 4 : index
    %c0_76 = arith.constant 0 : index
    %c0_77 = arith.constant 0 : index
    %87 = vector.load %arg4[%c4, %c0_76, %c0_77] : memref<9x128x128xbf16, #tpu.memory_space<vmem>>, vector<1x128x128xbf16>
    %88 = vector.shape_cast %87 : vector<1x128x128xbf16> to vector<128x128xbf16>
    %cst_78 = arith.constant dense<0.000000e+00> : vector<64x128xf32>
    %89 = tpu.matmul %86, %88, %cst_78 {dimension_numbers = #tpu.dot_dimension_numbers<[1], [0], [0], [1], [0, 0, 1, 1], [], []>} : vector<64x128xbf16>, vector<128x128xbf16>, vector<64x128xf32> -> vector<64x128xf32>
    %90 = arith.addf %83, %89 : vector<64x128xf32>
    %c0_79 = arith.constant 0 : index
    %c0_80 = arith.constant 0 : index
    %91 = vector.load %arg10[%c0_79, %c0_80] : memref<128x128xbf16, #tpu.memory_space<vmem>>, vector<128x128xbf16>
    %cst_81 = arith.constant dense<0.000000e+00> : vector<64x128xf32>
    %92 = tpu.matmul %86, %91, %cst_81 {dimension_numbers = #tpu.dot_dimension_numbers<[1], [0], [0], [1], [0, 0, 1, 1], [], []>} : vector<64x128xbf16>, vector<128x128xbf16>, vector<64x128xf32> -> vector<64x128xf32>
    %c1_82 = arith.constant 1 : index
    %c2_83 = arith.constant 2 : index
    %c0_84 = arith.constant 0 : index
    %93 = tpu.strided_load %arg14[%c1_82, %c2_83, %c0_84] {strides = array<i32: 2, 2, 1>} : memref<18x18x128xf32, #tpu.memory_space<vmem>>, vector<8x8x128xf32>
    %94 = vector.shape_cast %93 : vector<8x8x128xf32> to vector<64x128xf32>
    %95 = arith.truncf %94 : vector<64x128xf32> to vector<64x128xbf16>
    %c5 = arith.constant 5 : index
    %c0_85 = arith.constant 0 : index
    %c0_86 = arith.constant 0 : index
    %96 = vector.load %arg4[%c5, %c0_85, %c0_86] : memref<9x128x128xbf16, #tpu.memory_space<vmem>>, vector<1x128x128xbf16>
    %97 = vector.shape_cast %96 : vector<1x128x128xbf16> to vector<128x128xbf16>
    %cst_87 = arith.constant dense<0.000000e+00> : vector<64x128xf32>
    %98 = tpu.matmul %95, %97, %cst_87 {dimension_numbers = #tpu.dot_dimension_numbers<[1], [0], [0], [1], [0, 0, 1, 1], [], []>} : vector<64x128xbf16>, vector<128x128xbf16>, vector<64x128xf32> -> vector<64x128xf32>
    %99 = arith.addf %90, %98 : vector<64x128xf32>
    %c2_88 = arith.constant 2 : index
    %c0_89 = arith.constant 0 : index
    %c0_90 = arith.constant 0 : index
    %100 = tpu.strided_load %arg14[%c2_88, %c0_89, %c0_90] {strides = array<i32: 2, 2, 1>} : memref<18x18x128xf32, #tpu.memory_space<vmem>>, vector<8x8x128xf32>
    %101 = vector.shape_cast %100 : vector<8x8x128xf32> to vector<64x128xf32>
    %102 = arith.truncf %101 : vector<64x128xf32> to vector<64x128xbf16>
    %c6 = arith.constant 6 : index
    %c0_91 = arith.constant 0 : index
    %c0_92 = arith.constant 0 : index
    %103 = vector.load %arg4[%c6, %c0_91, %c0_92] : memref<9x128x128xbf16, #tpu.memory_space<vmem>>, vector<1x128x128xbf16>
    %104 = vector.shape_cast %103 : vector<1x128x128xbf16> to vector<128x128xbf16>
    %cst_93 = arith.constant dense<0.000000e+00> : vector<64x128xf32>
    %105 = tpu.matmul %102, %104, %cst_93 {dimension_numbers = #tpu.dot_dimension_numbers<[1], [0], [0], [1], [0, 0, 1, 1], [], []>} : vector<64x128xbf16>, vector<128x128xbf16>, vector<64x128xf32> -> vector<64x128xf32>
    %106 = arith.addf %99, %105 : vector<64x128xf32>
    %c2_94 = arith.constant 2 : index
    %c1_95 = arith.constant 1 : index
    %c0_96 = arith.constant 0 : index
    %107 = tpu.strided_load %arg14[%c2_94, %c1_95, %c0_96] {strides = array<i32: 2, 2, 1>} : memref<18x18x128xf32, #tpu.memory_space<vmem>>, vector<8x8x128xf32>
    %108 = vector.shape_cast %107 : vector<8x8x128xf32> to vector<64x128xf32>
    %109 = arith.truncf %108 : vector<64x128xf32> to vector<64x128xbf16>
    %c7 = arith.constant 7 : index
    %c0_97 = arith.constant 0 : index
    %c0_98 = arith.constant 0 : index
    %110 = vector.load %arg4[%c7, %c0_97, %c0_98] : memref<9x128x128xbf16, #tpu.memory_space<vmem>>, vector<1x128x128xbf16>
    %111 = vector.shape_cast %110 : vector<1x128x128xbf16> to vector<128x128xbf16>
    %cst_99 = arith.constant dense<0.000000e+00> : vector<64x128xf32>
    %112 = tpu.matmul %109, %111, %cst_99 {dimension_numbers = #tpu.dot_dimension_numbers<[1], [0], [0], [1], [0, 0, 1, 1], [], []>} : vector<64x128xbf16>, vector<128x128xbf16>, vector<64x128xf32> -> vector<64x128xf32>
    %113 = arith.addf %106, %112 : vector<64x128xf32>
    %c2_100 = arith.constant 2 : index
    %c2_101 = arith.constant 2 : index
    %c0_102 = arith.constant 0 : index
    %114 = tpu.strided_load %arg14[%c2_100, %c2_101, %c0_102] {strides = array<i32: 2, 2, 1>} : memref<18x18x128xf32, #tpu.memory_space<vmem>>, vector<8x8x128xf32>
    %115 = vector.shape_cast %114 : vector<8x8x128xf32> to vector<64x128xf32>
    %116 = arith.truncf %115 : vector<64x128xf32> to vector<64x128xbf16>
    %c8 = arith.constant 8 : index
    %c0_103 = arith.constant 0 : index
    %c0_104 = arith.constant 0 : index
    %117 = vector.load %arg4[%c8, %c0_103, %c0_104] : memref<9x128x128xbf16, #tpu.memory_space<vmem>>, vector<1x128x128xbf16>
    %118 = vector.shape_cast %117 : vector<1x128x128xbf16> to vector<128x128xbf16>
    %cst_105 = arith.constant dense<0.000000e+00> : vector<64x128xf32>
    %119 = tpu.matmul %116, %118, %cst_105 {dimension_numbers = #tpu.dot_dimension_numbers<[1], [0], [0], [1], [0, 0, 1, 1], [], []>} : vector<64x128xbf16>, vector<128x128xbf16>, vector<64x128xf32> -> vector<64x128xf32>
    %120 = arith.addf %113, %119 : vector<64x128xf32>
    %121 = vector.shape_cast %120 : vector<64x128xf32> to vector<1x8x8x128xf32>
    %122 = arith.truncf %121 : vector<1x8x8x128xf32> to vector<1x8x8x128xbf16>
    %c0_106 = arith.constant 0 : index
    %c0_107 = arith.constant 0 : index
    %c0_108 = arith.constant 0 : index
    %c0_109 = arith.constant 0 : index
    %123 = vector.load %arg11[%c0_106, %c0_107, %c0_108, %c0_109] : memref<1x8x8x128xbf16, #tpu.memory_space<vmem>>, vector<1x8x8x128xbf16>
    tpu.vector_store %arg11[%c0_106, %c0_107, %c0_108, %c0_109], %122 {strides = array<i32>} : memref<1x8x8x128xbf16, #tpu.memory_space<vmem>>, vector<1x8x8x128xbf16>,
    %124 = vector.shape_cast %92 : vector<64x128xf32> to vector<1x8x8x128xf32>
    %125 = arith.truncf %124 : vector<1x8x8x128xf32> to vector<1x8x8x128xbf16>
    %c0_110 = arith.constant 0 : index
    %c0_111 = arith.constant 0 : index
    %c0_112 = arith.constant 0 : index
    %c0_113 = arith.constant 0 : index
    %126 = vector.load %arg13[%c0_110, %c0_111, %c0_112, %c0_113] : memref<1x8x8x128xbf16, #tpu.memory_space<vmem>>, vector<1x8x8x128xbf16>
    tpu.vector_store %arg13[%c0_110, %c0_111, %c0_112, %c0_113], %125 {strides = array<i32>} : memref<1x8x8x128xbf16, #tpu.memory_space<vmem>>, vector<1x8x8x128xbf16>,
    return
  }
  func.func @transform_0(%arg0: i32) -> (i32, i32, i32, i32) {
    %c0_i32 = arith.constant 0 : i32
    %c0_i32_0 = arith.constant 0 : i32
    %c0_i32_1 = arith.constant 0 : i32
    %c0_i32_2 = arith.constant 0 : i32
    return %arg0, %c0_i32, %c0_i32_0, %c0_i32_1 : i32, i32, i32, i32
  }
  func.func @transform_1(%arg0: i32) -> (i32, i32) {
    %c0_i32 = arith.constant 0 : i32
    %c0_i32_0 = arith.constant 0 : i32
    %c0_i32_1 = arith.constant 0 : i32
    return %c0_i32, %c0_i32_0 : i32, i32
  }
  func.func @transform_2(%arg0: i32) -> (i32, i32) {
    %c0_i32 = arith.constant 0 : i32
    %c0_i32_0 = arith.constant 0 : i32
    %c0_i32_1 = arith.constant 0 : i32
    return %c0_i32, %c0_i32_0 : i32, i32
  }
  func.func @transform_3(%arg0: i32) -> (i32, i32, i32) {
    %c0_i32 = arith.constant 0 : i32
    %c0_i32_0 = arith.constant 0 : i32
    %c0_i32_1 = arith.constant 0 : i32
    %c0_i32_2 = arith.constant 0 : i32
    return %c0_i32, %c0_i32_0, %c0_i32_1 : i32, i32, i32
  }
  func.func @transform_4(%arg0: i32) -> (i32, i32) {
    %c0_i32 = arith.constant 0 : i32
    %c0_i32_0 = arith.constant 0 : i32
    %c0_i32_1 = arith.constant 0 : i32
    return %c0_i32, %c0_i32_0 : i32, i32
  }
  func.func @transform_5(%arg0: i32) -> (i32, i32) {
    %c0_i32 = arith.constant 0 : i32
    %c0_i32_0 = arith.constant 0 : i32
    %c0_i32_1 = arith.constant 0 : i32
    return %c0_i32, %c0_i32_0 : i32, i32
  }
  func.func @transform_6(%arg0: i32) -> (i32, i32) {
    %c0_i32 = arith.constant 0 : i32
    %c0_i32_0 = arith.constant 0 : i32
    %c0_i32_1 = arith.constant 0 : i32
    return %c0_i32, %c0_i32_0 : i32, i32
  }
  func.func @transform_7(%arg0: i32) -> (i32, i32) {
    %c0_i32 = arith.constant 0 : i32
    %c0_i32_0 = arith.constant 0 : i32
    %c0_i32_1 = arith.constant 0 : i32
    return %c0_i32, %c0_i32_0 : i32, i32
  }
  func.func @transform_8(%arg0: i32) -> (i32, i32) {
    %c0_i32 = arith.constant 0 : i32
    %c0_i32_0 = arith.constant 0 : i32
    %c0_i32_1 = arith.constant 0 : i32
    return %c0_i32, %c0_i32_0 : i32, i32
  }
  func.func @transform_9(%arg0: i32) -> (i32, i32) {
    %c0_i32 = arith.constant 0 : i32
    %c0_i32_0 = arith.constant 0 : i32
    %c0_i32_1 = arith.constant 0 : i32
    return %c0_i32, %c0_i32_0 : i32, i32
  }
  func.func @transform_10(%arg0: i32) -> (i32, i32, i32, i32) {
    %c0_i32 = arith.constant 0 : i32
    %c0_i32_0 = arith.constant 0 : i32
    %c0_i32_1 = arith.constant 0 : i32
    %c0_i32_2 = arith.constant 0 : i32
    return %arg0, %c0_i32, %c0_i32_0, %c0_i32_1 : i32, i32, i32, i32
  }
  func.func @transform_11(%arg0: i32) -> (i32, i32, i32) {
    %c0_i32 = arith.constant 0 : i32
    %c0_i32_0 = arith.constant 0 : i32
    %c0_i32_1 = arith.constant 0 : i32
    return %arg0, %c0_i32, %c0_i32_0 : i32, i32, i32
  }
  func.func @transform_12(%arg0: i32) -> (i32, i32, i32, i32) {
    %c0_i32 = arith.constant 0 : i32
    %c0_i32_0 = arith.constant 0 : i32
    %c0_i32_1 = arith.constant 0 : i32
    %c0_i32_2 = arith.constant 0 : i32
    return %arg0, %c0_i32, %c0_i32_0, %c0_i32_1 : i32, i32, i32, i32
  }
}

</mosaic_0001>

<bundles_post_ra>
// kernel: cpse_preact_block.3
= control target key start
LH: loop header
LB: loop body
LE: loop exit
PB: predicated region body
PF: predicated region fallthrough
CT: control target
= control target key end

     0   :  { %s2581_s21 = smov 0   ;;  %s3031_s0 = inlined_call_operand.vmem [shape: bf16[2,8,8,128], index: 0, kind: input, shape index: {}]   ;;  %s3032_s1 = inlined_call_operand.vmem [shape: f32[1,128], index: 1, kind: input, shape index: {}]   ;;  %s3033_s2 = inlined_call_operand.vmem [shape: f32[1,128], index: 2, kind: input, shape index: {}]   ;;  %s3034_s3 = inlined_call_operand.vmem [shape: bf16[9,128,128], index: 3, kind: input, shape index: {}]   ;;  %s3035_s4 = inlined_call_operand.vmem [shape: f32[2,1,128], index: 4, kind: input, shape index: {}]   ;;  %s3036_s5 = inlined_call_operand.vmem [shape: bf16[2,8,8,128], index: 5, kind: input, shape index: {}]   ;;  %s3037_s6 = inlined_call_operand.vmem [shape: bf16[2,8,8,128], index: 6, kind: output, shape index: {}]  }
   0x1 LB: > { %s1836_s22 = sadd.s32 4294967295, %s2543_s21   ;;  %p1840_p0 = scmp.ge.s32.totalorder %s2543_s21, 1  ;;  %s2543_s21 = sphi %s2581_s21, %s16_s21  }
   0x2   : > { %p230_p1 = scmp.lt.s32.totalorder %s2543_s21, 3 }
   0x4   : > { %p231_p2 = pnand %p1840_p0, %p230_p1 }
   0x6   : > { %234 = sbr.rel (%p231_p2) target bundleno = 382 (0x17e), region = 44 }
   0xb   : > { %v2465_v0 = vld [vmem:[%s3034_s3 + $0x78] sm:$0xff]   ;;  %v2467_v2 = vld [vmem:[%s3034_s3 + $0x70] sm:$0xff]   ;;  %p2600_p3 = scmp.lt.s32.totalorder %s1836_s22, 1  ;;  %v2545_v3 = vmov 0.0   ;;  %v2469_v5 = vld [vmem:[%s3034_s3 + $0x68] sm:$0xff]  }
   0xc   : > { %v2466_v1 = vld [vmem:[%s3034_s3 + $0x38] sm:$0xff]   ;;  %2224 = vmatprep.subr.bf16.mxu0 %v2465_v0  ;;  %341 = vst [vmem:[#allocation2] sm:$0xff] %v2545_v3  ;;  %342 = vst [vmem:[#allocation2 + $0x8] sm:$0x3] %v2545_v3  ;;  %v2468_v4 = vld [vmem:[%s3034_s3 + $0x30] sm:$0xff]  }
   0xd   : > { %344 = vst [vmem:[#allocation2 + $0x90] sm:$0xff] %v2545_v3  ;;  %345 = vst [vmem:[#allocation2 + $0x98] sm:$0x3] %v2545_v3  ;;  %2248 = vmatprep.subr.bf16.mxu1 %v2466_v1  ;;  %2225 = vmatpush3.bf16.msra.mxu0 %v2465_v0  ;;  %v2470_v6 = vld [vmem:[%s3034_s3 + $0x28] sm:$0xff]   ;;  %s3050_s22 = smov (!%p2600_p3, %s1836_s22), 1  ;;  %v2471_v7 = vld [vmem:[%s3034_s3 + $0x60] sm:$0xff]  }
   0xe   : > { %347 = vst [vmem:[#allocation2 + $0x10] sm:$0x1] %v2545_v3  ;;  %348 = vst [vmem:[#allocation2 + $0x20] sm:$0x1] %v2545_v3  ;;  %2249 = vmatpush3.bf16.msra.mxu1 %v2466_v1  ;;  %2226 = vmatprep.subr.bf16.mxu0 %v2467_v2  ;;  %v2472_v8 = vld [vmem:[%s3034_s3 + $0x20] sm:$0xff]   ;;  %s2646_s16 = sshll.u32 %s3050_s22, 5  ;;  %s275_s9 = scalar_lea.vmem %s3035_s4, %s3050_s22 }
   0xf   : > { %349 = vst [vmem:[#allocation2 + $0x30] sm:$0x1] %v2545_v3  ;;  %350 = vst [vmem:[#allocation2 + $0x40] sm:$0x1] %v2545_v3  ;;  %2250 = vmatprep.subr.bf16.mxu1 %v2468_v4  ;;  %v2473_v9 = vld [vmem:[%s3034_s3 + $0x58] sm:$0xff]   ;;  %s2658_s25 = scalar_lea.vmem %s3031_s0, %s2646_s16  ;;  %v2475_v11 = vld [vmem:[%s3034_s3 + $0x50] sm:$0xff]   ;;  %s280_s30 = scalar_lea.vmem %s3036_s5, %s2646_s16 }
  0x10   : > { %351 = vst [vmem:[#allocation2 + $0x50] sm:$0x1] %v2545_v3  ;;  %352 = vst [vmem:[#allocation2 + $0x60] sm:$0x1] %v2545_v3  ;;  %v2474_v10 = vld [vmem:[%s3034_s3 + $0x18] sm:$0xff]   ;;  %v2056_v12 = vld [vmem:[%s2658_s25] sm:$0xff]   ;;  %s285_s11 = scalar_lea.vmem %s3037_s6, %s2646_s16 }
  0x11   : > { %353 = vst [vmem:[#allocation2 + $0x70] sm:$0x1] %v2545_v3  ;;  %354 = vst [vmem:[#allocation2 + $0x80] sm:$0x1] %v2545_v3  ;;  %2227 = vmatpush3.bf16.msra.mxu0 %v2467_v2  ;;  %v1847_v13 = vld [vmem:[%s3032_s1] ss:$0 sm:$0xff]  ;;  %v2057_v15 = vunpack.c.l.bf16 %v2056_v12  ;;  %v2058_v16 = vunpack.c.h.bf16 %v2056_v12 }
  0x12   : > { %355 = vst [vmem:[#allocation2 + $0x19] sm:$0x1] %v2545_v3  ;;  %356 = vst [vmem:[#allocation2 + $0x29] sm:$0x1] %v2545_v3  ;;  %2251 = vmatpush3.bf16.msra.mxu1 %v2468_v4  ;;  %2228 = vmatprep.subr.bf16.mxu0 %v2469_v5  ;;  %v2476_v14 = vld [vmem:[%s3034_s3 + $0x10] sm:$0xff]   ;;  %v2107_v17 = vld [vmem:[%s2658_s25 + $0x8] sm:$0xff]  }
  0x13   : > { %357 = vst [vmem:[#allocation2 + $0x39] sm:$0x1] %v2545_v3  ;;  %358 = vst [vmem:[#allocation2 + $0x49] sm:$0x1] %v2545_v3  ;;  %2252 = vmatprep.subr.bf16.mxu1 %v2470_v6  ;;  %v2674_v18 = vld [vmem:[%s3033_s2] ss:$0 sm:$0xff]  ;;  %v2061_v19 = vunpack.c.l.bf16 %v2107_v17  ;;  %v2062_v20 = vunpack.c.h.bf16 %v2107_v17  ;;  %v310_v21 = vmul.f32 %v2057_v15, %v1847_v13  ;;  %v311_v22 = vmul.f32 %v2058_v16, %v1847_v13 }
  0x14   : > { %359 = vst [vmem:[#allocation2 + $0x59] sm:$0x1] %v2545_v3  ;;  %360 = vst [vmem:[#allocation2 + $0x69] sm:$0x1] %v2545_v3  ;;  %v2477_v23 = vld [vmem:[%s3034_s3 + $0x48] sm:$0xff]   ;;  %v2479_v32 = vld [vmem:[%s3034_s3 + $0x40] sm:$0xff]  }
  0x15   : > { %361 = vst [vmem:[#allocation2 + $0x79] sm:$0x1] %v2545_v3  ;;  %362 = vst [vmem:[#allocation2 + $0x89] sm:$0x1] %v2545_v3  ;;  %2229 = vmatpush3.bf16.msra.mxu0 %v2469_v5  ;;  %v312_v24 = vmul.f32 %v2061_v19, %v1847_v13  ;;  %v313_v25 = vmul.f32 %v2062_v20, %v1847_v13  ;;  %v2478_v26 = vld [vmem:[%s3034_s3 + $0x8] sm:$0xff]   ;;  %v325_v27 = vadd.f32 %v2674_v18, %v310_v21  ;;  %v2480_v35 = vld [vmem:[%s3034_s3] sm:$0xff]  }
  0x16   : > { %2253 = vmatpush3.bf16.msra.mxu1 %v2470_v6  ;;  %2230 = vmatprep.subr.bf16.mxu0 %v2471_v7  ;;  %v326_v28 = vadd.f32 %v2674_v18, %v311_v22  ;;  %v400_v29 = vld [vmem:[#allocation2 + $0x1] sm:$0xff]  ;;  %v2481_v39 = vld [vmem:[%s3034_s3 + $0xb8] sm:$0xff]   ;;  %v2108_v40 = vld [vmem:[%s2658_s25 + $0x10] sm:$0xff]  }
  0x17   : > { %2254 = vmatprep.subr.bf16.mxu1 %v2472_v8  ;;  %v327_v30 = vadd.f32 %v2674_v18, %v312_v24  ;;  %v328_v31 = vadd.f32 %v2674_v18, %v313_v25  ;;  %v2689_v33 = vmax.f32 %v325_v27, 0.0  ;;  %v2065_v41 = vunpack.c.l.bf16 %v2108_v40  ;;  %v2109_v43 = vld [vmem:[%s2658_s25 + $0x18] sm:$0xff]   ;;  %v2483_v55 = vld [vmem:[%s3034_s3 + $0xb0] sm:$0xff]   ;;  %v2485_v5 = vld [vmem:[%s3034_s3 + $0xa8] sm:$0xff]  }
  0x18   : > { %v2691_v34 = vmax.f32 %v326_v28, 0.0  ;;  %v2066_v42 = vunpack.c.h.bf16 %v2108_v40  ;;  %v2482_v45 = vld [vmem:[%s3034_s3 + $0xf8] sm:$0xff]   ;;  %v2069_v46 = vunpack.c.l.bf16 %v2109_v43  ;;  %v2070_v47 = vunpack.c.h.bf16 %v2109_v43  ;;  %v2484_v63 = vld [vmem:[%s3034_s3 + $0xf0] sm:$0xff]   ;;  %v2488_v15 = vld [vmem:[%s3034_s3 + $0xe0] sm:$0xff]  }
  0x19   : > { %2231 = vmatpush3.bf16.msra.mxu0 %v2471_v7  ;;  %v2696_v36 = vmax.f32 %v327_v30, 0.0  ;;  %363 = vst [vmem:[#allocation2 + $0x11] sm:$0xff] %v2689_v33  ;;  %v408_v37 = vpack.c.bf16 %v2689_v33, %v400_v29  ;;  %v2702_v38 = vmax.f32 %v328_v31, 0.0  ;;  %v314_v49 = vmul.f32 %v2065_v41, %v1847_v13  ;;  %v655_v7 = vld [vmem:[#allocation2 + $0x2] sm:$0xff]  ;;  %v2491_v24 = vld [vmem:[%s3034_s3 + $0x90] sm:$0xff]   ;;  %v2498_v40 = vld [vmem:[%s3034_s3 + $0x178] sm:$0xff]  }
  0x1a   : > { %2255 = vmatpush3.bf16.msra.mxu1 %v2472_v8  ;;  %2232 = vmatprep.subr.bf16.mxu0 %v2473_v9  ;;  %364 = vst [vmem:[#allocation2 + $0x21] sm:$0xff] %v2691_v34  ;;  %v315_v50 = vmul.f32 %v2066_v42, %v1847_v13  ;;  %v316_v51 = vmul.f32 %v2069_v46, %v1847_v13  ;;  %v2492_v25 = vld [vmem:[%s3034_s3 + $0xd0] sm:$0xff]   ;;  %v2494_v27 = vld [vmem:[%s3034_s3 + $0xc8] sm:$0xff]   ;;  %v2495_v28 = vld [vmem:[%s3034_s3 + $0x80] sm:$0xff]  }
  0x1b   : > { %2256 = vmatprep.subr.bf16.mxu1 %v2474_v10  ;;  %365 = vst [vmem:[#allocation2 + $0x31] sm:$0xff] %v2696_v36  ;;  %2240 = vmatprep.mubr.bf16.mxu0 %v408_v37  ;;  %366 = vst [vmem:[#allocation2 + $0x41] sm:$0xff] %v2702_v38  ;;  %v964_v44 = vpack.c.bf16 %v2702_v38, %v2696_v36  ;;  %v2717_v48 = vpack.c.bf16 %v2696_v36, %v2691_v34  ;;  %v2496_v29 = vld [vmem:[%s3034_s3 + $0xc0] sm:$0xff]   ;;  %v2499_v43 = vld [vmem:[%s3034_s3 + $0x130] sm:$0xff]  }
  0x1c   : > { %v317_v52 = vmul.f32 %v2070_v47, %v1847_v13  ;;  %v329_v56 = vadd.f32 %v2674_v18, %v314_v49  ;;  %v330_v57 = vadd.f32 %v2674_v18, %v315_v50  ;;  %v331_v60 = vadd.f32 %v2674_v18, %v316_v51  ;;  %v2487_v13 = vld [vmem:[%s3034_s3 + $0xa0] sm:$0xff]   ;;  %v2501_v50 = vld [vmem:[%s3034_s3 + $0x128] sm:$0xff]  }
  0x1d   : > { %2233 = vmatpush3.bf16.msra.mxu0 %v2473_v9  ;;  %v2486_v9 = vld [vmem:[%s3034_s3 + $0xe8] sm:$0xff]  }
  0x1e   : > { %2257 = vmatpush3.bf16.msra.mxu1 %v2474_v10  ;;  %2234 = vmatprep.subr.bf16.mxu0 %v2475_v11  ;;  %v332_v61 = vadd.f32 %v2674_v18, %v317_v52  ;;  %v2739_v0 = vmax.f32 %v329_v56, 0.0  ;;  %v2741_v1 = vmax.f32 %v330_v57, 0.0  ;;  %v2743_v2 = vmax.f32 %v331_v60, 0.0  ;;  %v2489_v18 = vld [vmem:[%s3034_s3 + $0x98] sm:$0xff]   ;;  %v2503_v56 = vld [vmem:[%s3034_s3 + $0x120] sm:$0xff]   ;;  %v2508_v60 = vld [vmem:[%s3034_s3 + $0x150] sm:$0xff]  }
  0x1f   : > { %2258 = vmatprep.subr.bf16.mxu1 %v2476_v14  ;;  %v2518_v36 = vld [vmem:[%s3034_s3 + $0x1e8] sm:$0xff]  }
  0x20   : > { %v2719_v53 = vld [vmem:[#allocation2 + $0x10] sm:$0xff]  ;;  %v2745_v4 = vmax.f32 %v332_v61, 0.0  ;;  %367 = vst [vmem:[#allocation2 + $0x51] sm:$0xff] %v2739_v0  ;;  %v2754_v6 = vpack.c.bf16 %v2739_v0, %v2702_v38  ;;  %368 = vst [vmem:[#allocation2 + $0x61] sm:$0xff] %v2741_v1  ;;  %v2767_v10 = vpack.c.bf16 %v2743_v2, %v2741_v1  ;;  %v2509_v61 = vld [vmem:[%s3034_s3 + $0x108] sm:$0xff]  }
  0x21   : > { %2235 = vmatpush3.bf16.msra.mxu0 %v2475_v11  ;;  %v374_v54 = vld [vmem:[#allocation2 + $0x20] sm:$0xff]  ;;  %v380_v58 = vpack.c.bf16 %v2719_v53, %v2545_v3  ;;  %v2757_v8 = vld [vmem:[#allocation2 + $0x12] sm:$0xff]  ;;  %369 = vst [vmem:[#allocation2 + $0x71] sm:$0xff] %v2743_v2 }
  0x22   : > { %2259 = vmatpush3.bf16.msra.mxu1 %v2476_v14  ;;  %2236 = vmatprep.subr.bf16.mxu0 %v2477_v23  ;;  %v2728_v59 = vld [vmem:[#allocation2 + $0x30] sm:$0xff]  ;;  %370 = vst [vmem:[#allocation2 + $0x81] sm:$0xff] %v2745_v4  ;;  %v966_v11 = vpack.c.bf16 %v2745_v4, %v2743_v2  ;;  %v663_v12 = vpack.c.bf16 %v2757_v8, %v655_v7  ;;  %v2775_v14 = vld [vmem:[#allocation2 + $0x40] sm:$0xff]  ;;  %v2522_v2 = vld [vmem:[%s3034_s3 + $0x1d8] sm:$0xff]  }
  0x23   : > { %2260 = vmatprep.subr.bf16.mxu1 %v2478_v26  ;;  %v2734_v62 = vpack.c.bf16 %v2728_v59, %v374_v54  ;;  %2264 = vmatprep.mubr.bf16.mxu1 %v380_v58  ;;  %v813_v21 = vpack.c.bf16 %v374_v54, %v2719_v53  ;;  %v657_v30 = vld [vmem:[#allocation2 + $0x22] sm:$0xff]  ;;  %v2816_v31 = vld [vmem:[#allocation2 + $0x32] sm:$0xff]  ;;  %v814_v42 = vpack.c.bf16 %v2775_v14, %v2728_v59 }
  0x24   : > { %v2502_v53 = vld [vmem:[%s3034_s3 + $0x168] sm:$0xff]   ;;  %v963_v54 = vpack.c.bf16 %v2691_v34, %v2689_v33  ;;  %v1113_v57 = vpack.c.bf16 %v657_v30, %v2757_v8  ;;  %v2504_v58 = vld [vmem:[%s3034_s3 + $0x160] sm:$0xff]   ;;  %v2505_v33 = vld [vmem:[%s3034_s3 + $0x118] sm:$0xff]  }
  0x25   : > { %2237 = vmatpush3.bf16.msra.mxu0 %v2477_v23  ;;  %v2490_v23 = vld [vmem:[%s3034_s3 + $0xd8] sm:$0xff]   ;;  %v2507_v59 = vld [vmem:[%s3034_s3 + $0x110] sm:$0xff]   ;;  %v2512_v7 = vld [vmem:[%s3034_s3 + $0x140] sm:$0xff]  }
  0x26   : > { %2261 = vmatpush3.bf16.msra.mxu1 %v2478_v26  ;;  %2238 = vmatprep.subr.bf16.mxu0 %v2479_v32  ;;  %v2493_v26 = vld [vmem:[%s3034_s3 + $0x88] sm:$0xff]   ;;  %v2506_v34 = vld [vmem:[%s3034_s3 + $0x158] sm:$0xff]  }
  0x27   : > { %2262 = vmatprep.subr.bf16.mxu1 %v2480_v35  ;;  %v377_v16 = vld [vmem:[#allocation2 + $0x50] sm:$0xff]  ;;  %v378_v17 = vld [vmem:[#allocation2 + $0x60] sm:$0xff]  ;;  %v2513_v8 = vld [vmem:[%s3034_s3 + $0x1b8] sm:$0xff]  }
  0x28   : > { %v2785_v19 = vpack.c.bf16 %v377_v16, %v2775_v14  ;;  %v2787_v20 = vld [vmem:[#allocation2 + $0x70] sm:$0xff]  ;;  %v815_v46 = vpack.c.bf16 %v378_v17, %v377_v16  ;;  %v2844_v47 = vld [vmem:[#allocation2 + $0x62] sm:$0xff] }
  0x29   : > { %2239 = vmatpush3.bf16.msra.mxu0 %v2479_v32  ;;  %v2791_v22 = vpack.c.bf16 %v2787_v20, %v378_v17  ;;  %v2497_v32 = vld [vmem:[%s3034_s3 + $0x138] sm:$0xff]   ;;  %v2852_v51 = vld [vmem:[#allocation2 + $0x80] sm:$0xff]  ;;  %v2515_v14 = vld [vmem:[%s3034_s3 + $0x1b0] sm:$0xff]  }
  0x2a   : > { %2263 = vmatpush3.bf16.msra.mxu1 %v2480_v35  ;;  %2272 = vmatprep.subr.bf16.mxu0 %v2481_v39  ;;  %v2821_v35 = vld [vmem:[#allocation2 + $0x42] sm:$0xff]  ;;  %v2823_v37 = vld [vmem:[#allocation2 + $0x52] sm:$0xff] }
  0x2b   : > { %2296 = vmatprep.subr.bf16.mxu1 %v2482_v45  ;;  %v2833_v41 = vpack.c.bf16 %v2823_v37, %v2821_v35  ;;  %v2847_v49 = vld [vmem:[#allocation2 + $0x72] sm:$0xff]  ;;  %v2921_v16 = vld [vmem:[#allocation2 + $0x82] sm:$0xff] }
  0x2c   : > { %2241 = vmatmul.mubr.bf16.vlgmr.msra.gmra.mxu0 %v2717_v48  ;;  %v2856_v52 = vpack.c.bf16 %v2847_v49, %v2844_v47  ;;  %v1116_v38 = vpack.c.bf16 %v2921_v16, %v2847_v49  ;;  %v2520_v17 = vld [vmem:[%s3034_s3 + $0x1e0] sm:$0xff]  }
  0x2d   : > { %2273 = vmatpush3.bf16.msra.mxu0 %v2481_v39  ;;  %2265 = vmatmul.mubr.bf16.vlgmr.msra.gmra.mxu1 %v2734_v62  ;;  %v2826_v39 = vpack.c.bf16 %v2816_v31, %v657_v30 }
  0x2e   : > { %2274 = vmatprep.subr.bf16.mxu0 %v2483_v55  ;;  %2297 = vmatpush3.bf16.msra.mxu1 %v2482_v45  ;;  %v2500_v45 = vld [vmem:[%s3034_s3 + $0x170] sm:$0xff]  }
  0x2f   : > { %2298 = vmatprep.subr.bf16.mxu1 %v2484_v63  ;;  %2244 = vmatprep.mubr.bf16.mxu0 %v2754_v6 }
  0x30   : > { %2268 = vmatprep.mubr.bf16.mxu1 %v2785_v19 }
  0x31   : > { %2275 = vmatpush3.bf16.msra.mxu0 %v2483_v55  ;;  %v816_v55 = vpack.c.bf16 %v2852_v51, %v2787_v20  ;;  %v2526_v20 = vld [vmem:[%s3034_s3 + $0x1c8] sm:$0xff]  }
  0x32   : > { %2276 = vmatprep.subr.bf16.mxu0 %v2485_v5  ;;  %2299 = vmatpush3.bf16.msra.mxu1 %v2484_v63  ;;  %v2510_v63 = vld [vmem:[%s3034_s3 + $0x148] sm:$0xff]  }
  0x33   : > { %2300 = vmatprep.subr.bf16.mxu1 %v2486_v9 }
  0x34   : > { %2245 = vmatmul.mubr.bf16.gmra.mxu0 %v2767_v10 }
  0x35   : > { %2277 = vmatpush3.bf16.msra.mxu0 %v2485_v5  ;;  %2288 = vmatprep.mubr.bf16.mxu0 %v663_v12  ;;  %v2511_v5 = vld [vmem:[%s3034_s3 + $0x100] sm:$0xff]   ;;  %v965_v12 = vpack.c.bf16 %v2741_v1, %v2739_v0  ;;  %v2516_v0 = vld [vmem:[%s3034_s3 + $0x1f0] sm:$0xff]   ;;  %v2517_v1 = vld [vmem:[%s3034_s3 + $0x1a8] sm:$0xff]  }
  0x36   : > { %2278 = vmatprep.subr.bf16.mxu0 %v2487_v13  ;;  %2301 = vmatpush3.bf16.msra.mxu1 %v2486_v9  ;;  %v2514_v9 = vld [vmem:[%s3034_s3 + $0x1f8] sm:$0xff]  }
  0x37   : > { %2302 = vmatprep.subr.bf16.mxu1 %v2488_v15  ;;  %2269 = vmatmul.mubr.bf16.gmra.mxu1 %v2791_v22 }
  0x38   : > { %2312 = vmatprep.mubr.bf16.mxu1 %v813_v21  ;;  %v2527_v21 = vld [vmem:[%s3034_s3 + $0x180] sm:$0xff]  }
  0x39   : > { %2279 = vmatpush3.bf16.msra.mxu0 %v2487_v13  ;;  %v1114_v13 = vpack.c.bf16 %v2821_v35, %v2816_v31 }
  0x3a   : > { %2280 = vmatprep.subr.bf16.mxu0 %v2489_v18  ;;  %2303 = vmatpush3.bf16.msra.mxu1 %v2488_v15  ;;  %v1115_v15 = vpack.c.bf16 %v2844_v47, %v2823_v37 }
  0x3b   : > { %2304 = vmatprep.subr.bf16.mxu1 %v2490_v23 }
  0x3d   : > { %2281 = vmatpush3.bf16.msra.mxu0 %v2489_v18  ;;  %v2521_v18 = vld [vmem:[%s3034_s3 + $0x198] sm:$0xff]  }
  0x3e   : > { %2282 = vmatprep.subr.bf16.mxu0 %v2491_v24  ;;  %2305 = vmatpush3.bf16.msra.mxu1 %v2490_v23  ;;  %v2528_v23 = vld [vmem:[%s3034_s3 + $0x1c0] sm:$0xff]  }
  0x3f   : > { %2306 = vmatprep.subr.bf16.mxu1 %v2492_v25 }
  0x41   : > { %2283 = vmatpush3.bf16.msra.mxu0 %v2491_v24  ;;  %v2529_v24 = vld [vmem:[%s3034_s3 + $0x238] sm:$0xff]  }
  0x42   : > { %2284 = vmatprep.subr.bf16.mxu0 %v2493_v26  ;;  %2307 = vmatpush3.bf16.msra.mxu1 %v2492_v25  ;;  %v2530_v25 = vld [vmem:[%s3034_s3 + $0x230] sm:$0xff]  }
  0x43   : > { %2308 = vmatprep.subr.bf16.mxu1 %v2494_v27 }
  0x45   : > { %2285 = vmatpush3.bf16.msra.mxu0 %v2493_v26  ;;  %v2531_v26 = vld [vmem:[%s3034_s3 + $0x228] sm:$0xff]  }
  0x46   : > { %2286 = vmatprep.subr.bf16.mxu0 %v2495_v28  ;;  %2309 = vmatpush3.bf16.msra.mxu1 %v2494_v27  ;;  %v1413_v27 = vld [vmem:[#allocation2 + $0x91] sm:$0xff] }
  0x47   : > { %2310 = vmatprep.subr.bf16.mxu1 %v2496_v29 }
  0x49   : > { %2287 = vmatpush3.bf16.msra.mxu0 %v2495_v28  ;;  %v1267_v28 = vpack.c.bf16 %v2545_v3, %v2852_v51  ;;  %v2533_v3 = vld [vmem:[%s3034_s3 + $0x218] sm:$0xff]  }
  0x4a   : > { %2320 = vmatprep.subr.bf16.mxu0 %v2497_v32  ;;  %2311 = vmatpush3.bf16.msra.mxu1 %v2496_v29  ;;  %v1563_v29 = vld [vmem:[#allocation2 + $0x92] sm:$0xff] }
  0x4b   : > { %2344 = vmatprep.subr.bf16.mxu1 %v2498_v40  ;;  %v1567_v30 = vpack.c.bf16 %v1563_v29, %v2921_v16 }
  0x4c   : > { %2289 = vmatmul.mubr.bf16.vlgmr.msra.gmra.mxu0 %v2826_v39 }
  0x4d   : > { %2321 = vmatpush3.bf16.msra.mxu0 %v2497_v32  ;;  %2292 = vmatprep.mubr.bf16.mxu0 %v2833_v41 }
  0x4e   : > { %2313 = vmatmul.mubr.bf16.vlgmr.msra.gmra.mxu1 %v814_v42  ;;  %2322 = vmatprep.subr.bf16.mxu0 %v2499_v43 }
  0x4f   : > { %2345 = vmatpush3.bf16.msra.mxu1 %v2498_v40  ;;  %2316 = vmatprep.mubr.bf16.mxu1 %v815_v46 }
  0x50   : > { %2346 = vmatprep.subr.bf16.mxu1 %v2500_v45 }
  0x51   : > { %2323 = vmatpush3.bf16.msra.mxu0 %v2499_v43 }
  0x52   : > { %2324 = vmatprep.subr.bf16.mxu0 %v2501_v50 }
  0x53   : > { %2347 = vmatpush3.bf16.msra.mxu1 %v2500_v45 }
  0x54   : > { %2293 = vmatmul.mubr.bf16.gmra.mxu0 %v2856_v52  ;;  %2348 = vmatprep.subr.bf16.mxu1 %v2502_v53 }
  0x55   : > { %2325 = vmatpush3.bf16.msra.mxu0 %v2501_v50  ;;  %2336 = vmatprep.mubr.bf16.mxu0 %v963_v54 }
  0x56   : > { %2317 = vmatmul.mubr.bf16.gmra.mxu1 %v816_v55  ;;  %2326 = vmatprep.subr.bf16.mxu0 %v2503_v56 }
  0x57   : > { %2349 = vmatpush3.bf16.msra.mxu1 %v2502_v53  ;;  %2360 = vmatprep.mubr.bf16.mxu1 %v1113_v57 }
  0x58   : > { %2350 = vmatprep.subr.bf16.mxu1 %v2504_v58 }
  0x59   : > { %2327 = vmatpush3.bf16.msra.mxu0 %v2503_v56 }
  0x5a   : > { %2328 = vmatprep.subr.bf16.mxu0 %v2505_v33 }
  0x5b   : > { %2351 = vmatpush3.bf16.msra.mxu1 %v2504_v58 }
  0x5c   : > { %2352 = vmatprep.subr.bf16.mxu1 %v2506_v34 }
  0x5d   : > { %2329 = vmatpush3.bf16.msra.mxu0 %v2505_v33 }
  0x5e   : > { %2330 = vmatprep.subr.bf16.mxu0 %v2507_v59 }
  0x5f   : > { %2353 = vmatpush3.bf16.msra.mxu1 %v2506_v34 }
  0x60   : > { %2354 = vmatprep.subr.bf16.mxu1 %v2508_v60 }
  0x61   : > { %2331 = vmatpush3.bf16.msra.mxu0 %v2507_v59 }
  0x62   : > { %2332 = vmatprep.subr.bf16.mxu0 %v2509_v61 }
  0x63   : > { %2355 = vmatpush3.bf16.msra.mxu1 %v2508_v60 }
  0x64   : > { %2356 = vmatprep.subr.bf16.mxu1 %v2510_v63 }
  0x65   : > { %2333 = vmatpush3.bf16.msra.mxu0 %v2509_v61 }
  0x66   : > { %2334 = vmatprep.subr.bf16.mxu0 %v2511_v5 }
  0x67   : > { %2357 = vmatpush3.bf16.msra.mxu1 %v2510_v63 }
  0x68   : > { %2358 = vmatprep.subr.bf16.mxu1 %v2512_v7 }
  0x69   : > { %2335 = vmatpush3.bf16.msra.mxu0 %v2511_v5 }
  0x6a   : > { %2368 = vmatprep.subr.bf16.mxu0 %v2513_v8 }
  0x6b   : > { %2359 = vmatpush3.bf16.msra.mxu1 %v2512_v7 }
  0x6c   : > { %2337 = vmatmul.mubr.bf16.vlgmr.msra.gmra.mxu0 %v964_v44  ;;  %2392 = vmatprep.subr.bf16.mxu1 %v2514_v9  ;;  %v2519_v44 = vld [vmem:[%s3034_s3 + $0x1a0] sm:$0xff]  }
  0x6d   : > { %2369 = vmatpush3.bf16.msra.mxu0 %v2513_v8  ;;  %2340 = vmatprep.mubr.bf16.mxu0 %v965_v12 }
  0x6e   : > { %2361 = vmatmul.mubr.bf16.vlgmr.msra.gmra.mxu1 %v1114_v13  ;;  %2370 = vmatprep.subr.bf16.mxu0 %v2515_v14 }
  0x6f   : > { %2393 = vmatpush3.bf16.msra.mxu1 %v2514_v9  ;;  %2364 = vmatprep.mubr.bf16.mxu1 %v1115_v15 }
  0x70   : > { %2394 = vmatprep.subr.bf16.mxu1 %v2516_v0 }
  0x71   : > { %2371 = vmatpush3.bf16.msra.mxu0 %v2515_v14 }
  0x72   : > { %2372 = vmatprep.subr.bf16.mxu0 %v2517_v1 }
  0x73   : > { %2395 = vmatpush3.bf16.msra.mxu1 %v2516_v0 }
  0x74   : > { %2341 = vmatmul.mubr.bf16.gmra.mxu0 %v966_v11  ;;  %2396 = vmatprep.subr.bf16.mxu1 %v2518_v36  ;;  %v2524_v11 = vld [vmem:[%s3034_s3 + $0x1d0] sm:$0xff]  }
  0x75   : > { %2373 = vmatpush3.bf16.msra.mxu0 %v2517_v1  ;;  %2384 = vmatprep.mubr.bf16.mxu0 %v2734_v62  ;;  %v2523_v62 = vld [vmem:[%s3034_s3 + $0x190] sm:$0xff]  }
  0x76   : > { %2365 = vmatmul.mubr.bf16.gmra.mxu1 %v1116_v38  ;;  %2374 = vmatprep.subr.bf16.mxu0 %v2519_v44 }
  0x77   : > { %2397 = vmatpush3.bf16.msra.mxu1 %v2518_v36  ;;  %2408 = vmatprep.mubr.bf16.mxu1 %v2717_v48  ;;  %v2525_v48 = vld [vmem:[%s3034_s3 + $0x188] sm:$0xff]  }
  0x78   : > { %2398 = vmatprep.subr.bf16.mxu1 %v2520_v17 }
  0x79   : > { %2375 = vmatpush3.bf16.msra.mxu0 %v2519_v44 }
  0x7a   : > { %2376 = vmatprep.subr.bf16.mxu0 %v2521_v18 }
  0x7b   : > { %2399 = vmatpush3.bf16.msra.mxu1 %v2520_v17 }
  0x7c   : > { %2400 = vmatprep.subr.bf16.mxu1 %v2522_v2 }
  0x7d   : > { %2377 = vmatpush3.bf16.msra.mxu0 %v2521_v18 }
  0x7e   : > { %2378 = vmatprep.subr.bf16.mxu0 %v2523_v62 }
  0x7f   : > { %2401 = vmatpush3.bf16.msra.mxu1 %v2522_v2 }
  0x80   : > { %2402 = vmatprep.subr.bf16.mxu1 %v2524_v11 }
  0x81   : > { %2379 = vmatpush3.bf16.msra.mxu0 %v2523_v62 }
  0x82   : > { %2380 = vmatprep.subr.bf16.mxu0 %v2525_v48 }
  0x83   : > { %2403 = vmatpush3.bf16.msra.mxu1 %v2524_v11 }
  0x84   : > { %2404 = vmatprep.subr.bf16.mxu1 %v2526_v20 }
  0x85   : > { %2381 = vmatpush3.bf16.msra.mxu0 %v2525_v48 }
  0x86   : > { %2382 = vmatprep.subr.bf16.mxu0 %v2527_v21 }
  0x87   : > { %2405 = vmatpush3.bf16.msra.mxu1 %v2526_v20 }
  0x88   : > { %2406 = vmatprep.subr.bf16.mxu1 %v2528_v23 }
  0x89   : > { %2383 = vmatpush3.bf16.msra.mxu0 %v2527_v21 }
  0x8a   : > { %2416 = vmatprep.subr.bf16.mxu0 %v2529_v24 }
  0x8b   : > { %2407 = vmatpush3.bf16.msra.mxu1 %v2528_v23 }
  0x8c   : > { %2385 = vmatmul.mubr.bf16.vlgmr.msra.gmra.mxu0 %v2785_v19  ;;  %2440 = vmatprep.subr.bf16.mxu1 %v2529_v24  ;;  %v1417_v19 = vpack.c.bf16 %v1413_v27, %v2745_v4  ;;  %v2534_v4 = vld [vmem:[%s3034_s3 + $0x210] sm:$0xff]  }
  0x8d   : > { %2417 = vmatpush3.bf16.msra.mxu0 %v2529_v24  ;;  %2388 = vmatprep.mubr.bf16.mxu0 %v2791_v22  ;;  %v2536_v22 = vld [vmem:[%s3034_s3 + $0x200] sm:$0xff]  }
  0x8e   : > { %2409 = vmatmul.mubr.bf16.vlgmr.msra.gmra.mxu1 %v2754_v6  ;;  %2418 = vmatprep.subr.bf16.mxu0 %v2530_v25  ;;  %v2532_v6 = vld [vmem:[%s3034_s3 + $0x220] sm:$0xff]  }
  0x8f   : > { %2448 = vmatpush3.bf16.msra.mxu1 %v2529_v24  ;;  %2412 = vmatprep.mubr.bf16.mxu1 %v2767_v10  ;;  %v2535_v10 = vld [vmem:[%s3034_s3 + $0x208] sm:$0xff]  }
  0x90   : > { %2441 = vmatprep.subr.bf16.mxu1 %v2530_v25 }
  0x91   : > { %2419 = vmatpush3.bf16.msra.mxu0 %v2530_v25 }
  0x92   : > { %2420 = vmatprep.subr.bf16.mxu0 %v2531_v26 }
  0x93   : > { %2449 = vmatpush3.bf16.msra.mxu1 %v2530_v25 }
  0x94   : > { %2389 = vmatmul.mubr.bf16.gmra.mxu0 %v1267_v28  ;;  %2442 = vmatprep.subr.bf16.mxu1 %v2531_v26 }
  0x95   : > { %2421 = vmatpush3.bf16.msra.mxu0 %v2531_v26  ;;  %2432 = vmatprep.mubr.bf16.mxu0 %v2826_v39 }
  0x96   : > { %2413 = vmatmul.mubr.bf16.gmra.mxu1 %v1417_v19  ;;  %2422 = vmatprep.subr.bf16.mxu0 %v2532_v6 }
  0x97   : > { %2450 = vmatpush3.bf16.msra.mxu1 %v2531_v26  ;;  %2436 = vmatprep.mubr.bf16.mxu1 %v2856_v52 }
  0x98   : > { %2443 = vmatprep.subr.bf16.mxu1 %v2532_v6 }
  0x99   : > { %2423 = vmatpush3.bf16.msra.mxu0 %v2532_v6 }
  0x9a   : > { %2424 = vmatprep.subr.bf16.mxu0 %v2533_v3 }
  0x9b   : > { %2451 = vmatpush3.bf16.msra.mxu1 %v2532_v6 }
  0x9c   : > { %2444 = vmatprep.subr.bf16.mxu1 %v2533_v3 }
  0x9d   : > { %2425 = vmatpush3.bf16.msra.mxu0 %v2533_v3 }
  0x9e   : > { %2426 = vmatprep.subr.bf16.mxu0 %v2534_v4 }
  0x9f   : > { %2452 = vmatpush3.bf16.msra.mxu1 %v2533_v3 }
  0xa0   : > { %2445 = vmatprep.subr.bf16.mxu1 %v2534_v4 }
  0xa1   : > { %2427 = vmatpush3.bf16.msra.mxu0 %v2534_v4 }
  0xa2   : > { %2428 = vmatprep.subr.bf16.mxu0 %v2535_v10 }
  0xa3   : > { %2453 = vmatpush3.bf16.msra.mxu1 %v2534_v4 }
  0xa4   : > { %2446 = vmatprep.subr.bf16.mxu1 %v2535_v10 }
  0xa5   : > { %2429 = vmatpush3.bf16.msra.mxu0 %v2535_v10 }
  0xa6   : > { %2430 = vmatprep.subr.bf16.mxu0 %v2536_v22 }
  0xa7   : > { %2454 = vmatpush3.bf16.msra.mxu1 %v2535_v10 }
  0xa8   : > { %2447 = vmatprep.subr.bf16.mxu1 %v2536_v22 }
  0xa9   : > { %2431 = vmatpush3.bf16.msra.mxu0 %v2536_v22 }
  0xab   : > { %2455 = vmatpush3.bf16.msra.mxu1 %v2536_v22 }
  0xac   : > { %2433 = vmatmul.mubr.bf16.vlgmr.msra.gmra.mxu0 %v2833_v41 }
  0xae   : > { %2437 = vmatmul.mubr.bf16.vlgmr.msra.gmra.mxu1 %v1567_v30 }
  0xec   : > { %v2242_v31 = vpop.f32.mrf.mxu0 }
  0xed   : > { %v2266_v35 = vpop.f32.mrf.mxu1 }
  0xee   : > { %v511_v32 = vpop.f32.mrf.mxu0  ;;  %v633_v26 = vadd.f32 %v2266_v35, %v2242_v31 }
  0xef   : > { %v624_v39 = vpop.f32.mrf.mxu1 }
  0xf0   : > { %v2243_v37 = vpop.f32.mrf.mxu0  ;;  %v625_v6 = vadd.f32 %v624_v39, %v511_v32 }
  0xf1   : > { %v2267_v43 = vpop.f32.mrf.mxu1 }
  0xf2   : > { %v514_v40 = vpop.f32.mrf.mxu0  ;;  %v636_v22 = vadd.f32 %v2267_v43, %v2243_v37 }
  0xf3   : > { %v627_v46 = vpop.f32.mrf.mxu1 }
  0xf4   : > { %v2246_v42 = vpop.f32.mrf.mxu0  ;;  %v628_v31 = vadd.f32 %v627_v46, %v514_v40 }
  0xf6   : > { %v527_v45 = vpop.f32.mrf.mxu0 }
  0xf7   : > { %v2270_v47 = vpop.f32.mrf.mxu1 }
  0xf8   : > { %v2247_v49 = vpop.f32.mrf.mxu0  ;;  %v649_v19 = vadd.f32 %v2270_v47, %v2246_v42 }
  0xf9   : > { %v640_v50 = vpop.f32.mrf.mxu1 }
  0xfa   : > { %v530_v51 = vpop.f32.mrf.mxu0  ;;  %v641_v4 = vadd.f32 %v640_v50, %v527_v45 }
  0xfb   : > { %v2271_v53 = vpop.f32.mrf.mxu1 }
  0xfd   : > { %v643_v55 = vpop.f32.mrf.mxu1 }
  0xfe   : > { %v644_v42 = vadd.f32 %v643_v55, %v530_v51 }
 0x10c   : > { %v2290_v52 = vpop.f32.mrf.mxu0 }
 0x10d   : > { %v799_v3 = vadd.f32 %v2290_v52, %v633_v26 }
 0x10e   : > { %v766_v54 = vpop.f32.mrf.mxu0  ;;  %v2314_v41 = vpop.f32.mrf.mxu1 }
 0x10f   : > { %v797_v29 = vadd.f32 %v766_v54, %v625_v6  ;;  %v949_v35 = vadd.f32 %v2314_v41, %v799_v3 }
 0x110   : > { %v2291_v56 = vpop.f32.mrf.mxu0  ;;  %v916_v57 = vpop.f32.mrf.mxu1 }
 0x111   : > { %v947_v39 = vadd.f32 %v916_v57, %v797_v29 }
 0x112   : > { %v769_v58 = vpop.f32.mrf.mxu0  ;;  %v2315_v33 = vpop.f32.mrf.mxu1 }
 0x113   : > { %v798_v26 = vadd.f32 %v769_v58, %v628_v31 }
 0x114   : > { %v2294_v34 = vpop.f32.mrf.mxu0  ;;  %v919_v59 = vpop.f32.mrf.mxu1 }
 0x115   : > { %v803_v10 = vadd.f32 %v2294_v34, %v649_v19 }
 0x116   : > { %v782_v60 = vpop.f32.mrf.mxu0  ;;  %v2318_v61 = vpop.f32.mrf.mxu1 }
 0x117   : > { %v953_v47 = vadd.f32 %v2318_v61, %v803_v10  ;;  %v2049_v10 = vld [vmem:[%s275_s9] ss:$0 sm:$0xff] }
 0x118   : > { %v2295_v63 = vpop.f32.mrf.mxu0  ;;  %v932_v5 = vpop.f32.mrf.mxu1 }
 0x11a   : > { %v785_v7 = vpop.f32.mrf.mxu0  ;;  %v2319_v8 = vpop.f32.mrf.mxu1 }
 0x11b   : > { %v802_v34 = vadd.f32 %v785_v7, %v644_v42 }
 0x11c   : > { %v935_v12 = vpop.f32.mrf.mxu1 }
 0x11d   : > { %v952_v51 = vadd.f32 %v935_v12, %v802_v34 }
 0x12c   : > { %v2338_v9 = vpop.f32.mrf.mxu0 }
 0x12d   : > { %v1099_v52 = vadd.f32 %v2338_v9, %v949_v35 }
 0x12e   : > { %v1066_v13 = vpop.f32.mrf.mxu0  ;;  %v2362_v14 = vpop.f32.mrf.mxu1 }
 0x12f   : > { %v1097_v54 = vadd.f32 %v1066_v13, %v947_v39  ;;  %v1249_v40 = vadd.f32 %v2362_v14, %v1099_v52 }
 0x130   : > { %v2339_v15 = vpop.f32.mrf.mxu0  ;;  %v1216_v0 = vpop.f32.mrf.mxu1 }
 0x131   : > { %v1247_v57 = vadd.f32 %v1216_v0, %v1097_v54 }
 0x132   : > { %v1069_v1 = vpop.f32.mrf.mxu0  ;;  %v2363_v16 = vpop.f32.mrf.mxu1 }
 0x134   : > { %v2342_v36 = vpop.f32.mrf.mxu0  ;;  %v2998_v38 = vpop.f32.mrf.mxu1 }
 0x135   : > { %3039 = vst [vmem:[#allocation3_spill] sm:$0xff] %v2998_v38  ;;  %v652_v38 = vadd.f32 %v2271_v53, %v2247_v49  ;;  %v1103_v37 = vadd.f32 %v2342_v36, %v953_v47  ;;  %v948_v53 = vadd.f32 %v919_v59, %v798_v26 }
 0x136   : > { %v1082_v44 = vpop.f32.mrf.mxu0  ;;  %v2366_v17 = vpop.f32.mrf.mxu1 }
 0x137   : > { %v804_v32 = vadd.f32 %v2295_v63, %v652_v38  ;;  %v1253_v55 = vadd.f32 %v2366_v17, %v1103_v37  ;;  %v1098_v58 = vadd.f32 %v1069_v1, %v948_v53 }
 0x138   : > { %v2343_v18 = vpop.f32.mrf.mxu0  ;;  %v1232_v2 = vpop.f32.mrf.mxu1 }
 0x139   : > { %v954_v6 = vadd.f32 %v2319_v8, %v804_v32 }
 0x13a   : > { %v1085_v62 = vpop.f32.mrf.mxu0  ;;  %v2367_v11 = vpop.f32.mrf.mxu1 }
 0x13c   : > { %v3000_v20 = vpop.f32.mrf.mxu1  ;;  %v3044_v12 = vld [vmem:[#allocation3_spill] sm:$0xff] }
 0x13d   : > { %3040 = vst [vmem:[#allocation4_spill] sm:$0xff] %v3000_v20  ;;  %v1248_v14 = vadd.f32 %v3044_v12, %v1098_v58 }
 0x144   : > { %v3045_v38 = vld [vmem:[#allocation4_spill] sm:$0xff] }
 0x14c   : > { %v2386_v48 = vpop.f32.mrf.mxu0 }
 0x14e   : > { %v2410_v21 = vpop.f32.mrf.mxu1  ;;  %v1367_v23 = vpop.f32.mrf.mxu0 }
 0x14f   : > { %v1398_v9 = vadd.f32 %v1367_v23, %v1247_v57 }
 0x150   : > { %v3002_v24 = vpop.f32.mrf.mxu1  ;;  %v2387_v25 = vpop.f32.mrf.mxu0 }
 0x151   : > { %3041 = vst [vmem:[#allocation5_spill] sm:$0xff] %v3002_v24  ;;  %v801_v24 = vadd.f32 %v782_v60, %v641_v4  ;;  %v1400_v60 = vadd.f32 %v2386_v48, %v1249_v40 }
 0x152   : > { %v3004_v27 = vpop.f32.mrf.mxu1  ;;  %v3006_v28 = vpop.f32.mrf.mxu0 }
 0x153   : > { %3042 = vst [vmem:[#allocation6_spill] sm:$0xff] %v3004_v27  ;;  %3043 = vst [vmem:[#allocation7_spill] sm:$0xff] %v3006_v28  ;;  %v800_v27 = vadd.f32 %v2291_v56, %v636_v22  ;;  %v951_v50 = vadd.f32 %v932_v5, %v801_v24  ;;  %v1104_v56 = vadd.f32 %v2343_v18, %v954_v6  ;;  %v2110_v18 = vld [vmem:[%s280_s30 + $0x8] sm:$0xff]  }
 0x154   : > { %v3008_v30 = vpop.f32.mrf.mxu1  ;;  %v2390_v20 = vpop.f32.mrf.mxu0  ;;  %v1102_v5 = vadd.f32 %v1085_v62, %v952_v51  ;;  %v2077_v35 = vunpack.c.l.bf16 %v2110_v18 }
 0x155   : > { %v950_v43 = vadd.f32 %v2315_v33, %v800_v27  ;;  %v1101_v49 = vadd.f32 %v1082_v44, %v951_v50  ;;  %v1404_v33 = vadd.f32 %v2390_v20, %v1253_v55  ;;  %v1254_v59 = vadd.f32 %v2367_v11, %v1104_v56  ;;  %v2111_v27 = vld [vmem:[%s280_s30 + $0x10] sm:$0xff]  }
 0x156   : > { %v2414_v28 = vpop.f32.mrf.mxu1  ;;  %v1383_v45 = vpop.f32.mrf.mxu0 }
 0x157   : > { %v1100_v46 = vadd.f32 %v2339_v15, %v950_v43  ;;  %v1251_v63 = vadd.f32 %v1232_v2, %v1101_v49  ;;  %v1550_v15 = vadd.f32 %v2410_v21, %v1400_v60  ;;  %v1554_v44 = vadd.f32 %v2414_v28, %v1404_v33  ;;  %v2112_v2 = vld [vmem:[%s280_s30 + $0x18] sm:$0xff]  }
 0x158   : > { %v1533_v19 = vpop.f32.mrf.mxu1  ;;  %v2391_v41 = vpop.f32.mrf.mxu0  ;;  %v3046_v62 = vld [vmem:[#allocation5_spill] sm:$0xff]  ;;  %v2085_v28 = vunpack.c.l.bf16 %v2112_v2  ;;  %v2078_v43 = vunpack.c.h.bf16 %v2110_v18  ;;  %v2086_v40 = vunpack.c.h.bf16 %v2112_v2 }
 0x159   : > { %v1250_v7 = vadd.f32 %v2363_v16, %v1100_v46  ;;  %v1402_v13 = vadd.f32 %v1383_v45, %v1251_v63  ;;  %v1252_v16 = vadd.f32 %v3045_v38, %v1102_v5  ;;  %v1405_v17 = vadd.f32 %v2391_v41, %v1254_v59 }
 0x15a   : > { %v2415_v61 = vpop.f32.mrf.mxu1  ;;  %v1386_v8 = vpop.f32.mrf.mxu0  ;;  %v1548_v48 = vadd.f32 %v3046_v62, %v1398_v9  ;;  %v3047_v11 = vld [vmem:[#allocation7_spill] sm:$0xff]  ;;  %v3048_v29 = vld [vmem:[#allocation6_spill] sm:$0xff]  ;;  %v2081_v45 = vunpack.c.l.bf16 %v2111_v27 }
 0x15b   : > { %v1401_v0 = vadd.f32 %v2387_v25, %v1250_v7  ;;  %v1399_v20 = vadd.f32 %v3047_v11, %v1248_v14  ;;  %v2072_v25 = vld [vmem:[%s280_s30] sm:$0xff]   ;;  %v1552_v3 = vadd.f32 %v1533_v19, %v1402_v13  ;;  %v1403_v4 = vadd.f32 %v1386_v8, %v1252_v16 }
 0x15c   : > { %v1536_v1 = vpop.f32.mrf.mxu1  ;;  %v1555_v39 = vadd.f32 %v2415_v61, %v1405_v17  ;;  %v2073_v26 = vunpack.c.l.bf16 %v2072_v25  ;;  %v2074_v55 = vunpack.c.h.bf16 %v2072_v25  ;;  %v2082_v61 = vunpack.c.h.bf16 %v2111_v27 }
 0x15d   : > { %v1551_v31 = vadd.f32 %v3048_v29, %v1401_v0  ;;  %v1549_v50 = vadd.f32 %v3008_v30, %v1399_v20  ;;  %v1553_v6 = vadd.f32 %v1536_v1, %v1403_v4 }
 0x16c   : > { %v2434_v36 = vpop.f32.mrf.mxu0 }
 0x16d   : > { %v1700_v23 = vadd.f32 %v2434_v36, %v1550_v15 }
 0x16e   : > { %v2438_v24 = vpop.f32.mrf.mxu1  ;;  %v1667_v21 = vpop.f32.mrf.mxu0 }
 0x16f   : > { %v1704_v22 = vadd.f32 %v2438_v24, %v1554_v44  ;;  %v1698_v42 = vadd.f32 %v1667_v21, %v1548_v48  ;;  %v1722_v34 = vmul.f32 %v2049_v10, %v1700_v23 }
 0x170   : > { %v1683_v47 = vpop.f32.mrf.mxu1  ;;  %v2435_v32 = vpop.f32.mrf.mxu0 }
 0x171   : > { %v1702_v52 = vadd.f32 %v1683_v47, %v1552_v3  ;;  %v1701_v37 = vadd.f32 %v2435_v32, %v1551_v31  ;;  %v1726_v49 = vmul.f32 %v2049_v10, %v1704_v22  ;;  %v1720_v46 = vmul.f32 %v2049_v10, %v1698_v42 }
 0x172   : > { %v2439_v54 = vpop.f32.mrf.mxu1  ;;  %v1670_v19 = vpop.f32.mrf.mxu0  ;;  %v1738_v30 = vadd.f32 %v2077_v35, %v1722_v34 }
 0x173   : > { %v1705_v53 = vadd.f32 %v2439_v54, %v1555_v39  ;;  %v1723_v41 = vmul.f32 %v2049_v10, %v1701_v37  ;;  %v1699_v51 = vadd.f32 %v1670_v19, %v1549_v50  ;;  %v1724_v57 = vmul.f32 %v2049_v10, %v1702_v52 }
 0x174   : > { %v1686_v56 = vpop.f32.mrf.mxu1  ;;  %v1742_v33 = vadd.f32 %v2085_v28, %v1726_v49  ;;  %v1736_v8 = vadd.f32 %v2073_v26, %v1720_v46 }
 0x175   : > { %v1727_v58 = vmul.f32 %v2049_v10, %v1705_v53  ;;  %v1703_v60 = vadd.f32 %v1686_v56, %v1553_v6  ;;  %v1739_v63 = vadd.f32 %v2078_v43, %v1723_v41  ;;  %v1721_v5 = vmul.f32 %v2049_v10, %v1699_v51 }
 0x176   : > { %v1740_v12 = vadd.f32 %v2081_v45, %v1724_v57 }
 0x177   : > { %v1743_v7 = vadd.f32 %v2086_v40, %v1727_v58  ;;  %v1725_v9 = vmul.f32 %v2049_v10, %v1703_v60  ;;  %v2095_v59 = vpack.c.bf16 %v1739_v63, %v1738_v30  ;;  %v1737_v13 = vadd.f32 %v2074_v55, %v1721_v5 }
 0x179   : > { %v2105_v14 = vpack.c.bf16 %v1743_v7, %v1742_v33  ;;  %v1741_v15 = vadd.f32 %v2082_v61, %v1725_v9  ;;  %2113 = vst [vmem:[%s285_s11 + $0x8] sm:$0xff] %v2095_v59   ;;  %v2090_v0 = vpack.c.bf16 %v1737_v13, %v1736_v8 }
 0x17b   : > { %2115 = vst [vmem:[%s285_s11 + $0x18] sm:$0xff] %v2105_v14   ;;  %v2100_v1 = vpack.c.bf16 %v1741_v15, %v1740_v12  ;;  %2091 = vst [vmem:[%s285_s11] sm:$0xff] %v2090_v0  }
 0x17d   : > { %2114 = vst [vmem:[%s285_s11 + $0x10] sm:$0xff] %v2100_v1  }
 0x17e PF: > { %s16_s21 = sadd.s32 1, %s2543_s21  }
 0x17f   : > { %p13_p4 = scmp.ge.s32.totalorder %s16_s21, 4  }
 0x181   :  { %15 = sbr.rel (!%p13_p4) target bundleno = 1 (0x1), region = 91 }

// kernel: cpse_preact_block.2
= control target key start
LH: loop header
LB: loop body
LE: loop exit
PB: predicated region body
PF: predicated region fallthrough
CT: control target
= control target key end

     0   :  { %s4064_s21 = smov 0   ;;  %s4847_s0 = inlined_call_operand.vmem [shape: bf16[2,16,16,128], index: 0, kind: input, shape index: {}]   ;;  %s4848_s1 = inlined_call_operand.vmem [shape: f32[1,128], index: 1, kind: input, shape index: {}]   ;;  %s4849_s2 = inlined_call_operand.vmem [shape: f32[1,128], index: 2, kind: input, shape index: {}]   ;;  %s4850_s3 = inlined_call_operand.vmem [shape: bf16[9,128,128], index: 3, kind: input, shape index: {}]   ;;  %s4851_s4 = inlined_call_operand.vmem [shape: bf16[128,128], index: 4, kind: input, shape index: {}]   ;;  %s4852_s5 = inlined_call_operand.vmem [shape: f32[1,128], index: 5, kind: input, shape index: {}]   ;;  %s4853_s6 = inlined_call_operand.vmem [shape: f32[1,128], index: 6, kind: input, shape index: {}]   ;;  %s4854_s7 = inlined_call_operand.vmem [shape: f32[128,2], index: 7, kind: input, shape index: {}]   ;;  %s4855_s8 = inlined_call_operand.vmem [shape: f32[2,128], index: 8, kind: input, shape index: {}]   ;;  %s4856_s9 = inlined_call_operand.vmem [shape: bf16[128,128], index: 9, kind: input, shape index: {}]   ;;  %s4857_s10 = inlined_call_operand.vmem [shape: bf16[2,8,8,128], index: 10, kind: output, shape index: {0}]   ;;  %s4858_s11 = inlined_call_operand.vmem [shape: f32[2,1,128], index: 11, kind: output, shape index: {1}]   ;;  %s4859_s12 = inlined_call_operand.vmem [shape: bf16[2,8,8,128], index: 12, kind: output, shape index: {2}]  }
   0x1 LB: > { %s3048_s22 = sadd.s32 4294967295, %s3995_s21   ;;  %p3052_p0 = scmp.ge.s32.totalorder %s3995_s21, 1  ;;  %s3995_s21 = sphi %s4064_s21, %s23_s21  }
   0x2   : > { %p367_p1 = scmp.lt.s32.totalorder %s3995_s21, 3 }
   0x4   : > { %p368_p2 = pnand %p3052_p0, %p367_p1 }
   0x5   : > { %p417_p3 = scmp.lt.s32.totalorder (!%p368_p2), %s3048_s22, 1 }
   0x6   : > { %371 = sbr.rel (%p368_p2) target bundleno = 916 (0x394), region = 60 }
   0xb   : > { %v3865_v0 = vld [vmem:[%s4851_s4 + $0x38] sm:$0xff]   ;;  %v3866_v1 = vld [vmem:[%s4851_s4 + $0x30] sm:$0xff]   ;;  %s4861_s22 = smov (!%p417_p3, %s3048_s22), 1  ;;  %v3867_v2 = vld [vmem:[%s4851_s4 + $0x28] sm:$0xff]   ;;  %vm3998_vm0 = vmmov 0   ;;  %vm1030_vm1 = vcmask 1041408  }
   0xc   : > { %3511 = vmatprep.subr.bf16.mxu0 %v3865_v0  ;;  %s3299_s29 = sshll.u32 %s4861_s22, 7  ;;  %v3868_v3 = vld [vmem:[%s4851_s4 + $0x20] sm:$0xff]   ;;  %v3869_v18 = vld [vmem:[%s4851_s4 + $0x18] sm:$0xff]   ;;  %v3870_v26 = vld [vmem:[%s4851_s4 + $0x10] sm:$0xff]   ;;  %vm1026_vm2 = vcmask 15360   ;;  %s3300_s19 = sshll.u32 %s4861_s22, 5 }
   0xd   : > { %3512 = vmatpush3.bf16.msra.mxu0 %v3865_v0  ;;  %s4087_s14 = scalar_lea.vmem %s4847_s0, %s3299_s29  ;;  %v4096_v7 = vld [vmem:[%s4848_s1] ss:$0 sm:$0xff]  ;;  %v3871_v44 = vld [vmem:[%s4851_s4 + $0x8] sm:$0xff]   ;;  %s434_s24 = scalar_lea.vmem %s4859_s12, %s3300_s19 }
   0xe   : > { %3513 = vmatprep.subr.bf16.mxu0 %v3866_v1  ;;  %v436_v4 = vld [vmem:[%s4087_s14] sm:$0xff]   ;;  %v4099_v8 = vld [vmem:[%s4087_s14 + $0x8] sm:$0xff]   ;;  %v4104_v11 = vld [vmem:[%s4087_s14 + $0x10] sm:$0xff]   ;;  %s429_s27 = scalar_lea.vmem %s4858_s11, %s4861_s22  ;;  %s4816_s30 = scalar_lea.vmem %s4857_s10, %s3300_s19 }
   0xf   : > { %v1111_v5 = vunpack.c.l.bf16 %v436_v4  ;;  %v1112_v6 = vunpack.c.h.bf16 %v436_v4  ;;  %v1113_v9 = vunpack.c.l.bf16 %v4099_v8  ;;  %v1114_v10 = vunpack.c.h.bf16 %v4099_v8  ;;  %3527 = vmatprep.mubr.bf16.mxu0 %v436_v4  ;;  %v4111_v14 = vld [vmem:[%s4849_s2] ss:$0 sm:$0xff]  ;;  %v4116_v17 = vld [vmem:[%s4087_s14 + $0x18] sm:$0xff]   ;;  %v4143_v40 = vld [vmem:[%s4087_s14 + $0x28] sm:$0xff]  }
  0x10   : > { %v1115_v15 = vunpack.c.l.bf16 %v4104_v11  ;;  %v1116_v16 = vunpack.c.h.bf16 %v4104_v11  ;;  %v1117_v21 = vunpack.c.l.bf16 %v4116_v17  ;;  %v1118_v29 = vunpack.c.h.bf16 %v4116_v17  ;;  %v4136_v31 = vld [vmem:[%s4087_s14 + $0x20] sm:$0xff]   ;;  %v4152_v48 = vld [vmem:[%s4087_s14 + $0x30] sm:$0xff]   ;;  %v4161_v56 = vld [vmem:[%s4087_s14 + $0x38] sm:$0xff]  }
  0x11   : > { %3514 = vmatpush3.bf16.msra.mxu0 %v3866_v1  ;;  %v1150_v12 = vmul.f32 %v4096_v7, %v1111_v5  ;;  %v1151_v13 = vmul.f32 %v4096_v7, %v1112_v6  ;;  %v1152_v19 = vmul.f32 %v4096_v7, %v1113_v9  ;;  %v1153_v20 = vmul.f32 %v4096_v7, %v1114_v10  ;;  %v3872_v60 = vld [vmem:[%s4851_s4] sm:$0xff]  }
  0x12   : > { %3515 = vmatprep.subr.bf16.mxu0 %v3867_v2  ;;  %v1154_v24 = vmul.f32 %v4096_v7, %v1115_v15  ;;  %v1155_v25 = vmul.f32 %v4096_v7, %v1116_v16  ;;  %v1156_v30 = vmul.f32 %v4096_v7, %v1117_v21  ;;  %v1157_v38 = vmul.f32 %v4096_v7, %v1118_v29  ;;  %v4177_v5 = vld [vmem:[%s4087_s14 + $0x40] sm:$0xff]   ;;  %v4194_v29 = vld [vmem:[%s4087_s14 + $0x50] sm:$0xff]  }
  0x13   : > { %v1189_v22 = vadd.f32 %v4111_v14, %v1150_v12  ;;  %v1190_v23 = vadd.f32 %v4111_v14, %v1151_v13  ;;  %v1191_v27 = vadd.f32 %v4111_v14, %v1152_v19  ;;  %v1192_v28 = vadd.f32 %v4111_v14, %v1153_v20  ;;  %v4183_v13 = vld [vmem:[%s4087_s14 + $0x48] sm:$0xff]  }
  0x14   : > { %v1193_v34 = vadd.f32 %v4111_v14, %v1154_v24  ;;  %v1194_v35 = vadd.f32 %v4111_v14, %v1155_v25  ;;  %v1195_v39 = vadd.f32 %v4111_v14, %v1156_v30  ;;  %v1119_v43 = vunpack.c.l.bf16 %v4136_v31 }
  0x15   : > { %3516 = vmatpush3.bf16.msra.mxu0 %v3867_v2  ;;  %v1221_v32 = vmax.f32 %v1189_v22, 0.0  ;;  %v1222_v33 = vmax.f32 %v1190_v23, 0.0  ;;  %v1223_v36 = vmax.f32 %v1191_v27, 0.0  ;;  %v1224_v37 = vmax.f32 %v1192_v28, 0.0 }
  0x16   : > { %3517 = vmatprep.subr.bf16.mxu0 %v3868_v3  ;;  %v1225_v41 = vmax.f32 %v1193_v34, 0.0  ;;  %v1226_v42 = vmax.f32 %v1194_v35, 0.0  ;;  %v1196_v45 = vadd.f32 %v4111_v14, %v1157_v38  ;;  %v1227_v46 = vmax.f32 %v1195_v39, 0.0  ;;  %v4200_v35 = vld [vmem:[%s4087_s14 + $0x58] sm:$0xff]  }
  0x17   : > { %1293 = vst [vmem:[#allocation2 + $0x19] sm:$0xff] %v1221_v32  ;;  %1294 = vst [vmem:[#allocation2 + $0x21] sm:$0xff] %v1222_v33  ;;  %v1120_v47 = vunpack.c.h.bf16 %v4136_v31  ;;  %v1158_v49 = vmul.f32 %v4096_v7, %v1119_v43  ;;  %v1121_v50 = vunpack.c.l.bf16 %v4143_v40  ;;  %v1122_v51 = vunpack.c.h.bf16 %v4143_v40 }
  0x18   : > { %1295 = vst [vmem:[#allocation2 + $0x31] sm:$0xff] %v1223_v36  ;;  %1296 = vst [vmem:[#allocation2 + $0x39] sm:$0xff] %v1224_v37  ;;  %v1228_v52 = vmax.f32 %v1196_v45, 0.0  ;;  %v1123_v54 = vunpack.c.l.bf16 %v4152_v48  ;;  %v1124_v55 = vunpack.c.h.bf16 %v4152_v48  ;;  %v1125_v0 = vunpack.c.l.bf16 %v4161_v56 }
  0x19   : > { %3518 = vmatpush3.bf16.msra.mxu0 %v3868_v3  ;;  %1297 = vst [vmem:[#allocation2 + $0x49] sm:$0xff] %v1225_v41  ;;  %1298 = vst [vmem:[#allocation2 + $0x51] sm:$0xff] %v1226_v42  ;;  %v1159_v53 = vmul.f32 %v4096_v7, %v1120_v47  ;;  %v1197_v57 = vadd.f32 %v4111_v14, %v1158_v49  ;;  %v1160_v58 = vmul.f32 %v4096_v7, %v1121_v50 }
  0x1a   : > { %3519 = vmatprep.subr.bf16.mxu0 %v3869_v18  ;;  %1299 = vst [vmem:[#allocation2 + $0x61] sm:$0xff] %v1227_v46  ;;  %v1161_v59 = vmul.f32 %v4096_v7, %v1122_v51  ;;  %1300 = vst [vmem:[#allocation2 + $0x69] sm:$0xff] %v1228_v52  ;;  %v1162_v62 = vmul.f32 %v4096_v7, %v1123_v54  ;;  %v1163_v63 = vmul.f32 %v4096_v7, %v1124_v55 }
  0x1b   : > { %v1198_v61 = vadd.f32 %v4111_v14, %v1159_v53  ;;  %v1229_v1 = vmax.f32 %v1197_v57, 0.0  ;;  %v1199_v2 = vadd.f32 %v4111_v14, %v1160_v58  ;;  %v1126_v4 = vunpack.c.h.bf16 %v4161_v56  ;;  %v4218_v57 = vld [vmem:[%s4087_s14 + $0x60] sm:$0xff]  }
  0x1c   : > { %v1200_v3 = vadd.f32 %v4111_v14, %v1161_v59  ;;  %v1201_v9 = vadd.f32 %v4111_v14, %v1162_v62  ;;  %v1202_v10 = vadd.f32 %v4111_v14, %v1163_v63  ;;  %v1164_v12 = vmul.f32 %v4096_v7, %v1125_v0 }
  0x1d   : > { %3520 = vmatpush3.bf16.msra.mxu0 %v3869_v18  ;;  %v1230_v6 = vmax.f32 %v1198_v61, 0.0  ;;  %1301 = vst [vmem:[#allocation2 + $0x79] sm:$0xff] %v1229_v1  ;;  %v1231_v15 = vmax.f32 %v1199_v2, 0.0  ;;  %v1165_v18 = vmul.f32 %v4096_v7, %v1126_v4  ;;  %v1127_v22 = vunpack.c.l.bf16 %v4177_v5  ;;  %v462_v61 = vld [vmem:[%s4087_s14 + $0x68] sm:$0xff]   ;;  %v464_v4 = vld [vmem:[%s4087_s14 + $0x70] sm:$0xff]  }
  0x1e   : > { %3521 = vmatprep.subr.bf16.mxu0 %v3870_v26  ;;  %v1232_v16 = vmax.f32 %v1200_v3, 0.0  ;;  %v1233_v19 = vmax.f32 %v1201_v9, 0.0  ;;  %v1234_v20 = vmax.f32 %v1202_v10, 0.0  ;;  %v1203_v21 = vadd.f32 %v4111_v14, %v1164_v12  ;;  %v466_v12 = vld [vmem:[%s4087_s14 + $0x78] sm:$0xff]  }
  0x1f   : > { %1302 = vst [vmem:[#allocation2 + $0x81] sm:$0xff] %v1230_v6  ;;  %1303 = vst [vmem:[#allocation2 + $0x91] sm:$0xff] %v1231_v15  ;;  %v1204_v23 = vadd.f32 %v4111_v14, %v1165_v18  ;;  %v1128_v24 = vunpack.c.h.bf16 %v4177_v5  ;;  %v1129_v25 = vunpack.c.l.bf16 %v4183_v13  ;;  %v1166_v27 = vmul.f32 %v4096_v7, %v1127_v22 }
  0x20   : > { %1304 = vst [vmem:[#allocation2 + $0x99] sm:$0xff] %v1232_v16  ;;  %1305 = vst [vmem:[#allocation2 + $0xa9] sm:$0xff] %v1233_v19  ;;  %v1130_v28 = vunpack.c.h.bf16 %v4183_v13  ;;  %v1131_v34 = vunpack.c.l.bf16 %v4194_v29  ;;  %v1132_v38 = vunpack.c.h.bf16 %v4194_v29  ;;  %v1133_v43 = vunpack.c.l.bf16 %v4200_v35 }
  0x21   : > { %3522 = vmatpush3.bf16.msra.mxu0 %v3870_v26  ;;  %1306 = vst [vmem:[#allocation2 + $0xb1] sm:$0xff] %v1234_v20  ;;  %v1235_v26 = vmax.f32 %v1203_v21, 0.0  ;;  %v1236_v30 = vmax.f32 %v1204_v23, 0.0  ;;  %v1167_v32 = vmul.f32 %v4096_v7, %v1128_v24  ;;  %v1168_v33 = vmul.f32 %v4096_v7, %v1129_v25 }
  0x22   : > { %3523 = vmatprep.subr.bf16.mxu0 %v3871_v44  ;;  %v1205_v36 = vadd.f32 %v4111_v14, %v1166_v27  ;;  %v1169_v37 = vmul.f32 %v4096_v7, %v1130_v28  ;;  %v1170_v42 = vmul.f32 %v4096_v7, %v1131_v34  ;;  %v1171_v46 = vmul.f32 %v4096_v7, %v1132_v38 }
  0x23   : > { %1307 = vst [vmem:[#allocation2 + $0xc1] sm:$0xff] %v1235_v26  ;;  %1308 = vst [vmem:[#allocation2 + $0xc9] sm:$0xff] %v1236_v30  ;;  %v1206_v39 = vadd.f32 %v4111_v14, %v1167_v32  ;;  %v1207_v41 = vadd.f32 %v4111_v14, %v1168_v33  ;;  %v1134_v47 = vunpack.c.h.bf16 %v4200_v35  ;;  %v1172_v52 = vmul.f32 %v4096_v7, %v1133_v43  ;;  %v944_v43 = vld [vmem:[%s4854_s7 + $0x30] sm:$0xff] }
  0x24   : > { %v1208_v45 = vadd.f32 %v4111_v14, %v1169_v37  ;;  %v1209_v51 = vadd.f32 %v4111_v14, %v1170_v42  ;;  %v1210_v54 = vadd.f32 %v4111_v14, %v1171_v46  ;;  %v1137_v0 = vunpack.c.l.bf16 %v462_v61  ;;  %v941_v46 = vld [vmem:[%s4854_s7 + $0x18] sm:$0xff] }
  0x25   : > { %3524 = vmatpush3.bf16.msra.mxu0 %v3871_v44  ;;  %v1237_v44 = vmax.f32 %v1205_v36, 0.0  ;;  %v1238_v49 = vmax.f32 %v1206_v39, 0.0  ;;  %v1239_v50 = vmax.f32 %v1207_v41, 0.0  ;;  %v1173_v55 = vmul.f32 %v4096_v7, %v1134_v47  ;;  %v940_v47 = vld [vmem:[%s4854_s7 + $0x10] sm:$0xff] }
  0x26   : > { %3525 = vmatprep.subr.bf16.mxu0 %v3872_v60  ;;  %v1240_v53 = vmax.f32 %v1208_v45, 0.0  ;;  %v1241_v58 = vmax.f32 %v1209_v51, 0.0  ;;  %v1211_v59 = vadd.f32 %v4111_v14, %v1172_v52  ;;  %v1242_v62 = vmax.f32 %v1210_v54, 0.0  ;;  %v942_v45 = vld [vmem:[%s4854_s7 + $0x20] sm:$0xff] }
  0x27   : > { %1309 = vst [vmem:[#allocation2 + $0xd9] sm:$0xff] %v1237_v44  ;;  %1310 = vst [vmem:[#allocation2 + $0xe1] sm:$0xff] %v1238_v49  ;;  %v1212_v63 = vadd.f32 %v4111_v14, %v1173_v55  ;;  %v1138_v3 = vunpack.c.h.bf16 %v462_v61  ;;  %v1176_v9 = vmul.f32 %v4096_v7, %v1137_v0  ;;  %v1139_v10 = vunpack.c.l.bf16 %v464_v4  ;;  %v943_v44 = vld [vmem:[%s4854_s7 + $0x28] sm:$0xff]  ;;  %v4343_v52 = vld [vmem:[%s4852_s5] ss:$0 sm:$0xff] }
  0x28   : > { %1311 = vst [vmem:[#allocation2 + $0xf1] sm:$0xff] %v1239_v50  ;;  %1312 = vst [vmem:[#allocation2 + $0xf9] sm:$0xff] %v1240_v53  ;;  %v1243_v1 = vmax.f32 %v1211_v59, 0.0  ;;  %v1140_v19 = vunpack.c.h.bf16 %v464_v4  ;;  %v1141_v22 = vunpack.c.l.bf16 %v466_v12  ;;  %v1142_v30 = vunpack.c.h.bf16 %v466_v12  ;;  %v939_v49 = vld [vmem:[%s4854_s7 + $0x8] sm:$0xff]  ;;  %v938_v50 = vld [vmem:[%s4854_s7] sm:$0xff] }
  0x29   : > { %3526 = vmatpush3.bf16.msra.mxu0 %v3872_v60  ;;  %v1135_v60 = vunpack.c.l.bf16 %v4218_v57  ;;  %1313 = vst [vmem:[#allocation2 + $0x109] sm:$0xff] %v1241_v58  ;;  %1314 = vst [vmem:[#allocation2 + $0x111] sm:$0xff] %v1242_v62  ;;  %v1244_v6 = vmax.f32 %v1212_v63, 0.0  ;;  %v1177_v18 = vmul.f32 %v4096_v7, %v1138_v3  ;;  %v1215_v20 = vadd.f32 %v4111_v14, %v1176_v9  ;;  %v4350_v58 = vld [vmem:[%s4853_s6] ss:$0 sm:$0xff] }
  0x2a   : > { %1315 = vst [vmem:[#allocation2 + $0x121] sm:$0xff] %v1243_v1  ;;  %v1178_v21 = vmul.f32 %v4096_v7, %v1139_v10  ;;  %v1179_v26 = vmul.f32 %v4096_v7, %v1140_v19  ;;  %v1180_v32 = vmul.f32 %v4096_v7, %v1141_v22  ;;  %v1181_v37 = vmul.f32 %v4096_v7, %v1142_v30 }
  0x2b   : > { %1316 = vst [vmem:[#allocation2 + $0x129] sm:$0xff] %v1244_v6  ;;  %v1216_v25 = vadd.f32 %v4111_v14, %v1177_v18  ;;  %v1247_v27 = vmax.f32 %v1215_v20, 0.0 }
  0x2c   : > { %3528 = vmatmul.mubr.bf16.vlgmr.msra.gmra.mxu0 %v4099_v8  ;;  %v1136_v8 = vunpack.c.h.bf16 %v4218_v57  ;;  %v1217_v28 = vadd.f32 %v4111_v14, %v1178_v21  ;;  %v1218_v34 = vadd.f32 %v4111_v14, %v1179_v26  ;;  %v1219_v38 = vadd.f32 %v4111_v14, %v1180_v32 }
  0x2d   : > { %3531 = vmatprep.mubr.bf16.mxu0 %v4104_v11  ;;  %v1174_v11 = vmul.f32 %v4096_v7, %v1135_v60  ;;  %v1248_v33 = vmax.f32 %v1216_v25, 0.0  ;;  %1319 = vst [vmem:[#allocation2 + $0x151] sm:$0xff] %v1247_v27  ;;  %v1220_v39 = vadd.f32 %v4111_v14, %v1181_v37 }
  0x2e   : > { %v1175_v2 = vmul.f32 %v4096_v7, %v1136_v8  ;;  %v1249_v36 = vmax.f32 %v1217_v28, 0.0  ;;  %v1251_v41 = vmax.f32 %v1219_v38, 0.0  ;;  %v3997_v7 = vmov 0.0  }
  0x2f   : > { %v1213_v15 = vadd.f32 %v4111_v14, %v1174_v11  ;;  %1320 = vst [vmem:[#allocation2 + $0x159] sm:$0xff] %v1248_v33  ;;  %v1252_v42 = vmax.f32 %v1220_v39, 0.0  ;;  %3559 = vmatprep.subr.mxu1 %v3997_v7  ;;  %1253 = vst [vmem:[#allocation2] sm:$0xff] %v3997_v7  ;;  %3591 = vmatprep.mubr.msk.f32.mxu1 %vm3998_vm0, %v3997_v7 }
  0x30   : > { %v1214_v16 = vadd.f32 %v4111_v14, %v1175_v2  ;;  %1321 = vst [vmem:[#allocation2 + $0x169] sm:$0xff] %v1249_v36  ;;  %1323 = vst [vmem:[#allocation2 + $0x181] sm:$0xff] %v1251_v41  ;;  %v953_v14 = vld [vmem:[%s4854_s7 + $0x78] sm:$0xff] }
  0x31   : > { %v1245_v23 = vmax.f32 %v1213_v15, 0.0  ;;  %1324 = vst [vmem:[#allocation2 + $0x189] sm:$0xff] %v1252_v42  ;;  %1254 = vst [vmem:[#allocation2 + $0x8] sm:$0xff] %v3997_v7  ;;  %3560 = vmatpush3.msra.mxu1 %v953_v14 }
  0x32   : > { %v1246_v24 = vmax.f32 %v1214_v16, 0.0  ;;  %1255 = vst [vmem:[#allocation2 + $0x10] sm:$0x3] %v3997_v7  ;;  %1261 = vst [vmem:[#allocation2 + $0x18] sm:$0x1] %v3997_v7  ;;  %3561 = vmatprep.subr.mxu1 %v3997_v7 }
  0x33   : > { %1317 = vst [vmem:[#allocation2 + $0x139] sm:$0xff] %v1245_v23  ;;  %1262 = vst [vmem:[#allocation2 + $0x30] sm:$0x1] %v3997_v7 }
  0x34   : > { %3532 = vmatmul.mubr.bf16.gmra.mxu0 %v4116_v17  ;;  %1318 = vst [vmem:[#allocation2 + $0x141] sm:$0xff] %v1246_v24  ;;  %v1250_v17 = vmax.f32 %v1218_v34, 0.0  ;;  %1263 = vst [vmem:[#allocation2 + $0x48] sm:$0x1] %v3997_v7 }
  0x35   : > { %3535 = vmatprep.mubr.bf16.mxu0 %v4136_v31  ;;  %1264 = vst [vmem:[#allocation2 + $0x60] sm:$0x1] %v3997_v7  ;;  %1265 = vst [vmem:[#allocation2 + $0x78] sm:$0x1] %v3997_v7  ;;  %v952_v31 = vld [vmem:[%s4854_s7 + $0x70] sm:$0xff] }
  0x36   : > { %1322 = vst [vmem:[#allocation2 + $0x171] sm:$0xff] %v1250_v17  ;;  %1266 = vst [vmem:[#allocation2 + $0x90] sm:$0x1] %v3997_v7  ;;  %3562 = vmatpush3.msra.mxu1 %v952_v31 }
  0x37   : > { %1267 = vst [vmem:[#allocation2 + $0xa8] sm:$0x1] %v3997_v7  ;;  %1268 = vst [vmem:[#allocation2 + $0xc0] sm:$0x1] %v3997_v7  ;;  %3563 = vmatprep.subr.mxu1 %v3997_v7 }
  0x38   : > { %1269 = vst [vmem:[#allocation2 + $0xd8] sm:$0x1] %v3997_v7  ;;  %1270 = vst [vmem:[#allocation2 + $0xf0] sm:$0x1] %v3997_v7 }
  0x39   : > { %1271 = vst [vmem:[#allocation2 + $0x108] sm:$0x1] %v3997_v7  ;;  %1272 = vst [vmem:[#allocation2 + $0x120] sm:$0x1] %v3997_v7 }
  0x3a   : > { %1273 = vst [vmem:[#allocation2 + $0x138] sm:$0x1] %v3997_v7  ;;  %1274 = vst [vmem:[#allocation2 + $0x150] sm:$0x1] %v3997_v7 }
  0x3b   : > { %1275 = vst [vmem:[#allocation2 + $0x168] sm:$0x1] %v3997_v7  ;;  %1276 = vst [vmem:[#allocation2 + $0x180] sm:$0x1] %v3997_v7 }
  0x3c   : > { %3536 = vmatmul.mubr.bf16.gmra.mxu0 %v4143_v40  ;;  %v951_v40 = vld [vmem:[%s4854_s7 + $0x68] sm:$0xff] }
  0x3d   : > { %3539 = vmatprep.mubr.bf16.mxu0 %v4152_v48  ;;  %3564 = vmatpush3.msra.mxu1 %v951_v40  ;;  %v950_v48 = vld [vmem:[%s4854_s7 + $0x60] sm:$0xff] }
  0x3e   : > { %3565 = vmatprep.subr.mxu1 %v3997_v7 }
  0x3f   : > { %3566 = vmatpush3.msra.mxu1 %v950_v48 }
  0x40   : > { %3567 = vmatprep.subr.mxu1 %v3997_v7 }
  0x44   : > { %3540 = vmatmul.mubr.bf16.gmra.mxu0 %v4161_v56  ;;  %v949_v56 = vld [vmem:[%s4854_s7 + $0x58] sm:$0xff] }
  0x45   : > { %3543 = vmatprep.mubr.bf16.mxu0 %v4177_v5  ;;  %3568 = vmatpush3.msra.mxu1 %v949_v56  ;;  %v948_v5 = vld [vmem:[%s4854_s7 + $0x50] sm:$0xff] }
  0x46   : > { %3569 = vmatprep.subr.mxu1 %v3997_v7 }
  0x47   : > { %3570 = vmatpush3.msra.mxu1 %v948_v5 }
  0x48   : > { %3571 = vmatprep.subr.mxu1 %v3997_v7 }
  0x4c   : > { %3544 = vmatmul.mubr.bf16.gmra.mxu0 %v4183_v13  ;;  %v947_v13 = vld [vmem:[%s4854_s7 + $0x48] sm:$0xff] }
  0x4d   : > { %3547 = vmatprep.mubr.bf16.mxu0 %v4194_v29  ;;  %3572 = vmatpush3.msra.mxu1 %v947_v13  ;;  %v946_v29 = vld [vmem:[%s4854_s7 + $0x40] sm:$0xff] }
  0x4e   : > { %3573 = vmatprep.subr.mxu1 %v3997_v7 }
  0x4f   : > { %3574 = vmatpush3.msra.mxu1 %v946_v29 }
  0x50   : > { %3575 = vmatprep.subr.mxu1 %v3997_v7 }
  0x54   : > { %3548 = vmatmul.mubr.bf16.gmra.mxu0 %v4200_v35  ;;  %v945_v35 = vld [vmem:[%s4854_s7 + $0x38] sm:$0xff] }
  0x55   : > { %3551 = vmatprep.mubr.bf16.mxu0 %v4218_v57  ;;  %3576 = vmatpush3.msra.mxu1 %v945_v35 }
  0x56   : > { %3577 = vmatprep.subr.mxu1 %v3997_v7 }
  0x57   : > { %3578 = vmatpush3.msra.mxu1 %v944_v43 }
  0x58   : > { %3579 = vmatprep.subr.mxu1 %v3997_v7 }
  0x59   : > { %3580 = vmatpush3.msra.mxu1 %v943_v44 }
  0x5a   : > { %3581 = vmatprep.subr.mxu1 %v3997_v7 }
  0x5b   : > { %3582 = vmatpush3.msra.mxu1 %v942_v45 }
  0x5c   : > { %3552 = vmatmul.mubr.bf16.gmra.mxu0 %v462_v61  ;;  %3583 = vmatprep.subr.mxu1 %v3997_v7 }
  0x5d   : > { %3555 = vmatprep.mubr.bf16.mxu0 %v464_v4  ;;  %3584 = vmatpush3.msra.mxu1 %v941_v46 }
  0x5e   : > { %3585 = vmatprep.subr.mxu1 %v3997_v7 }
  0x5f   : > { %3586 = vmatpush3.msra.mxu1 %v940_v47 }
  0x60   : > { %3587 = vmatprep.subr.mxu1 %v3997_v7 }
  0x61   : > { %3588 = vmatpush3.msra.mxu1 %v939_v49 }
  0x62   : > { %3589 = vmatprep.subr.mxu1 %v3997_v7 }
  0x63   : > { %3590 = vmatpush3.msra.mxu1 %v938_v50 }
  0x64   : > { %3556 = vmatmul.mubr.bf16.gmra.mxu0 %v466_v12  ;;  %3594 = vmatprep.subr.mxu1 %v3997_v7 }
  0xec   : > { %v3529_v51 = vpop.f32.mrf.mxu0 }
  0xed   : > { %v798_v57 = vmul.f32 %v3529_v51, %v4343_v52 }
  0xee   : > { %v662_v53 = vpop.f32.mrf.mxu0 }
  0xef   : > { %v796_v54 = vmul.f32 %v4343_v52, %v662_v53  ;;  %v837_v63 = vadd.f32 %v4350_v58, %v798_v57 }
  0xf0   : > { %v3530_v55 = vpop.f32.mrf.mxu0 }
  0xf1   : > { %v835_v60 = vadd.f32 %v4350_v58, %v796_v54  ;;  %v799_v8 = vmul.f32 %v3530_v55, %v4343_v52  ;;  %v869_v9 = vmax.f32 %v837_v63, 0.0 }
  0xf2   : > { %v665_v59 = vpop.f32.mrf.mxu0 }
  0xf3   : > { %v797_v61 = vmul.f32 %v4343_v52, %v665_v59  ;;  %v867_v11 = vmax.f32 %v835_v60, 0.0  ;;  %v838_v2 = vadd.f32 %v4350_v58, %v799_v8 }
  0xf4   : > { %v3533_v62 = vpop.f32.mrf.mxu0 }
  0xf5   : > { %v836_v0 = vadd.f32 %v4350_v58, %v797_v61  ;;  %v802_v12 = vmul.f32 %v3533_v62, %v4343_v52  ;;  %v870_v18 = vmax.f32 %v838_v2, 0.0 }
  0xf6   : > { %v678_v1 = vpop.f32.mrf.mxu0 }
  0xf7   : > { %v868_v3 = vmax.f32 %v836_v0, 0.0  ;;  %v800_v4 = vmul.f32 %v4343_v52, %v678_v1  ;;  %v841_v23 = vadd.f32 %v4350_v58, %v802_v12 }
  0xf8   : > { %v3534_v6 = vpop.f32.mrf.mxu0 }
  0xf9   : > { %v899_v10 = vadd.f32 %v868_v3, %v867_v11  ;;  %v839_v15 = vadd.f32 %v4350_v58, %v800_v4  ;;  %v803_v20 = vmul.f32 %v3534_v6, %v4343_v52  ;;  %v873_v36 = vmax.f32 %v841_v23, 0.0 }
  0xfa   : > { %v681_v16 = vpop.f32.mrf.mxu0 }
  0xfb   : > { %v900_v19 = vadd.f32 %v899_v10, %v869_v9  ;;  %v801_v21 = vmul.f32 %v4343_v52, %v681_v16  ;;  %v871_v24 = vmax.f32 %v839_v15, 0.0  ;;  %v842_v30 = vadd.f32 %v4350_v58, %v803_v20 }
  0xfc   : > { %v3537_v22 = vpop.f32.mrf.mxu0 }
  0xfd   : > { %v901_v25 = vadd.f32 %v900_v19, %v870_v18  ;;  %v840_v26 = vadd.f32 %v4350_v58, %v801_v21  ;;  %v806_v38 = vmul.f32 %v3537_v22, %v4343_v52  ;;  %v874_v41 = vmax.f32 %v842_v30, 0.0 }
  0xfe   : > { %v694_v27 = vpop.f32.mrf.mxu0 }
  0xff   : > { %v902_v28 = vadd.f32 %v901_v25, %v871_v24  ;;  %v872_v32 = vmax.f32 %v840_v26, 0.0  ;;  %v804_v33 = vmul.f32 %v4343_v52, %v694_v27  ;;  %v845_v48 = vadd.f32 %v4350_v58, %v806_v38 }
 0x100   : > { %v3538_v34 = vpop.f32.mrf.mxu0 }
 0x101   : > { %v903_v37 = vadd.f32 %v902_v28, %v872_v32  ;;  %v843_v17 = vadd.f32 %v4350_v58, %v804_v33  ;;  %v807_v14 = vmul.f32 %v3538_v34, %v4343_v52  ;;  %v877_v47 = vmax.f32 %v845_v48, 0.0 }
 0x102   : > { %v697_v39 = vpop.f32.mrf.mxu0 }
 0x103   : > { %v904_v42 = vadd.f32 %v903_v37, %v873_v36  ;;  %v805_v31 = vmul.f32 %v4343_v52, %v697_v39  ;;  %v875_v56 = vmax.f32 %v843_v17, 0.0  ;;  %v846_v43 = vadd.f32 %v4350_v58, %v807_v14 }
 0x104   : > { %v3541_v40 = vpop.f32.mrf.mxu0 }
 0x105   : > { %v905_v5 = vadd.f32 %v904_v42, %v874_v41  ;;  %v844_v13 = vadd.f32 %v4350_v58, %v805_v31  ;;  %v810_v50 = vmul.f32 %v3541_v40, %v4343_v52  ;;  %v878_v54 = vmax.f32 %v846_v43, 0.0 }
 0x106   : > { %v710_v29 = vpop.f32.mrf.mxu0 }
 0x107   : > { %v906_v35 = vadd.f32 %v905_v5, %v875_v56  ;;  %v876_v44 = vmax.f32 %v844_v13, 0.0  ;;  %v808_v45 = vmul.f32 %v4343_v52, %v710_v29  ;;  %v849_v8 = vadd.f32 %v4350_v58, %v810_v50 }
 0x108   : > { %v3542_v46 = vpop.f32.mrf.mxu0 }
 0x109   : > { %v907_v49 = vadd.f32 %v906_v35, %v876_v44  ;;  %v847_v51 = vadd.f32 %v4350_v58, %v808_v45  ;;  %v811_v57 = vmul.f32 %v3542_v46, %v4343_v52  ;;  %v881_v6 = vmax.f32 %v849_v8, 0.0 }
 0x10a   : > { %v713_v53 = vpop.f32.mrf.mxu0 }
 0x10b   : > { %v908_v55 = vadd.f32 %v907_v49, %v877_v47  ;;  %v809_v59 = vmul.f32 %v4343_v52, %v713_v53  ;;  %v879_v61 = vmax.f32 %v847_v51, 0.0  ;;  %v850_v11 = vadd.f32 %v4350_v58, %v811_v57 }
 0x10c   : > { %v3545_v60 = vpop.f32.mrf.mxu0 }
 0x10d   : > { %v909_v62 = vadd.f32 %v908_v55, %v878_v54  ;;  %v848_v63 = vadd.f32 %v4350_v58, %v809_v59  ;;  %v814_v10 = vmul.f32 %v3545_v60, %v4343_v52  ;;  %v882_v16 = vmax.f32 %v850_v11, 0.0 }
 0x10e   : > { %v726_v0 = vpop.f32.mrf.mxu0 }
 0x10f   : > { %v910_v1 = vadd.f32 %v909_v62, %v879_v61  ;;  %v880_v2 = vmax.f32 %v848_v63, 0.0  ;;  %v812_v3 = vmul.f32 %v4343_v52, %v726_v0  ;;  %v853_v22 = vadd.f32 %v4350_v58, %v814_v10 }
 0x110   : > { %v3546_v4 = vpop.f32.mrf.mxu0 }
 0x111   : > { %v911_v9 = vadd.f32 %v910_v1, %v880_v2  ;;  %v851_v12 = vadd.f32 %v4350_v58, %v812_v3  ;;  %v815_v19 = vmul.f32 %v3546_v4, %v4343_v52  ;;  %v885_v34 = vmax.f32 %v853_v22, 0.0 }
 0x112   : > { %v729_v15 = vpop.f32.mrf.mxu0 }
 0x113   : > { %v912_v18 = vadd.f32 %v911_v9, %v881_v6  ;;  %v813_v20 = vmul.f32 %v4343_v52, %v729_v15  ;;  %v883_v23 = vmax.f32 %v851_v12, 0.0  ;;  %v854_v28 = vadd.f32 %v4350_v58, %v815_v19 }
 0x114   : > { %v3549_v21 = vpop.f32.mrf.mxu0 }
 0x115   : > { %v913_v24 = vadd.f32 %v912_v18, %v882_v16  ;;  %v852_v25 = vadd.f32 %v4350_v58, %v813_v20  ;;  %v818_v37 = vmul.f32 %v3549_v21, %v4343_v52  ;;  %v886_v39 = vmax.f32 %v854_v28, 0.0 }
 0x116   : > { %v742_v26 = vpop.f32.mrf.mxu0 }
 0x117   : > { %v914_v27 = vadd.f32 %v913_v24, %v883_v23  ;;  %v884_v30 = vmax.f32 %v852_v25, 0.0  ;;  %v816_v32 = vmul.f32 %v4343_v52, %v742_v26  ;;  %v857_v40 = vadd.f32 %v4350_v58, %v818_v37 }
 0x118   : > { %v3550_v33 = vpop.f32.mrf.mxu0 }
 0x119   : > { %v915_v36 = vadd.f32 %v914_v27, %v884_v30  ;;  %v855_v38 = vadd.f32 %v4350_v58, %v816_v32  ;;  %v819_v42 = vmul.f32 %v3550_v33, %v4343_v52  ;;  %v889_v46 = vmax.f32 %v857_v40, 0.0  ;;  %v3898_v40 = vld [vmem:[%s4850_s3 + $0x18] sm:$0xff]  }
 0x11a   : > { %v745_v17 = vpop.f32.mrf.mxu0 }
 0x11b   : > { %v916_v41 = vadd.f32 %v915_v36, %v885_v34  ;;  %v817_v14 = vmul.f32 %v4343_v52, %v745_v17  ;;  %v887_v48 = vmax.f32 %v855_v38, 0.0  ;;  %v858_v35 = vadd.f32 %v4350_v58, %v819_v42  ;;  %v3890_v42 = vld [vmem:[%s4850_s3 + $0x38] sm:$0xff]  }
 0x11c   : > { %v3553_v31 = vpop.f32.mrf.mxu0  ;;  %3623 = vmatprep.subr.bf16.mxu0 %v3890_v42 }
 0x11d   : > { %v917_v56 = vadd.f32 %v916_v41, %v886_v39  ;;  %v856_v5 = vadd.f32 %v4350_v58, %v817_v14  ;;  %v822_v49 = vmul.f32 %v3553_v31, %v4343_v52  ;;  %v890_v53 = vmax.f32 %v858_v35, 0.0  ;;  %v1025_v41 = vld [vmem:[%s4855_s8] sm:$0x3]  ;;  %3624 = vmatpush3.bf16.msra.mxu0 %v3890_v42  ;;  %v3892_v14 = vld [vmem:[%s4850_s3 + $0x30] sm:$0xff]  }
 0x11e   : > { %v758_v13 = vpop.f32.mrf.mxu0  ;;  %3625 = vmatprep.subr.bf16.mxu0 %v3892_v14  ;;  %v3896_v31 = vld [vmem:[%s4850_s3 + $0x20] sm:$0xff]  }
 0x11f   : > { %v918_v29 = vadd.f32 %v917_v56, %v887_v48  ;;  %v888_v43 = vmax.f32 %v856_v5, 0.0  ;;  %v820_v44 = vmul.f32 %v4343_v52, %v758_v13  ;;  %v861_v60 = vadd.f32 %v4350_v58, %v822_v49  ;;  %v3900_v48 = vld [vmem:[%s4850_s3 + $0x10] sm:$0xff]   ;;  %v3902_v56 = vld [vmem:[%s4850_s3 + $0x8] sm:$0xff]   ;;  %v3904_v5 = vld [vmem:[%s4850_s3] sm:$0xff]  }
 0x120   : > { %v3554_v45 = vpop.f32.mrf.mxu0  ;;  %v1325_v13 = vld [vmem:[#allocation2] ss:$2 sm:$0xff] }
 0x121   : > { %v919_v47 = vadd.f32 %v918_v29, %v888_v43  ;;  %v859_v50 = vadd.f32 %v4350_v58, %v820_v44  ;;  %v823_v55 = vmul.f32 %v3554_v45, %v4343_v52  ;;  %v893_v4 = vmax.f32 %v861_v60, 0.0  ;;  %3626 = vmatpush3.bf16.msra.mxu0 %v3892_v14  ;;  %v1327_v29 = vld [vmem:[#allocation2 + $0x30] ss:$2 sm:$0xff]  ;;  %v1329_v43 = vld [vmem:[#allocation2 + $0x60] ss:$2 sm:$0xff] }
 0x122   : > { %v761_v51 = vpop.f32.mrf.mxu0  ;;  %v1340_v35 = vpack.c.bf16 %v1327_v29, %v1325_v13  ;;  %v1331_v44 = vld [vmem:[#allocation2 + $0x90] ss:$2 sm:$0xff]  ;;  %v3910_v49 = vld [vmem:[%s4850_s3 + $0xe8] sm:$0xff]   ;;  %v3944_v42 = vld [vmem:[%s4850_s3 + $0x1a0] sm:$0xff]  }
 0x123   : > { %v920_v54 = vadd.f32 %v919_v47, %v889_v46  ;;  %v821_v57 = vmul.f32 %v4343_v52, %v761_v51  ;;  %v891_v8 = vmax.f32 %v859_v50, 0.0  ;;  %v862_v1 = vadd.f32 %v4350_v58, %v823_v55  ;;  %v3906_v46 = vld [vmem:[%s4850_s3 + $0xf8] sm:$0xff]   ;;  %v3908_v47 = vld [vmem:[%s4850_s3 + $0xf0] sm:$0xff]   ;;  %v3912_v50 = vld [vmem:[%s4850_s3 + $0xe0] sm:$0xff]  }
 0x124   : > { %v3557_v59 = vpop.f32.mrf.mxu0  ;;  %v1341_v45 = vpack.c.bf16 %v1331_v44, %v1329_v43  ;;  %3639 = vmatprep.mubr.bf16.mxu0 %v1340_v35  ;;  %v1333_v51 = vld [vmem:[#allocation2 + $0xc0] ss:$2 sm:$0xff]  ;;  %v3946_v14 = vld [vmem:[%s4850_s3 + $0x198] sm:$0xff]   ;;  %v3891_v35 = vld [vmem:[%s4850_s3 + $0x70] sm:$0xff]  }
 0x125   : > { %v921_v61 = vadd.f32 %v920_v54, %v890_v53  ;;  %v860_v62 = vadd.f32 %v4350_v58, %v821_v57  ;;  %v826_v9 = vmul.f32 %v3557_v59, %v4343_v52  ;;  %v894_v15 = vmax.f32 %v862_v1, 0.0  ;;  %v1335_v53 = vld [vmem:[#allocation2 + $0xf0] ss:$2 sm:$0xff]  ;;  %v1337_v57 = vld [vmem:[#allocation2 + $0x120] ss:$2 sm:$0xff] }
 0x126   : > { %v774_v63 = vpop.f32.mrf.mxu0  ;;  %v3914_v54 = vld [vmem:[%s4850_s3 + $0xd8] sm:$0xff]   ;;  %v1342_v55 = vpack.c.bf16 %v1335_v53, %v1333_v51  ;;  %v2386_v44 = vld [vmem:[#allocation2 + $0x60] ss:$2 sm:$0xff] }
 0x127   : > { %v922_v0 = vadd.f32 %v921_v61, %v891_v8  ;;  %v892_v11 = vmax.f32 %v860_v62, 0.0  ;;  %v824_v2 = vmul.f32 %v4343_v52, %v774_v63  ;;  %v865_v20 = vadd.f32 %v4350_v58, %v826_v9  ;;  %v1339_v59 = vld [vmem:[#allocation2 + $0x150] ss:$2 sm:$0xff]  ;;  %v3918_v61 = vld [vmem:[%s4850_s3 + $0xc8] sm:$0xff]   ;;  %v3920_v62 = vld [vmem:[%s4850_s3 + $0xc0] sm:$0xff]  }
 0x128   : > { %v3558_v3 = vpop.f32.mrf.mxu0  ;;  %v1343_v60 = vpack.c.bf16 %v1339_v59, %v1337_v57  ;;  %v3916_v8 = vld [vmem:[%s4850_s3 + $0xd0] sm:$0xff]   ;;  %v1781_v63 = vld [vmem:[#allocation2 + $0x18] ss:$2 sm:$0xff]  ;;  %v3893_v53 = vld [vmem:[%s4850_s3 + $0x68] sm:$0xff]  }
 0x129   : > { %v923_v6 = vadd.f32 %v922_v0, %v892_v11  ;;  %v863_v10 = vadd.f32 %v4350_v58, %v824_v2  ;;  %v827_v18 = vmul.f32 %v3558_v3, %v4343_v52  ;;  %v897_v27 = vmax.f32 %v865_v20, 0.0  ;;  %v1783_v0 = vld [vmem:[#allocation2 + $0x48] ss:$2 sm:$0xff]  ;;  %v1785_v11 = vld [vmem:[#allocation2 + $0x78] ss:$2 sm:$0xff] }
 0x12a   : > { %v777_v12 = vpop.f32.mrf.mxu0  ;;  %v1796_v1 = vpack.c.bf16 %v1783_v0, %v1781_v63  ;;  %v1787_v2 = vld [vmem:[#allocation2 + $0xa8] ss:$2 sm:$0xff]  ;;  %v1789_v9 = vld [vmem:[#allocation2 + $0xd8] ss:$2 sm:$0xff] }
 0x12b   : > { %v924_v16 = vadd.f32 %v923_v6, %v893_v4  ;;  %v825_v19 = vmul.f32 %v4343_v52, %v777_v12  ;;  %v895_v21 = vmax.f32 %v863_v10, 0.0  ;;  %v866_v25 = vadd.f32 %v4350_v58, %v827_v18  ;;  %v3922_v4 = vld [vmem:[%s4856_s9 + $0x38] sm:$0xff]   ;;  %v3924_v6 = vld [vmem:[%s4856_s9 + $0x30] sm:$0xff]   ;;  %v3928_v20 = vld [vmem:[%s4856_s9 + $0x20] sm:$0xff]  }
 0x12c   : > { %v1797_v3 = vpack.c.bf16 %v1787_v2, %v1785_v11  ;;  %v1791_v10 = vld [vmem:[#allocation2 + $0x108] ss:$2 sm:$0xff]  ;;  %v4539_v51 = vld [vmem:[%s4850_s3 + $0x238] sm:$0xff]   ;;  %v4570_v0 = vld [vmem:[%s4850_s3 + $0x220] sm:$0xff]  }
 0x12d   : > { %v925_v22 = vadd.f32 %v924_v16, %v894_v15  ;;  %v864_v23 = vadd.f32 %v4350_v58, %v825_v19  ;;  %v898_v30 = vmax.f32 %v866_v25, 0.0  ;;  %v4422_v58 = vld [vmem:[%s4850_s3 + $0x78] sm:$0xff]   ;;  %v1798_v12 = vpack.c.bf16 %v1791_v10, %v1789_v9  ;;  %v1795_v16 = vld [vmem:[#allocation2 + $0x168] ss:$2 sm:$0xff]  ;;  %v1365_v9 = vld [vmem:[#allocation2 + $0x61] ss:$2 sm:$0xff] }
 0x12e   : > { %v1793_v15 = vld [vmem:[#allocation2 + $0x138] ss:$2 sm:$0xff]  ;;  %v3926_v19 = vld [vmem:[%s4856_s9 + $0x28] sm:$0xff]   ;;  %v1939_v25 = vld [vmem:[#allocation2 + $0x19] ss:$2 sm:$0xff] }
 0x12f   : > { %v926_v24 = vadd.f32 %v925_v22, %v895_v21  ;;  %v896_v26 = vmax.f32 %v864_v23, 0.0  ;;  %v1799_v18 = vpack.c.bf16 %v1795_v16, %v1793_v15  ;;  %v3930_v21 = vld [vmem:[%s4856_s9 + $0x18] sm:$0xff]   ;;  %v3932_v22 = vld [vmem:[%s4856_s9 + $0x10] sm:$0xff]   ;;  %v3934_v23 = vld [vmem:[%s4856_s9 + $0x8] sm:$0xff]  }
 0x130   : > { %v2384_v43 = vld [vmem:[#allocation2 + $0x30] ss:$2 sm:$0xff]  ;;  %v2394_v57 = vld [vmem:[#allocation2 + $0x120] ss:$2 sm:$0xff]  ;;  %v1367_v10 = vld [vmem:[#allocation2 + $0x91] ss:$2 sm:$0xff] }
 0x131   : > { %v927_v28 = vadd.f32 %v926_v24, %v896_v26  ;;  %v3936_v24 = vld [vmem:[%s4856_s9] sm:$0xff]   ;;  %v1941_v26 = vld [vmem:[#allocation2 + $0x49] ss:$2 sm:$0xff]  ;;  %v3897_v63 = vld [vmem:[%s4850_s3 + $0x58] sm:$0xff]  }
 0x132   : > { %v4580_v11 = vld [vmem:[%s4850_s3 + $0x218] sm:$0xff]   ;;  %v3901_v2 = vld [vmem:[%s4850_s3 + $0x48] sm:$0xff]  }
 0x133   : > { %v928_v32 = vadd.f32 %v927_v28, %v897_v27  ;;  %v4497_v27 = vpack.c.bf16 %v1941_v26, %v1939_v25  ;;  %v1943_v28 = vld [vmem:[#allocation2 + $0x79] ss:$2 sm:$0xff]  ;;  %v2704_v25 = vld [vmem:[#allocation2 + $0x92] ss:$2 sm:$0xff]  ;;  %v2706_v26 = vld [vmem:[#allocation2 + $0xc2] ss:$2 sm:$0xff] }
 0x134   : > { %v1369_v15 = vld [vmem:[#allocation2 + $0xc1] ss:$2 sm:$0xff]  ;;  %v1371_v16 = vld [vmem:[#allocation2 + $0xf1] ss:$2 sm:$0xff] }
 0x135   : > { %v929_v33 = vadd.f32 %v928_v32, %v898_v30  ;;  %v1945_v30 = vld [vmem:[#allocation2 + $0xa9] ss:$2 sm:$0xff] }
 0x136   : > { %v4500_v32 = vpack.c.bf16 %v1945_v30, %v1943_v28  ;;  %v2716_v28 = vpack.c.bf16 %v2706_v26, %v2704_v25  ;;  %v1373_v30 = vld [vmem:[#allocation2 + $0x121] ss:$2 sm:$0xff] }
 0x137   : > { %v930_v34 = vrot.slane %v929_v33, 4  ;;  %v3957_v26 = vld [vmem:[%s4850_s3 + $0x1e8] sm:$0xff]  }
 0x139   : > { %v931_v36 = vadd.f32 %v930_v34, %v929_v33  ;;  %v3938_v33 = vld [vmem:[%s4850_s3 + $0x1b8] sm:$0xff]   ;;  %v3940_v34 = vld [vmem:[%s4850_s3 + $0x1b0] sm:$0xff]  }
 0x13b   : > { %v932_v37 = vrot.slane %v931_v36, 2 }
 0x13d   : > { %v933_v38 = vadd.f32 %v932_v37, %v931_v36  ;;  %v1947_v36 = vld [vmem:[#allocation2 + $0xd9] ss:$2 sm:$0xff]  ;;  %v1949_v37 = vld [vmem:[#allocation2 + $0x109] ss:$2 sm:$0xff] }
 0x13f   : > { %v934_v52 = vrot.slane %v933_v38, 1 }
 0x141   : > { %v935_v17 = vadd.f32 %v934_v52, %v933_v38  ;;  %v4509_v38 = vpack.c.bf16 %v1949_v37, %v1947_v36  ;;  %v1951_v52 = vld [vmem:[#allocation2 + $0x139] ss:$2 sm:$0xff]  ;;  %v1624_v36 = vld [vmem:[#allocation2 + $0x2] ss:$2 sm:$0xff]  ;;  %v1626_v37 = vld [vmem:[#allocation2 + $0x32] ss:$2 sm:$0xff] }
 0x143   : > { %v937_v39 = vmul.f32 0.00390625, %v935_v17  ;;  %v1953_v17 = vld [vmem:[#allocation2 + $0x169] ss:$2 sm:$0xff] }
 0x145   : > { %3592 = vmatmul.mubr.f32.vlgmr.msra.gmra.mxu1 %v937_v39  ;;  %v4512_v39 = vpack.c.bf16 %v1953_v17, %v1951_v52  ;;  %v1639_v17 = vpack.c.bf16 %v1626_v37, %v1624_v36  ;;  %v3959_v37 = vld [vmem:[%s4850_s3 + $0x1e0] sm:$0xff]  }
 0x146   : > { %3595 = vmatpush3.msk.msra.mxu1 %vm1030_vm1, %v1025_v41  ;;  %3596 = vmatprep.mubr.msk.f32.mxu1 %vm3998_vm0, %v3997_v7  ;;  %v3894_v7 = vld [vmem:[%s4850_s3 + $0x28] sm:$0xff]  }
 0x147   : > { %3599 = vmatprep.subr.bf16.mxu1 %v4422_v58  ;;  %3627 = vmatprep.subr.bf16.mxu0 %v3894_v7  ;;  %v3942_v41 = vld [vmem:[%s4850_s3 + $0x1a8] sm:$0xff]  }
 0x148   : > { %3628 = vmatpush3.bf16.msra.mxu0 %v3894_v7  ;;  %v3948_v7 = vld [vmem:[%s4850_s3 + $0x190] sm:$0xff]  }
 0x149   : > { %3629 = vmatprep.subr.bf16.mxu0 %v3896_v31 }
 0x14c   : > { %3630 = vmatpush3.bf16.msra.mxu0 %v3896_v31  ;;  %v3950_v31 = vld [vmem:[%s4850_s3 + $0x188] sm:$0xff]  }
 0x14d   : > { %3631 = vmatprep.subr.bf16.mxu0 %v3898_v40 }
 0x150   : > { %3632 = vmatpush3.bf16.msra.mxu0 %v3898_v40  ;;  %v1361_v40 = vld [vmem:[#allocation2 + $0x1] ss:$2 sm:$0xff] }
 0x151   : > { %3633 = vmatprep.subr.bf16.mxu0 %v3900_v48 }
 0x154   : > { %3634 = vmatpush3.bf16.msra.mxu0 %v3900_v48  ;;  %v1363_v48 = vld [vmem:[#allocation2 + $0x31] ss:$2 sm:$0xff] }
 0x155   : > { %3635 = vmatprep.subr.bf16.mxu0 %v3902_v56  ;;  %v1376_v13 = vpack.c.bf16 %v1363_v48, %v1361_v40  ;;  %v1628_v40 = vld [vmem:[#allocation2 + $0x62] ss:$2 sm:$0xff]  ;;  %v1630_v48 = vld [vmem:[#allocation2 + $0x92] ss:$2 sm:$0xff] }
 0x158   : > { %3636 = vmatpush3.bf16.msra.mxu0 %v3902_v56  ;;  %v3952_v56 = vld [vmem:[%s4850_s3 + $0x180] sm:$0xff]  }
 0x159   : > { %3637 = vmatprep.subr.bf16.mxu0 %v3904_v5 }
 0x15c   : > { %3638 = vmatpush3.bf16.msra.mxu0 %v3904_v5 }
 0x15d   : > { %3671 = vmatprep.subr.bf16.mxu0 %v3906_v46 }
 0x15f   : > { %3640 = vmatmul.mubr.bf16.vlgmr.msra.gmra.mxu0 %v1341_v45 }
 0x160   : > { %3672 = vmatpush3.bf16.msra.mxu0 %v3906_v46  ;;  %3643 = vmatprep.mubr.bf16.mxu0 %v1342_v55  ;;  %v2399_v46 = vpack.c.bf16 %v2386_v44, %v2384_v43  ;;  %v2392_v55 = vld [vmem:[#allocation2 + $0xf0] ss:$2 sm:$0xff] }
 0x161   : > { %3673 = vmatprep.subr.bf16.mxu0 %v3908_v47  ;;  %v2401_v59 = vpack.c.bf16 %v2394_v57, %v2392_v55  ;;  %v3923_v43 = vld [vmem:[%s4850_s3 + $0x130] sm:$0xff]   ;;  %v3937_v55 = vld [vmem:[%s4850_s3 + $0x178] sm:$0xff]  }
 0x162   : > { %v1636_v44 = vld [vmem:[#allocation2 + $0x122] ss:$2 sm:$0xff] }
 0x163   : > { %v3939_v57 = vld [vmem:[%s4850_s3 + $0x170] sm:$0xff]  }
 0x164   : > { %3674 = vmatpush3.bf16.msra.mxu0 %v3908_v47  ;;  %v2388_v47 = vld [vmem:[#allocation2 + $0x90] ss:$2 sm:$0xff] }
 0x165   : > { %3675 = vmatprep.subr.bf16.mxu0 %v3910_v49 }
 0x167   : > { %3644 = vmatmul.mubr.bf16.gmra.mxu0 %v1343_v60  ;;  %v2396_v60 = vld [vmem:[#allocation2 + $0x150] ss:$2 sm:$0xff] }
 0x168   : > { %3676 = vmatpush3.bf16.msra.mxu0 %v3910_v49  ;;  %3687 = vmatprep.mubr.bf16.mxu0 %v1796_v1  ;;  %v2390_v49 = vld [vmem:[#allocation2 + $0xc0] ss:$2 sm:$0xff]  ;;  %v3899_v1 = vld [vmem:[%s4850_s3 + $0x50] sm:$0xff]  }
 0x169   : > { %3677 = vmatprep.subr.bf16.mxu0 %v3912_v50 }
 0x16c   : > { %3678 = vmatpush3.bf16.msra.mxu0 %v3912_v50  ;;  %v2400_v50 = vpack.c.bf16 %v2390_v49, %v2388_v47  ;;  %v3927_v49 = vld [vmem:[%s4850_s3 + $0x120] sm:$0xff]  }
 0x16d   : > { %3679 = vmatprep.subr.bf16.mxu0 %v3914_v54 }
 0x170   : > { %3680 = vmatpush3.bf16.msra.mxu0 %v3914_v54  ;;  %v4550_v54 = vld [vmem:[%s4850_s3 + $0x230] sm:$0xff]  }
 0x171   : > { %3681 = vmatprep.subr.bf16.mxu0 %v3916_v8 }
 0x174   : > { %3682 = vmatpush3.bf16.msra.mxu0 %v3916_v8  ;;  %v2398_v8 = vld [vmem:[#allocation2 + $0x180] ss:$2 sm:$0xff] }
 0x175   : > { %3683 = vmatprep.subr.bf16.mxu0 %v3918_v61 }
 0x178   : > { %3684 = vmatpush3.bf16.msra.mxu0 %v3918_v61  ;;  %v2402_v61 = vpack.c.bf16 %v2398_v8, %v2396_v60  ;;  %v2226_v60 = vld [vmem:[#allocation2 + $0x1a] ss:$2 sm:$0xff]  ;;  %v2228_v8 = vld [vmem:[#allocation2 + $0x4a] ss:$2 sm:$0xff] }
 0x179   : > { %3685 = vmatprep.subr.bf16.mxu0 %v3920_v62 }
 0x17c   : > { %3686 = vmatpush3.bf16.msra.mxu0 %v3920_v62  ;;  %v4560_v62 = vld [vmem:[%s4850_s3 + $0x228] sm:$0xff]  }
 0x17d   : > { %3719 = vmatprep.subr.bf16.mxu0 %v3922_v4 }
 0x17f   : > { %3688 = vmatmul.mubr.bf16.vlgmr.msra.gmra.mxu0 %v1797_v3  ;;  %v4590_v3 = vld [vmem:[%s4850_s3 + $0x210] sm:$0xff]  }
 0x180   : > { %3720 = vmatpush3.bf16.msra.mxu0 %v3922_v4  ;;  %3691 = vmatprep.mubr.bf16.mxu0 %v1798_v12  ;;  %v3903_v4 = vld [vmem:[%s4850_s3 + $0x40] sm:$0xff]   ;;  %v3905_v12 = vld [vmem:[%s4850_s3 + $0xb8] sm:$0xff]  }
 0x181   : > { %3721 = vmatprep.subr.bf16.mxu0 %v3924_v6 }
 0x184   : > { %3722 = vmatpush3.bf16.msra.mxu0 %v3924_v6  ;;  %v4600_v6 = vld [vmem:[%s4850_s3 + $0x208] sm:$0xff]  }
 0x185   : > { %3723 = vmatprep.subr.bf16.mxu0 %v3926_v19 }
 0x187   : > { %3692 = vmatmul.mubr.bf16.gmra.mxu0 %v1799_v18  ;;  %v1377_v18 = vpack.c.bf16 %v1367_v10, %v1365_v9  ;;  %v2232_v9 = vld [vmem:[#allocation2 + $0xaa] ss:$2 sm:$0xff] }
 0x188   : > { %3724 = vmatpush3.bf16.msra.mxu0 %v3926_v19  ;;  %3735 = vmatprep.mubr.bf16.mxu0 %v4497_v27  ;;  %v4610_v19 = vld [vmem:[%s4850_s3 + $0x200] sm:$0xff]  }
 0x189   : > { %3725 = vmatprep.subr.bf16.mxu0 %v3928_v20 }
 0x18c   : > { %3726 = vmatpush3.bf16.msra.mxu0 %v3928_v20  ;;  %v1378_v20 = vpack.c.bf16 %v1371_v16, %v1369_v15  ;;  %v2234_v15 = vld [vmem:[#allocation2 + $0xda] ss:$2 sm:$0xff]  ;;  %v2236_v16 = vld [vmem:[#allocation2 + $0x10a] ss:$2 sm:$0xff] }
 0x18d   : > { %3727 = vmatprep.subr.bf16.mxu0 %v3930_v21 }
 0x190   : > { %3728 = vmatpush3.bf16.msra.mxu0 %v3930_v21  ;;  %v3907_v21 = vld [vmem:[%s4850_s3 + $0xb0] sm:$0xff]  }
 0x191   : > { %3729 = vmatprep.subr.bf16.mxu0 %v3932_v22 }
 0x194   : > { %3730 = vmatpush3.bf16.msra.mxu0 %v3932_v22  ;;  %v2700_v22 = vld [vmem:[#allocation2 + $0x32] ss:$2 sm:$0xff] }
 0x195   : > { %3731 = vmatprep.subr.bf16.mxu0 %v3934_v23 }
 0x198   : > { %3732 = vmatpush3.bf16.msra.mxu0 %v3934_v23  ;;  %v2702_v23 = vld [vmem:[#allocation2 + $0x62] ss:$2 sm:$0xff] }
 0x199   : > { %3733 = vmatprep.subr.bf16.mxu0 %v3936_v24 }
 0x19c   : > { %3734 = vmatpush3.bf16.msra.mxu0 %v3936_v24  ;;  %v2715_v24 = vpack.c.bf16 %v2702_v23, %v2700_v22  ;;  %v3955_v22 = vld [vmem:[%s4850_s3 + $0x1f0] sm:$0xff]   ;;  %v2238_v23 = vld [vmem:[#allocation2 + $0x13a] ss:$2 sm:$0xff] }
 0x19d   : > { %3767 = vmatprep.subr.bf16.mxu0 %v3938_v33 }
 0x19f   : > { %3736 = vmatmul.mubr.bf16.vlgmr.msra.gmra.mxu0 %v4500_v32 }
 0x1a0   : > { %3768 = vmatpush3.bf16.msra.mxu0 %v3938_v33  ;;  %3739 = vmatprep.mubr.bf16.mxu0 %v4509_v38  ;;  %v1375_v33 = vld [vmem:[#allocation2 + $0x151] ss:$2 sm:$0xff] }
 0x1a1   : > { %3769 = vmatprep.subr.bf16.mxu0 %v3940_v34  ;;  %v1379_v52 = vpack.c.bf16 %v1375_v33, %v1373_v30  ;;  %v2544_v30 = vld [vmem:[#allocation2 + $0x61] ss:$2 sm:$0xff] }
 0x1a4   : > { %3770 = vmatpush3.bf16.msra.mxu0 %v3940_v34  ;;  %v3909_v34 = vld [vmem:[%s4850_s3 + $0xa8] sm:$0xff]  }
 0x1a5   : > { %3771 = vmatprep.subr.bf16.mxu0 %v3942_v41 }
 0x1a7   : > { %3740 = vmatmul.mubr.bf16.gmra.mxu0 %v4512_v39 }
 0x1a8   : > { %3772 = vmatpush3.bf16.msra.mxu0 %v3942_v41  ;;  %3783 = vmatprep.mubr.bf16.mxu0 %v2399_v46  ;;  %v3911_v41 = vld [vmem:[%s4850_s3 + $0xa0] sm:$0xff]   ;;  %v3925_v46 = vld [vmem:[%s4850_s3 + $0x128] sm:$0xff]  }
 0x1a9   : > { %3773 = vmatprep.subr.bf16.mxu0 %v3944_v42 }
 0x1ac   : > { %3774 = vmatpush3.bf16.msra.mxu0 %v3944_v42  ;;  %v3913_v42 = vld [vmem:[%s4850_s3 + $0x98] sm:$0xff]  }
 0x1ad   : > { %3775 = vmatprep.subr.bf16.mxu0 %v3946_v14 }
 0x1b0   : > { %3776 = vmatpush3.bf16.msra.mxu0 %v3946_v14  ;;  %v3915_v14 = vld [vmem:[%s4850_s3 + $0x90] sm:$0xff]  }
 0x1b1   : > { %3777 = vmatprep.subr.bf16.mxu0 %v3948_v7 }
 0x1b4   : > { %3778 = vmatpush3.bf16.msra.mxu0 %v3948_v7  ;;  %v3917_v7 = vld [vmem:[%s4850_s3 + $0x88] sm:$0xff]  }
 0x1b5   : > { %3779 = vmatprep.subr.bf16.mxu0 %v3950_v31 }
 0x1b8   : > { %3780 = vmatpush3.bf16.msra.mxu0 %v3950_v31  ;;  %v3919_v31 = vld [vmem:[%s4850_s3 + $0x80] sm:$0xff]  }
 0x1b9   : > { %3781 = vmatprep.subr.bf16.mxu0 %v3952_v56 }
 0x1bc   : > { %3782 = vmatpush3.bf16.msra.mxu0 %v3952_v56  ;;  %v3921_v56 = vld [vmem:[%s4850_s3 + $0x138] sm:$0xff]  }
 0x1bd   : > { %3815 = vmatprep.subr.bf16.mxu0 %v4539_v51 }
 0x1bf   : > { %3784 = vmatmul.mubr.bf16.vlgmr.msra.gmra.mxu0 %v2400_v50  ;;  %v3929_v50 = vld [vmem:[%s4850_s3 + $0x118] sm:$0xff]  }
 0x1c0   : > { %3816 = vmatpush3.bf16.msra.mxu0 %v4539_v51  ;;  %3787 = vmatprep.mubr.bf16.mxu0 %v2401_v59  ;;  %v3941_v59 = vld [vmem:[%s4850_s3 + $0x168] sm:$0xff]  }
 0x1c1   : > { %3817 = vmatprep.subr.bf16.mxu0 %v4550_v54 }
 0x1c4   : > { %3818 = vmatpush3.bf16.msra.mxu0 %v4550_v54 }
 0x1c5   : > { %3819 = vmatprep.subr.bf16.mxu0 %v4560_v62 }
 0x1c7   : > { %3788 = vmatmul.mubr.bf16.gmra.mxu0 %v2402_v61  ;;  %v2241_v61 = vpack.c.bf16 %v2228_v8, %v2226_v60 }
 0x1c8   : > { %3820 = vmatpush3.bf16.msra.mxu0 %v4560_v62  ;;  %3831 = vmatprep.mubr.bf16.mxu0 %v2715_v24  ;;  %v2240_v24 = vld [vmem:[#allocation2 + $0x16a] ss:$2 sm:$0xff] }
 0x1c9   : > { %3821 = vmatprep.subr.bf16.mxu0 %v4570_v0 }
 0x1cc   : > { %3822 = vmatpush3.bf16.msra.mxu0 %v4570_v0 }
 0x1cd   : > { %3823 = vmatprep.subr.bf16.mxu0 %v4580_v11 }
 0x1d0   : > { %3824 = vmatpush3.bf16.msra.mxu0 %v4580_v11 }
 0x1d1   : > { %3825 = vmatprep.subr.bf16.mxu0 %v4590_v3 }
 0x1d4   : > { %3826 = vmatpush3.bf16.msra.mxu0 %v4590_v3 }
 0x1d5   : > { %3827 = vmatprep.subr.bf16.mxu0 %v4600_v6 }
 0x1d8   : > { %3828 = vmatpush3.bf16.msra.mxu0 %v4600_v6 }
 0x1d9   : > { %3829 = vmatprep.subr.bf16.mxu0 %v4610_v19 }
 0x1dc   : > { %3830 = vmatpush3.bf16.msra.mxu0 %v4610_v19 }
 0x1df   : > { %3832 = vmatmul.mubr.bf16.vlgmr.msra.gmra.mxu0 %v2716_v28  ;;  %v2542_v28 = vld [vmem:[#allocation2 + $0x31] ss:$2 sm:$0xff] }
 0x1e0   : > { %v2557_v36 = vpack.c.bf16 %v2544_v30, %v2542_v28 }
 0x205   : > { %v1020_v5 = vpop.f32.mrf.mxu1 }
 0x206   : > { %v1024_v29 = vmax.f32 %v1020_v5, 0.0  ;;  %v1632_v5 = vld [vmem:[#allocation2 + $0xc2] ss:$2 sm:$0xff] }
 0x207   : > { %v3593_v45 = vpop.f32.mrf.mxu1 }
 0x208   : > { %3597 = vmatmul.mubr.msk.f32.vlgmr.msra.gmra.mxu1 %vm1026_vm2, %v1024_v29  ;;  %v1640_v29 = vpack.c.bf16 %v1630_v48, %v1628_v40  ;;  %v1638_v45 = vld [vmem:[#allocation2 + $0x152] ss:$2 sm:$0xff] }
 0x209   : > { %3600 = vmatpush3.bf16.msra.mxu1 %v4422_v58  ;;  %3615 = vmatprep.mubr.bf16.mxu1 %v1376_v13  ;;  %v3895_v58 = vld [vmem:[%s4850_s3 + $0x60] sm:$0xff]   ;;  %v1642_v47 = vpack.c.bf16 %v1638_v45, %v1636_v44 }
 0x20a   : > { %3601 = vmatprep.subr.bf16.mxu1 %v3891_v35  ;;  %v1634_v13 = vld [vmem:[#allocation2 + $0xf2] ss:$2 sm:$0xff] }
 0x20b   : > { %v3967_v48 = vld [vmem:[%s4850_s3 + $0x1c0] sm:$0xff]  }
 0x20d   : > { %3602 = vmatpush3.bf16.msra.mxu1 %v3891_v35  ;;  %v1641_v35 = vpack.c.bf16 %v1634_v13, %v1632_v5  ;;  %v2548_v5 = vld [vmem:[#allocation2 + $0xc1] ss:$2 sm:$0xff] }
 0x20e   : > { %3603 = vmatprep.subr.bf16.mxu1 %v3893_v53 }
 0x211   : > { %3604 = vmatpush3.bf16.msra.mxu1 %v3893_v53  ;;  %v3931_v53 = vld [vmem:[%s4850_s3 + $0x110] sm:$0xff]  }
 0x212   : > { %3605 = vmatprep.subr.bf16.mxu1 %v3895_v58 }
 0x215   : > { %3606 = vmatpush3.bf16.msra.mxu1 %v3895_v58  ;;  %v3933_v58 = vld [vmem:[%s4850_s3 + $0x108] sm:$0xff]  }
 0x216   : > { %3607 = vmatprep.subr.bf16.mxu1 %v3897_v63 }
 0x219   : > { %3608 = vmatpush3.bf16.msra.mxu1 %v3897_v63  ;;  %v3943_v63 = vld [vmem:[%s4850_s3 + $0x160] sm:$0xff]  }
 0x21a   : > { %3609 = vmatprep.subr.bf16.mxu1 %v3899_v1 }
 0x21d   : > { %3610 = vmatpush3.bf16.msra.mxu1 %v3899_v1  ;;  %v3949_v1 = vld [vmem:[%s4850_s3 + $0x148] sm:$0xff]  }
 0x21e   : > { %3611 = vmatprep.subr.bf16.mxu1 %v3901_v2 }
 0x221   : > { %3612 = vmatpush3.bf16.msra.mxu1 %v3901_v2  ;;  %v3951_v2 = vld [vmem:[%s4850_s3 + $0x140] sm:$0xff]  }
 0x222   : > { %3613 = vmatprep.subr.bf16.mxu1 %v3903_v4 }
 0x225   : > { %3614 = vmatpush3.bf16.msra.mxu1 %v3903_v4  ;;  %v2230_v4 = vld [vmem:[#allocation2 + $0x7a] ss:$2 sm:$0xff] }
 0x226   : > { %3647 = vmatprep.subr.bf16.mxu1 %v3905_v12 }
 0x228   : > { %3616 = vmatmul.mubr.bf16.vlgmr.msra.gmra.mxu1 %v1377_v18  ;;  %v2242_v18 = vpack.c.bf16 %v2232_v9, %v2230_v4 }
 0x229   : > { %3648 = vmatpush3.bf16.msra.mxu1 %v3905_v12  ;;  %3619 = vmatprep.mubr.bf16.mxu1 %v1378_v20  ;;  %v3953_v12 = vld [vmem:[%s4850_s3 + $0x1f8] sm:$0xff]   ;;  %v2243_v20 = vpack.c.bf16 %v2236_v16, %v2234_v15 }
 0x22a   : > { %3649 = vmatprep.subr.bf16.mxu1 %v3907_v21 }
 0x22d   : > { %3650 = vmatpush3.bf16.msra.mxu1 %v3907_v21 }
 0x22e   : > { %3651 = vmatprep.subr.bf16.mxu1 %v3909_v34 }
 0x230   : > { %3620 = vmatmul.mubr.bf16.gmra.mxu1 %v1379_v52 }
 0x231   : > { %3652 = vmatpush3.bf16.msra.mxu1 %v3909_v34  ;;  %3663 = vmatprep.mubr.bf16.mxu1 %v1639_v17  ;;  %v2244_v34 = vpack.c.bf16 %v2240_v24, %v2238_v23  ;;  %v3961_v17 = vld [vmem:[%s4850_s3 + $0x1d8] sm:$0xff]  }
 0x232   : > { %3653 = vmatprep.subr.bf16.mxu1 %v3911_v41 }
 0x235   : > { %3654 = vmatpush3.bf16.msra.mxu1 %v3911_v41 }
 0x236   : > { %3655 = vmatprep.subr.bf16.mxu1 %v3913_v42 }
 0x239   : > { %3656 = vmatpush3.bf16.msra.mxu1 %v3913_v42  ;;  %v3963_v42 = vld [vmem:[%s4850_s3 + $0x1d0] sm:$0xff]  }
 0x23a   : > { %3657 = vmatprep.subr.bf16.mxu1 %v3915_v14 }
 0x23d   : > { %3658 = vmatpush3.bf16.msra.mxu1 %v3915_v14 }
 0x23e   : > { %3659 = vmatprep.subr.bf16.mxu1 %v3917_v7 }
 0x241   : > { %3660 = vmatpush3.bf16.msra.mxu1 %v3917_v7 }
 0x242   : > { %3661 = vmatprep.subr.bf16.mxu1 %v3919_v31 }
 0x245   : > { %3662 = vmatpush3.bf16.msra.mxu1 %v3919_v31  ;;  %v3965_v31 = vld [vmem:[%s4850_s3 + $0x1c8] sm:$0xff]  }
 0x246   : > { %3695 = vmatprep.subr.bf16.mxu1 %v3921_v56 }
 0x248   : > { %3664 = vmatmul.mubr.bf16.vlgmr.msra.gmra.mxu1 %v1640_v29  ;;  %v2550_v29 = vld [vmem:[#allocation2 + $0xf1] ss:$2 sm:$0xff] }
 0x249   : > { %3696 = vmatpush3.bf16.msra.mxu1 %v3921_v56  ;;  %3667 = vmatprep.mubr.bf16.mxu1 %v1641_v35  ;;  %v2546_v56 = vld [vmem:[#allocation2 + $0x91] ss:$2 sm:$0xff]  ;;  %v2552_v35 = vld [vmem:[#allocation2 + $0x121] ss:$2 sm:$0xff] }
 0x24a   : > { %3697 = vmatprep.subr.bf16.mxu1 %v3923_v43  ;;  %v2559_v44 = vpack.c.bf16 %v2552_v35, %v2550_v29 }
 0x24d   : > { %3698 = vmatpush3.bf16.msra.mxu1 %v3923_v43  ;;  %v2558_v43 = vpack.c.bf16 %v2548_v5, %v2546_v56 }
 0x24e   : > { %3699 = vmatprep.subr.bf16.mxu1 %v3925_v46 }
 0x250   : > { %3668 = vmatmul.mubr.bf16.gmra.mxu1 %v1642_v47  ;;  %v2556_v47 = vld [vmem:[#allocation2 + $0x181] ss:$2 sm:$0xff] }
 0x251   : > { %3700 = vmatpush3.bf16.msra.mxu1 %v3925_v46  ;;  %3711 = vmatprep.mubr.bf16.mxu1 %v4497_v27  ;;  %v3935_v27 = vld [vmem:[%s4850_s3 + $0x100] sm:$0xff]   ;;  %v2554_v46 = vld [vmem:[#allocation2 + $0x151] ss:$2 sm:$0xff] }
 0x252   : > { %3701 = vmatprep.subr.bf16.mxu1 %v3927_v49 }
 0x255   : > { %3702 = vmatpush3.bf16.msra.mxu1 %v3927_v49 }
 0x256   : > { %3703 = vmatprep.subr.bf16.mxu1 %v3929_v50 }
 0x259   : > { %3704 = vmatpush3.bf16.msra.mxu1 %v3929_v50  ;;  %v2708_v50 = vld [vmem:[#allocation2 + $0xf2] ss:$2 sm:$0xff] }
 0x25a   : > { %3705 = vmatprep.subr.bf16.mxu1 %v3931_v53 }
 0x25d   : > { %3706 = vmatpush3.bf16.msra.mxu1 %v3931_v53  ;;  %v2710_v53 = vld [vmem:[#allocation2 + $0x122] ss:$2 sm:$0xff] }
 0x25e   : > { %3707 = vmatprep.subr.bf16.mxu1 %v3933_v58 }
 0x261   : > { %3708 = vmatpush3.bf16.msra.mxu1 %v3933_v58  ;;  %v2560_v58 = vpack.c.bf16 %v2556_v47, %v2554_v46 }
 0x262   : > { %3709 = vmatprep.subr.bf16.mxu1 %v3935_v27 }
 0x265   : > { %3710 = vmatpush3.bf16.msra.mxu1 %v3935_v27  ;;  %v2717_v27 = vpack.c.bf16 %v2710_v53, %v2708_v50 }
 0x266   : > { %3743 = vmatprep.subr.bf16.mxu1 %v3937_v55 }
 0x268   : > { %3712 = vmatmul.mubr.bf16.vlgmr.msra.gmra.mxu1 %v4500_v32  ;;  %v3945_v32 = vld [vmem:[%s4850_s3 + $0x158] sm:$0xff]  }
 0x269   : > { %3744 = vmatpush3.bf16.msra.mxu1 %v3937_v55  ;;  %3715 = vmatprep.mubr.bf16.mxu1 %v4509_v38  ;;  %v3947_v38 = vld [vmem:[%s4850_s3 + $0x150] sm:$0xff]  }
 0x26a   : > { %3745 = vmatprep.subr.bf16.mxu1 %v3939_v57 }
 0x26d   : > { %3746 = vmatpush3.bf16.msra.mxu1 %v3939_v57 }
 0x26e   : > { %3747 = vmatprep.subr.bf16.mxu1 %v3941_v59 }
 0x270   : > { %3716 = vmatmul.mubr.bf16.gmra.mxu1 %v4512_v39  ;;  %v4684_v39 = vpop.f32.mrf.mxu0 }
 0x271   : > { %3748 = vmatpush3.bf16.msra.mxu1 %v3941_v59  ;;  %3759 = vmatprep.mubr.bf16.mxu1 %v2241_v61 }
 0x272   : > { %3749 = vmatprep.subr.bf16.mxu1 %v3943_v63  ;;  %v4689_v10 = vpop.f32.mrf.mxu0 }
 0x274   : > { %v4694_v21 = vpop.f32.mrf.mxu0 }
 0x275   : > { %3750 = vmatpush3.bf16.msra.mxu1 %v3943_v63  ;;  %v2714_v63 = vld [vmem:[#allocation2 + $0x182] ss:$2 sm:$0xff] }
 0x276   : > { %3751 = vmatprep.subr.bf16.mxu1 %v3945_v32  ;;  %v4699_v25 = vpop.f32.mrf.mxu0 }
 0x278   : > { %v4704_v33 = vpop.f32.mrf.mxu0 }
 0x279   : > { %3752 = vmatpush3.bf16.msra.mxu1 %v3945_v32 }
 0x27a   : > { %3753 = vmatprep.subr.bf16.mxu1 %v3947_v38  ;;  %v4709_v52 = vpop.f32.mrf.mxu0 }
 0x27c   : > { %v4714_v41 = vpop.f32.mrf.mxu0 }
 0x27d   : > { %3754 = vmatpush3.bf16.msra.mxu1 %v3947_v38 }
 0x27e   : > { %3755 = vmatprep.subr.bf16.mxu1 %v3949_v1  ;;  %v4719_v14 = vpop.f32.mrf.mxu0 }
 0x280   : > { %v4721_v7 = vpop.f32.mrf.mxu0 }
 0x281   : > { %3756 = vmatpush3.bf16.msra.mxu1 %v3949_v1 }
 0x282   : > { %3757 = vmatprep.subr.bf16.mxu1 %v3951_v2  ;;  %v4726_v40 = vpop.f32.mrf.mxu0 }
 0x284   : > { %v4731_v13 = vpop.f32.mrf.mxu0 }
 0x285   : > { %3758 = vmatpush3.bf16.msra.mxu1 %v3951_v2 }
 0x286   : > { %3791 = vmatprep.subr.bf16.mxu1 %v3953_v12  ;;  %v4733_v45 = vpop.f32.mrf.mxu0 }
 0x288   : > { %3760 = vmatmul.mubr.bf16.vlgmr.msra.gmra.mxu1 %v2242_v18  ;;  %v4737_v49 = vpop.f32.mrf.mxu0 }
 0x289   : > { %3792 = vmatpush3.bf16.msra.mxu1 %v3953_v12  ;;  %3763 = vmatprep.mubr.bf16.mxu1 %v2243_v20 }
 0x28a   : > { %3793 = vmatprep.subr.bf16.mxu1 %v3955_v22  ;;  %v4741_v55 = vpop.f32.mrf.mxu0 }
 0x28d   : > { %3794 = vmatpush3.bf16.msra.mxu1 %v3955_v22 }
 0x28e   : > { %3795 = vmatprep.subr.bf16.mxu1 %v3957_v26 }
 0x290   : > { %3764 = vmatmul.mubr.bf16.gmra.mxu1 %v2244_v34 }
 0x291   : > { %3796 = vmatpush3.bf16.msra.mxu1 %v3957_v26  ;;  %3807 = vmatprep.mubr.bf16.mxu1 %v2557_v36 }
 0x292   : > { %3797 = vmatprep.subr.bf16.mxu1 %v3959_v37 }
 0x295   : > { %3798 = vmatpush3.bf16.msra.mxu1 %v3959_v37 }
 0x296   : > { %3799 = vmatprep.subr.bf16.mxu1 %v3961_v17 }
 0x299   : > { %3800 = vmatpush3.bf16.msra.mxu1 %v3961_v17 }
 0x29a   : > { %3801 = vmatprep.subr.bf16.mxu1 %v3963_v42 }
 0x29d   : > { %3802 = vmatpush3.bf16.msra.mxu1 %v3963_v42 }
 0x29e   : > { %3803 = vmatprep.subr.bf16.mxu1 %v3965_v31 }
 0x2a1   : > { %3804 = vmatpush3.bf16.msra.mxu1 %v3965_v31 }
 0x2a2   : > { %3805 = vmatprep.subr.bf16.mxu1 %v3967_v48 }
 0x2a5   : > { %3806 = vmatpush3.bf16.msra.mxu1 %v3967_v48 }
 0x2a6   : > { %3839 = vmatprep.subr.bf16.mxu1 %v4539_v51 }
 0x2a8   : > { %3808 = vmatmul.mubr.bf16.vlgmr.msra.gmra.mxu1 %v2558_v43 }
 0x2a9   : > { %3847 = vmatpush3.bf16.msra.mxu1 %v4539_v51  ;;  %3811 = vmatprep.mubr.bf16.mxu1 %v2559_v44  ;;  %v4745_v51 = vpop.f32.mrf.mxu0 }
 0x2aa   : > { %3840 = vmatprep.subr.bf16.mxu1 %v4550_v54 }
 0x2ab   : > { %v4749_v57 = vpop.f32.mrf.mxu0 }
 0x2ad   : > { %3848 = vmatpush3.bf16.msra.mxu1 %v4550_v54  ;;  %v3737_v54 = vpop.f32.mrf.mxu0 }
 0x2ae   : > { %3841 = vmatprep.subr.bf16.mxu1 %v4560_v62 }
 0x2af   : > { %v2194_v59 = vpop.f32.mrf.mxu0 }
 0x2b0   : > { %3812 = vmatmul.mubr.bf16.gmra.mxu1 %v2560_v58 }
 0x2b1   : > { %3849 = vmatpush3.bf16.msra.mxu1 %v4560_v62  ;;  %3835 = vmatprep.mubr.bf16.mxu1 %v2717_v27  ;;  %v3738_v62 = vpop.f32.mrf.mxu0 }
 0x2b2   : > { %3842 = vmatprep.subr.bf16.mxu1 %v4570_v0  ;;  %v3330_v60 = vpack.c.bf16 %v3738_v62, %v3737_v54 }
 0x2b4   : > { %3345 = vst [vmem:[%s434_s24 + $0x8] sm:$0xff] %v3330_v60  }
 0x2b5   : > { %3850 = vmatpush3.bf16.msra.mxu1 %v4570_v0  ;;  %v2197_v0 = vpop.f32.mrf.mxu0 }
 0x2b6   : > { %3843 = vmatprep.subr.bf16.mxu1 %v4580_v11  ;;  %v3325_v8 = vpack.c.bf16 %v2197_v0, %v2194_v59 }
 0x2b7   : > { %v3741_v61 = vpop.f32.mrf.mxu0 }
 0x2b8   : > { %3326 = vst [vmem:[%s434_s24] sm:$0xff] %v3325_v8  }
 0x2b9   : > { %3851 = vmatpush3.bf16.msra.mxu1 %v4580_v11  ;;  %v2712_v11 = vld [vmem:[#allocation2 + $0x152] ss:$2 sm:$0xff]  ;;  %v2210_v32 = vpop.f32.mrf.mxu0 }
 0x2ba   : > { %3844 = vmatprep.subr.bf16.mxu1 %v4590_v3  ;;  %v2718_v1 = vpack.c.bf16 %v2714_v63, %v2712_v11 }
 0x2bb   : > { %v3742_v38 = vpop.f32.mrf.mxu0 }
 0x2bc   : > { %v3340_v2 = vpack.c.bf16 %v3742_v38, %v3741_v61 }
 0x2bd   : > { %3852 = vmatpush3.bf16.msra.mxu1 %v4590_v3  ;;  %v2213_v3 = vpop.f32.mrf.mxu0 }
 0x2be   : > { %3845 = vmatprep.subr.bf16.mxu1 %v4600_v6  ;;  %3347 = vst [vmem:[%s434_s24 + $0x18] sm:$0xff] %v3340_v2   ;;  %v3335_v4 = vpack.c.bf16 %v2213_v3, %v2210_v32 }
 0x2c0   : > { %3346 = vst [vmem:[%s434_s24 + $0x10] sm:$0xff] %v3335_v4  }
 0x2c1   : > { %3853 = vmatpush3.bf16.msra.mxu1 %v4600_v6 }
 0x2c2   : > { %3846 = vmatprep.subr.bf16.mxu1 %v4610_v19 }
 0x2c5   : > { %3854 = vmatpush3.bf16.msra.mxu1 %v4610_v19 }
 0x2c8   : > { %3836 = vmatmul.mubr.bf16.vlgmr.msra.gmra.mxu1 %v2718_v1  ;;  %v1100_v9 = vpop.f32.mrf.mxu1 }
 0x2c9   : > { %v1104_v12 = vsub.f32 0.0, %v1100_v9 }
 0x2ca   : > { %v3598_v15 = vpop.f32.mrf.mxu1 }
 0x2cb   : > { %v1105_v6 = vmul.f32 1.442695, %v1104_v12 }
 0x2cd   : > { %3985 = vpow2.f32 %v1105_v6 }
 0x2da   : > { %v3986_v16 = vpop.eup %3985 }
 0x2db   : > { %v1107_v18 = vadd.f32 1.0, %v3986_v16 }
 0x2dd   : > { %3987 = vrcp.f32 %v1107_v18 }
 0x2e8   : > { %v3617_v19 = vpop.f32.mrf.mxu1 }
 0x2e9   : > { %v1601_v1 = vadd.f32 %v4684_v39, %v3617_v19 }
 0x2ea   : > { %v3988_v20 = vpop.eup %3987  ;;  %v1479_v22 = vpop.f32.mrf.mxu1 }
 0x2eb   : > { %1110 = vst [vmem:[%s429_s27] sm:$0x1] %v3988_v20  ;;  %v1593_v3 = vadd.f32 %v4689_v10, %v1479_v22 }
 0x2ec   : > { %v3618_v23 = vpop.f32.mrf.mxu1 }
 0x2ed   : > { %v1604_v4 = vadd.f32 %v4694_v21, %v3618_v23 }
 0x2ee   : > { %v1482_v24 = vpop.f32.mrf.mxu1 }
 0x2ef   : > { %v1596_v15 = vadd.f32 %v4699_v25, %v1482_v24 }
 0x2f0   : > { %v3621_v26 = vpop.f32.mrf.mxu1 }
 0x2f1   : > { %v1617_v31 = vadd.f32 %v4704_v33, %v3621_v26 }
 0x2f2   : > { %v1495_v28 = vpop.f32.mrf.mxu1 }
 0x2f3   : > { %v1609_v56 = vadd.f32 %v4709_v52, %v1495_v28  ;;  %v3785_v52 = vpop.f32.mrf.mxu0 }
 0x2f4   : > { %v4769_v30 = vpop.f32.mrf.mxu1 }
 0x2f5   : > { %v2502_v59 = vpop.f32.mrf.mxu0 }
 0x2f6   : > { %v4771_v34 = vpop.f32.mrf.mxu1 }
 0x2f7   : > { %v3786_v60 = vpop.f32.mrf.mxu0 }
 0x2f9   : > { %v2505_v8 = vpop.f32.mrf.mxu0 }
 0x2fb   : > { %v4791_v11 = vpop.f32.mrf.mxu0 }
 0x2fd   : > { %v4793_v32 = vpop.f32.mrf.mxu0 }
 0x2ff   : > { %v4798_v2 = vpop.f32.mrf.mxu0 }
 0x301   : > { %v4805_v18 = vpop.f32.mrf.mxu0 }
 0x303   : > { %v3833_v39 = vpop.f32.mrf.mxu0 }
 0x305   : > { %v2818_v24 = vpop.f32.mrf.mxu0 }
 0x308   : > { %v3665_v36 = vpop.f32.mrf.mxu1 }
 0x309   : > { %v1775_v9 = vadd.f32 %v3665_v36, %v1601_v1  ;;  %v3834_v1 = vpop.f32.mrf.mxu0 }
 0x30a   : > { %v1742_v37 = vpop.f32.mrf.mxu1 }
 0x30b   : > { %v1773_v6 = vadd.f32 %v1742_v37, %v1593_v3  ;;  %v1932_v20 = vadd.f32 %v4721_v7, %v1775_v9 }
 0x30c   : > { %v3666_v17 = vpop.f32.mrf.mxu1 }
 0x30d   : > { %v1776_v16 = vadd.f32 %v3666_v17, %v1604_v4  ;;  %v1930_v19 = vadd.f32 %v4726_v40, %v1773_v6 }
 0x30e   : > { %v1745_v42 = vpop.f32.mrf.mxu1 }
 0x30f   : > { %v1774_v26 = vadd.f32 %v1745_v42, %v1596_v15  ;;  %v1933_v10 = vadd.f32 %v4731_v13, %v1776_v16 }
 0x310   : > { %v3669_v48 = vpop.f32.mrf.mxu1 }
 0x311   : > { %v4775_v5 = vadd.f32 %v3669_v48, %v1617_v31  ;;  %v1931_v21 = vadd.f32 %v4733_v45, %v1774_v26 }
 0x312   : > { %v1758_v29 = vpop.f32.mrf.mxu1 }
 0x313   : > { %v4777_v35 = vadd.f32 %v1758_v29, %v1609_v56  ;;  %v1936_v26 = vadd.f32 %v4737_v49, %v4775_v5 }
 0x314   : > { %v4779_v43 = vpop.f32.mrf.mxu1 }
 0x316   : > { %v4781_v44 = vpop.f32.mrf.mxu1 }
 0x328   : > { %v3713_v46 = vpop.f32.mrf.mxu1 }
 0x329   : > { %v2090_v22 = vadd.f32 %v3713_v46, %v1932_v20 }
 0x32a   : > { %v2057_v47 = vpop.f32.mrf.mxu1 }
 0x32b   : > { %v2088_v23 = vadd.f32 %v2057_v47, %v1930_v19 }
 0x32c   : > { %v3714_v50 = vpop.f32.mrf.mxu1 }
 0x32d   : > { %v2091_v36 = vadd.f32 %v3714_v50, %v1933_v10  ;;  %v1934_v10 = vadd.f32 %v4741_v55, %v4777_v35 }
 0x32e   : > { %v2060_v53 = vpop.f32.mrf.mxu1 }
 0x32f   : > { %v2089_v37 = vadd.f32 %v2060_v53, %v1931_v21 }
 0x330   : > { %v4783_v58 = vpop.f32.mrf.mxu1 }
 0x332   : > { %v4785_v27 = vpop.f32.mrf.mxu1 }
 0x334   : > { %v4787_v33 = vpop.f32.mrf.mxu1 }
 0x336   : > { %v4789_v54 = vpop.f32.mrf.mxu1 }
 0x348   : > { %v3761_v62 = vpop.f32.mrf.mxu1 }
 0x349   : > { %v2377_v31 = vadd.f32 %v3761_v62, %v2090_v22  ;;  %v2821_v62 = vpop.f32.mrf.mxu0 }
 0x34a   : > { %v2344_v0 = vpop.f32.mrf.mxu1 }
 0x34b   : > { %v2375_v17 = vadd.f32 %v2344_v0, %v2088_v23  ;;  %v2535_v7 = vadd.f32 %v3785_v52, %v2377_v31 }
 0x34c   : > { %v3762_v61 = vpop.f32.mrf.mxu1 }
 0x34d   : > { %v2378_v48 = vadd.f32 %v3762_v61, %v2091_v36  ;;  %v2533_v40 = vadd.f32 %v2502_v59, %v2375_v17  ;;  %v1620_v61 = vadd.f32 %v4714_v41, %v4769_v30  ;;  %v2094_v41 = vadd.f32 %v4783_v58, %v1936_v26 }
 0x34e   : > { %v2347_v63 = vpop.f32.mrf.mxu1  ;;  %v2092_v30 = vadd.f32 %v4785_v27, %v1934_v10 }
 0x34f   : > { %v2376_v42 = vadd.f32 %v2347_v63, %v2089_v37  ;;  %v2536_v3 = vadd.f32 %v3786_v60, %v2378_v48  ;;  %v1612_v63 = vadd.f32 %v4719_v14, %v4771_v34  ;;  %v1780_v6 = vadd.f32 %v4779_v43, %v1620_v61 }
 0x350   : > { %v4795_v38 = vpop.f32.mrf.mxu1 }
 0x351   : > { %v2534_v4 = vadd.f32 %v2505_v8, %v2376_v42  ;;  %v1778_v20 = vadd.f32 %v4781_v44, %v1612_v63  ;;  %v2381_v43 = vadd.f32 %v4795_v38, %v2094_v41 }
 0x352   : > { %v4802_v12 = vpop.f32.mrf.mxu1 }
 0x353   : > { %v1935_v22 = vadd.f32 %v4749_v57, %v1778_v20  ;;  %v2539_v55 = vadd.f32 %v4791_v11, %v2381_v43 }
 0x354   : > { %v3766_v28 = vpop.f32.mrf.mxu1 }
 0x355   : > { %v2093_v34 = vadd.f32 %v4789_v54, %v1935_v22 }
 0x356   : > { %v2363_v25 = vpop.f32.mrf.mxu1 }
 0x357   : > { %v2380_v5 = vadd.f32 %v2363_v25, %v2093_v34 }
 0x359   : > { %v2538_v27 = vadd.f32 %v4805_v18, %v2380_v5 }
 0x368   : > { %v3809_v56 = vpop.f32.mrf.mxu1 }
 0x369   : > { %v2693_v13 = vadd.f32 %v3809_v56, %v2535_v7 }
 0x36a   : > { %v2660_v29 = vpop.f32.mrf.mxu1 }
 0x36b   : > { %v2691_v45 = vadd.f32 %v2660_v29, %v2533_v40  ;;  %v2851_v9 = vadd.f32 %v3833_v39, %v2693_v13  ;;  %v1937_v39 = vadd.f32 %v4745_v51, %v1780_v6  ;;  %v2379_v51 = vadd.f32 %v4802_v12, %v2092_v30 }
 0x36c   : > { %v3810_v46 = vpop.f32.mrf.mxu1 }
 0x36d   : > { %v2694_v47 = vadd.f32 %v3810_v46, %v2536_v3  ;;  %v2849_v52 = vadd.f32 %v2818_v24, %v2691_v45  ;;  %v2095_v14 = vadd.f32 %v4787_v33, %v1937_v39  ;;  %v2537_v58 = vadd.f32 %v4793_v32, %v2379_v51 }
 0x36e   : > { %v2663_v50 = vpop.f32.mrf.mxu1 }
 0x36f   : > { %v2692_v15 = vadd.f32 %v2663_v50, %v2534_v4  ;;  %v2852_v53 = vadd.f32 %v3834_v1, %v2694_v47  ;;  %v2382_v44 = vadd.f32 %v3766_v28, %v2095_v14 }
 0x370   : > { %v3813_v8 = vpop.f32.mrf.mxu1 }
 0x371   : > { %v3310_v59 = vpack.c.bf16 %v2852_v53, %v2851_v9  ;;  %v2850_v60 = vadd.f32 %v2821_v62, %v2692_v15  ;;  %v2540_v57 = vadd.f32 %v4798_v2, %v2382_v44  ;;  %v2697_v33 = vadd.f32 %v3813_v8, %v2539_v55 }
 0x372   : > { %v2676_v16 = vpop.f32.mrf.mxu1 }
 0x373   : > { %3342 = vst [vmem:[%s4816_s30 + $0x8] sm:$0xff] %v3310_v59   ;;  %v3305_v0 = vpack.c.bf16 %v2850_v60, %v2849_v52  ;;  %v2695_v28 = vadd.f32 %v2676_v16, %v2537_v58 }
 0x374   : > { %v3814_v19 = vpop.f32.mrf.mxu1 }
 0x375   : > { %3306 = vst [vmem:[%s4816_s30] sm:$0xff] %v3305_v0   ;;  %v2698_v54 = vadd.f32 %v3814_v19, %v2540_v57 }
 0x376   : > { %v2679_v49 = vpop.f32.mrf.mxu1 }
 0x377   : > { %v2696_v23 = vadd.f32 %v2679_v49, %v2538_v27 }
 0x388   : > { %v3837_v21 = vpop.f32.mrf.mxu1 }
 0x389   : > { %v2855_v36 = vadd.f32 %v3837_v21, %v2697_v33 }
 0x38a   : > { %v2834_v35 = vpop.f32.mrf.mxu1 }
 0x38b   : > { %v2853_v25 = vadd.f32 %v2834_v35, %v2695_v28 }
 0x38c   : > { %v3838_v38 = vpop.f32.mrf.mxu1 }
 0x38d   : > { %v2856_v12 = vadd.f32 %v3838_v38, %v2698_v54 }
 0x38e   : > { %v2837_v31 = vpop.f32.mrf.mxu1 }
 0x38f   : > { %v3320_v24 = vpack.c.bf16 %v2856_v12, %v2855_v36  ;;  %v2854_v11 = vadd.f32 %v2837_v31, %v2696_v23 }
 0x391   : > { %3344 = vst [vmem:[%s4816_s30 + $0x18] sm:$0xff] %v3320_v24   ;;  %v3315_v37 = vpack.c.bf16 %v2854_v11, %v2853_v25 }
 0x393   : > { %3343 = vst [vmem:[%s4816_s30 + $0x10] sm:$0xff] %v3315_v37  }
 0x394 PF: > { %s23_s21 = sadd.s32 1, %s3995_s21  }
 0x395   : > { %p20_p4 = scmp.ge.s32.totalorder %s23_s21, 4  }
 0x397   :  { %22 = sbr.rel (!%p20_p4) target bundleno = 1 (0x1), region = 194 }

</bundles_post_ra>
